<compile_context>
chip_gen: v5e
topology: v5e:2x2
jax: 0.10.0
libtpu: 0.0.40
codegen_flags: <defaults>
</compile_context>

<pallas_src>
import functools
import math

import jax
import jax.numpy as jnp
from jax.experimental import pallas as pl
from jax.experimental.pallas import tpu as pltpu


# ----------------------------------------------------------------------------- #
# Plain-JAX glue: farthest point sampling, kNN, gathers (pytorch3d.ops analogue) #
# ----------------------------------------------------------------------------- #
def farthest_point_sampling(x, num_samples):
    """x: (B, N, 3) -> (Q:(B,K,3), idx:(B,K)). Deterministic start at index 0."""
    B, N, _ = x.shape
    last = jnp.zeros((B,), dtype=jnp.int32)
    selected = [last]
    min_d2 = jnp.full((B, N), jnp.inf, dtype=jnp.float32)
    for _ in range(num_samples - 1):
        last_pt = jnp.take_along_axis(x, last[:, None, None], axis=1)  # (B,1,3)
        d2 = jnp.sum((x - last_pt) ** 2, axis=-1)                      # (B,N)
        min_d2 = jnp.minimum(min_d2, d2)
        last = jnp.argmax(min_d2, axis=-1).astype(jnp.int32)
        selected.append(last)
    idx = jnp.stack(selected, axis=1)                                  # (B,K)
    q = jnp.take_along_axis(x, idx[:, :, None], axis=1)                # (B,K,3)
    return q, idx


def knn_points(q, x, k):
    """q: (B,M,3), x: (B,N,3) -> idx (B,M,k) sorted by ascending distance."""
    d2 = jnp.sum((q[:, :, None, :] - x[:, None, :, :]) ** 2, axis=-1)  # (B,M,N)
    _, idx = jax.lax.top_k(-d2, k)
    return idx


def batched_gather(points, idx):
    """points: (B,N,C), idx: (B,M,k) -> (B,M,k,C)."""
    return jax.vmap(lambda p, i: p[i])(points, idx)


def _prepare_neighborhoods(X, F_feat, *, k, mc_num):
    """FPS + kNN + gather + to_spherical angle.  Returns (Q, theta:(B,Np), knn_f:(B,Np,in))."""
    B, N, _ = X.shape
    in_dim = F_feat.shape[-1]
    Np = mc_num * k
    Q, _ = farthest_point_sampling(X, mc_num)                           # (B, mc_num, 3)
    idx = knn_points(Q, X, k)                                           # (B, mc_num, k)
    knn_x = batched_gather(X, idx).reshape(B, Np, 3)
    knn_x = knn_x / jnp.maximum(jnp.linalg.norm(knn_x, axis=-1, keepdims=True), 1e-12)
    knn_f = batched_gather(F_feat, idx).reshape(B, Np, in_dim)
    # Rotating each group so its first point maps to the north pole makes the post-rotation
    # z-coordinate equal dot(x, q_first); theta = acos(.)  (rotation_between_s2points analogue).
    xg = knn_x.reshape(B, mc_num, k, 3)
    q_first = xg[:, :, 0:1, :]
    cosang = jnp.sum(xg * q_first, axis=-1)                             # (B, mc_num, k)
    cosang = jnp.clip(cosang, -1.0 + 1e-6, 1.0 - 1e-6)
    theta = jnp.arccos(cosang).reshape(B, Np)
    return Q, theta, knn_f


# ------------------------------------------------------- #
# Parameter packing: one f32 slab with static row offsets #
# ------------------------------------------------------- #
def _round_up(v, m):
    return (v + m - 1) // m * m


def _gelu_tanh(x):
    # TODO(synk): PyTorch nn.GELU() is erf-exact; using the tanh approximation (numerics only).
    c = jnp.float32(0.7978845608028654)  # sqrt(2/pi)
    return 0.5 * x * (1.0 + jnp.tanh(c * (x + 0.044715 * x * x * x)))


def pack_filter_params(params, *, in_dim, out_dim, fourier_dim, hidden_dim, freq, do_norm):
    """Pack (frozen fourier W, filter MLP weights) into one (rows, cols) f32 slab.

    The last Linear(H, out*in) is re-laid-out into per-input-channel (H, out) blocks so that the
    kernel can fold the (kernel * F).sum(in_dim) contraction into its matmuls (no selection
    matrix, no feature tiling).
    """
    wf_raw, w1, b1, w2, b2, w3, b3 = params
    if do_norm:
        wf = wf_raw / jnp.linalg.norm(wf_raw) * jnp.pi * freq
    else:
        wf = wf_raw * jnp.pi * freq
    w1a, w1b = w1[:fourier_dim], w1[fourier_dim:]                       # sin / cos halves
    # kernel flat layout is out-major / in-minor (matches .view(..., out_dim, in_dim)):
    w3_per_in = jnp.transpose(w3.reshape(hidden_dim, out_dim, in_dim), (2, 0, 1))  # (in, H, out)
    b3_per_in = jnp.transpose(b3.reshape(out_dim, in_dim), (1, 0))                 # (in, out)

    cols = max(hidden_dim, fourier_dim, out_dim)
    off = {"wf": 0, "b1": 8, "b2": 16, "b3": 24}                        # 8-aligned row blocks
    mat0 = _round_up(off["b3"] + in_dim, 8)
    off["w1a"] = mat0
    off["w1b"] = mat0 + fourier_dim
    off["w2"] = mat0 + 2 * fourier_dim
    off["w3"] = mat0 + 2 * fourier_dim + hidden_dim
    rows = _round_up(off["w3"] + in_dim * hidden_dim, 8)

    slab = jnp.zeros((rows, cols), jnp.float32)
    slab = slab.at[off["wf"], :fourier_dim].set(wf.reshape(-1))
    slab = slab.at[off["b1"], :hidden_dim].set(b1.reshape(-1))
    slab = slab.at[off["b2"], :hidden_dim].set(b2.reshape(-1))
    slab = slab.at[off["b3"]:off["b3"] + in_dim, :out_dim].set(b3_per_in)
    slab = slab.at[off["w1a"]:off["w1a"] + fourier_dim, :hidden_dim].set(w1a)
    slab = slab.at[off["w1b"]:off["w1b"] + fourier_dim, :hidden_dim].set(w1b)
    slab = slab.at[off["w2"]:off["w2"] + hidden_dim, :hidden_dim].set(w2)
    slab = slab.at[off["w3"]:off["w3"] + in_dim * hidden_dim, :out_dim].set(
        w3_per_in.reshape(in_dim * hidden_dim, out_dim))
    return slab, off


# -------------------------------------------- #
# Pallas kernel: fused SO3EquivConvBlock steps  #
# -------------------------------------------- #
def _so3_block_kernel(pts_ref, w_ref, o_ref, *, np_per_batch, mc_num, k, in_dim,
                      out_dim, fourier_dim, hidden_dim, off, mxu_dtype):
    bb = pts_ref.shape[0]                      # fused batches per grid step
    rows = bb * np_per_batch                   # matmul M dimension
    groups = bb * mc_num

    # One dense input block: lane 0 = theta, lanes 1..in_dim = features.
    pf = pts_ref[...].reshape(rows, in_dim + 1)      # cheap leading-dim collapse
    th = pf[:, 0:1]                                  # (rows, 1)
    feat = pf[:, 1:1 + in_dim]                       # (rows, in_dim)

    # Weight slab: static row-offset slices (single operand, fetched once).
    wf = w_ref[off["wf"]:off["wf"] + 1, :][:, :fourier_dim]             # (1, F)  pre-scaled
    b1 = w_ref[off["b1"]:off["b1"] + 1, :][:, :hidden_dim]              # (1, H)
    b2 = w_ref[off["b2"]:off["b2"] + 1, :][:, :hidden_dim]              # (1, H)
    b3 = w_ref[off["b3"]:off["b3"] + in_dim, :][:, :out_dim]            # (in, out)
    w1a = w_ref[off["w1a"]:off["w1a"] + fourier_dim, :][:, :hidden_dim].astype(mxu_dtype)
    w1b = w_ref[off["w1b"]:off["w1b"] + fourier_dim, :][:, :hidden_dim].astype(mxu_dtype)
    w2 = w_ref[off["w2"]:off["w2"] + hidden_dim, :][:, :hidden_dim].astype(mxu_dtype)

    # Fourier features: theta * (W * pi * freq) -> [sin, cos]  (f32 elementwise; v5e-safe).
    proj = th * wf                                   # (rows, F)
    s = jnp.sin(proj)
    c = jnp.cos(proj)

    # filter MLP: Linear(2F,H) -> GELU -> Linear(H,H) -> GELU -> Linear(H, out*in)
    # ([sin,cos] @ W1 split as sin @ W1a + cos @ W1b to avoid a lane concat).
    # TODO(synk): hidden_num=2 (the module's default MLP depth) is hard-coded.
    h = (jnp.dot(s.astype(mxu_dtype), w1a, preferred_element_type=jnp.float32)
         + jnp.dot(c.astype(mxu_dtype), w1b, preferred_element_type=jnp.float32)
         + b1)
    h = _gelu_tanh(h)
    h = jnp.dot(h.astype(mxu_dtype), w2, preferred_element_type=jnp.float32) + b2
    h = _gelu_tanh(h)
    h_mx = h.astype(mxu_dtype)

    # Last Linear folded with the (kernel * F).sum(in_dim) contraction:
    #   conv[:, o] = sum_i (h @ W3_i + b3_i)[:, o] * feat[:, i]
    conv = None
    for i in range(in_dim):
        w3_i = w_ref[off["w3"] + i * hidden_dim:
                     off["w3"] + (i + 1) * hidden_dim, :][:, :out_dim].astype(mxu_dtype)
        k_i = jnp.dot(h_mx, w3_i, preferred_element_type=jnp.float32) + b3[i:i + 1, :]
        term = k_i * feat[:, i:i + 1]
        conv = term if conv is None else conv + term                    # (rows, out)

    # Mean over the k neighbors of each group, via an in-kernel iota mask + MXU matmul.
    g_ids = jax.lax.broadcasted_iota(jnp.int32, (groups, rows), 0)
    r_ids = jax.lax.broadcasted_iota(jnp.int32, (groups, rows), 1)
    lo = g_ids * k
    avg = jnp.where((r_ids >= lo) & (r_ids < lo + k),
                    jnp.float32(1.0 / k), jnp.float32(0.0))             # (groups, rows)
    pooled = jnp.maximum(
        jnp.dot(avg, conv, preferred_element_type=jnp.float32), 0.0)    # (groups, out), ReLU

    # Lane-dense store: one (1, groups*out_dim) row per step (wrapper reshapes back).
    row = jnp.concatenate([pooled[g:g + 1, :] for g in range(groups)], axis=-1)
    o_ref[0] = row


def _pick_batches_per_step(B, Np, mc_num, target_rows=512, max_groups=64):
    """Fuse batches per step to amortize the ~0.35us/step overhead, keep >=2 steps (v7x 2 TCs)."""
    cap = max(1, min(target_rows // max(Np, 1), max_groups // max(mc_num, 1)))
    if B >= 2:
        cap = min(cap, max(1, B // 2))
    bb = 1
    for d in range(1, min(cap, B) + 1):
        if B % d == 0:
            bb = d
    return bb


def so3_conv_block_pallas(theta, feat, w_slab, off, *, mc_num, k, in_dim, out_dim,
                          fourier_dim, hidden_dim, mxu_dtype=jnp.bfloat16,
                          target_rows=512):
    """theta: (B, Np), feat: (B, Np, in_dim), Np = mc_num*k -> (B, mc_num, out_dim)."""
    B, Np = theta.shape
    assert Np == mc_num * k
    assert feat.shape == (B, Np, in_dim)

    bb = _pick_batches_per_step(B, Np, mc_num, target_rows)
    steps = B // bb
    out_cols = bb * mc_num * out_dim

    # Single dense point operand: lane 0 = theta, lanes 1.. = features.
    pts = jnp.concatenate([theta[..., None], feat], axis=-1)            # (B, Np, in_dim+1)

    kern = functools.partial(
        _so3_block_kernel, np_per_batch=Np, mc_num=mc_num, k=k, in_dim=in_dim,
        out_dim=out_dim, fourier_dim=fourier_dim, hidden_dim=hidden_dim,
        off=off, mxu_dtype=mxu_dtype)

    out = pl.pallas_call(
        kern,
        out_shape=jax.ShapeDtypeStruct((steps, 1, out_cols), jnp.float32),
        grid=(steps,),
        in_specs=[
            pl.BlockSpec((bb, Np, in_dim + 1), lambda i: (i, 0, 0)),     # fused point block
            pl.BlockSpec(w_slab.shape, lambda i: (0, 0)),                # weight slab (fetched once)
        ],
        out_specs=pl.BlockSpec((1, 1, out_cols), lambda i: (i, 0, 0)),   # lane-dense output row
        compiler_params=pltpu.CompilerParams(dimension_semantics=("parallel",)),
    )(pts, w_slab)
    return out.reshape(B, mc_num, out_dim)


# ---------------------------------------- #
# Full SO3EquivConv forward (JAX wrapper)  #
# ---------------------------------------- #
def so3_equiv_conv(X, F_feat, params, *, k, mc_num, in_dim, out_dim, fourier_dim,
                   hidden_dim, freq, do_norm, mxu_dtype=jnp.bfloat16):
    Q, theta, knn_f = _prepare_neighborhoods(X, F_feat, k=k, mc_num=mc_num)
    slab, off = pack_filter_params(params, in_dim=in_dim, out_dim=out_dim,
                                   fourier_dim=fourier_dim, hidden_dim=hidden_dim,
                                   freq=freq, do_norm=do_norm)
    conv = so3_conv_block_pallas(theta, knn_f, slab, off, mc_num=mc_num, k=k,
                                 in_dim=in_dim, out_dim=out_dim,
                                 fourier_dim=fourier_dim, hidden_dim=hidden_dim,
                                 mxu_dtype=mxu_dtype)
    return Q, conv


def so3_block_reference(theta, feat, params, *, mc_num, k, in_dim, out_dim,
                        fourier_dim, freq, do_norm):
    """Pure-JAX reference of the block (same math as the PyTorch forward, + outer ReLU)."""
    wf_raw, w1, b1, w2, b2, w3, b3 = params
    if do_norm:
        wf = wf_raw / jnp.linalg.norm(wf_raw) * jnp.pi * freq
    else:
        wf = wf_raw * jnp.pi * freq
    B, Np = theta.shape
    proj = theta[..., None] * wf.reshape(1, 1, fourier_dim)
    ff = jnp.concatenate([jnp.sin(proj), jnp.cos(proj)], axis=-1)
    h = _gelu_tanh(ff @ w1 + b1)
    h = _gelu_tanh(h @ w2 + b2)
    kern = (h @ w3 + b3).reshape(B, mc_num, k, out_dim, in_dim)
    fexp = feat.reshape(B, mc_num, k, 1, in_dim)
    conv = (kern * fexp).sum(-1).mean(-2)
    return jnp.maximum(conv, 0.0)


def init_params(key, in_dim, out_dim, fourier_dim, hidden_dim):
    """Deterministic synthetic parameters (shapes follow SO3EquivConvBlock, hidden_num=2)."""
    ks = jax.random.split(key, 7)

    def uniform(kk, shape, fan_in):
        bound = 1.0 / math.sqrt(fan_in)
        return jax.random.uniform(kk, shape, jnp.float32, -bound, bound)

    wf = jax.random.normal(ks[0], (1, fourier_dim), jnp.float32)            # frozen fourier W
    w1 = uniform(ks[1], (2 * fourier_dim, hidden_dim), 2 * fourier_dim)     # Linear(2F, H)
    b1 = uniform(ks[2], (hidden_dim,), 2 * fourier_dim)
    w2 = uniform(ks[3], (hidden_dim, hidden_dim), hidden_dim)               # Linear(H, H)
    b2 = uniform(ks[4], (hidden_dim,), hidden_dim)
    w3 = uniform(ks[5], (hidden_dim, out_dim * in_dim), hidden_dim)         # Linear(H, out*in)
    b3 = uniform(ks[6], (out_dim * in_dim,), hidden_dim)
    return (wf, w1, b1, w2, b2, w3, b3)


if __name__ == "__main__":
    B, N = 2, 64
    in_dim, out_dim = 4, 8
    fourier_dim, hidden_dim = 16, 32
    k, mc_num, freq = 16, 4, 16
    do_norm = False

    key = jax.random.PRNGKey(0)
    kx, kf, kp = jax.random.split(key, 3)
    X = jax.random.normal(kx, (B, N, 3), jnp.float32)
    F = jax.random.normal(kf, (B, N, in_dim), jnp.float32)
    params = init_params(kp, in_dim, out_dim, fourier_dim, hidden_dim)

    Q, out = so3_equiv_conv(
        X, F, params,
        k=k, mc_num=mc_num, in_dim=in_dim, out_dim=out_dim,
        fourier_dim=fourier_dim, hidden_dim=hidden_dim,
        freq=freq, do_norm=do_norm)

    jax.block_until_ready((Q, out))
    assert Q.shape == (B, mc_num, 3)
    assert out.shape == (B, mc_num, out_dim)

    # Sanity check against a pure-JAX reference of the block (bf16 MXU -> loose tolerance).
    _, theta, knn_f = _prepare_neighborhoods(X, F, k=k, mc_num=mc_num)
    ref = so3_block_reference(theta, knn_f, params, mc_num=mc_num, k=k,
                              in_dim=in_dim, out_dim=out_dim,
                              fourier_dim=fourier_dim, freq=freq, do_norm=do_norm)
    err = float(jnp.max(jnp.abs(out - ref)))
    assert err < 1e-1, f"max abs error vs reference: {err}"

    print("KERNEL_OK")
</pallas_src>

<mosaic_0001>
module attributes {stable_mosaic.version = 11 : i64} {
  func.func @_so3_block_kernel(%arg0: i32, %arg1: memref<1x64x5xf32, #tpu.memory_space<vmem>>, %arg2: memref<224x32xf32, #tpu.memory_space<vmem>>, %arg3: memref<1x1x32xf32, #tpu.memory_space<vmem>>) attributes {dimension_semantics = [#tpu.dimension_semantics<parallel>], iteration_bounds = array<i64: 2>, scalar_prefetch = 0 : i64, scratch_operands = 0 : i64, tpu.core_type = #tpu.core_type<tc>, window_params = [{transform_indices = @transform_0, window_bounds = array<i64: 1, 64, 5>}, {pipeline_mode = #tpu.pipeline_mode<synchronous>, transform_indices = @transform_1, window_bounds = array<i64: 224, 32>}, {transform_indices = @transform_2, window_bounds = array<i64: 1, 1, 32>}]} {
    %c0 = arith.constant 0 : index
    %c0_0 = arith.constant 0 : index
    %c0_1 = arith.constant 0 : index
    %0 = vector.load %arg1[%c0, %c0_0, %c0_1] : memref<1x64x5xf32, #tpu.memory_space<vmem>>, vector<1x64x5xf32>
    %1 = vector.shape_cast %0 : vector<1x64x5xf32> to vector<64x5xf32>
    %2 = vector.extract_strided_slice %1 {offsets = [0, 0], sizes = [64, 1], strides = [1, 1]} : vector<64x5xf32> to vector<64x1xf32>
    %3 = vector.extract_strided_slice %1 {offsets = [0, 1], sizes = [64, 4], strides = [1, 1]} : vector<64x5xf32> to vector<64x4xf32>
    %c0_2 = arith.constant 0 : index
    %c0_3 = arith.constant 0 : index
    %4 = vector.load %arg2[%c0_2, %c0_3] : memref<224x32xf32, #tpu.memory_space<vmem>>, vector<1x32xf32>
    %5 = vector.extract_strided_slice %4 {offsets = [0, 0], sizes = [1, 16], strides = [1, 1]} : vector<1x32xf32> to vector<1x16xf32>
    %c8 = arith.constant 8 : index
    %c0_4 = arith.constant 0 : index
    %6 = vector.load %arg2[%c8, %c0_4] : memref<224x32xf32, #tpu.memory_space<vmem>>, vector<1x32xf32>
    %c16 = arith.constant 16 : index
    %c0_5 = arith.constant 0 : index
    %7 = vector.load %arg2[%c16, %c0_5] : memref<224x32xf32, #tpu.memory_space<vmem>>, vector<1x32xf32>
    %c24 = arith.constant 24 : index
    %c0_6 = arith.constant 0 : index
    %8 = vector.load %arg2[%c24, %c0_6] : memref<224x32xf32, #tpu.memory_space<vmem>>, vector<4x32xf32>
    %9 = vector.extract_strided_slice %8 {offsets = [0, 0], sizes = [4, 8], strides = [1, 1]} : vector<4x32xf32> to vector<4x8xf32>
    %c32 = arith.constant 32 : index
    %c0_7 = arith.constant 0 : index
    %10 = vector.load %arg2[%c32, %c0_7] : memref<224x32xf32, #tpu.memory_space<vmem>>, vector<16x32xf32>
    %11 = arith.truncf %10 : vector<16x32xf32> to vector<16x32xbf16>
    %c48 = arith.constant 48 : index
    %c0_8 = arith.constant 0 : index
    %12 = vector.load %arg2[%c48, %c0_8] : memref<224x32xf32, #tpu.memory_space<vmem>>, vector<16x32xf32>
    %13 = arith.truncf %12 : vector<16x32xf32> to vector<16x32xbf16>
    %c64 = arith.constant 64 : index
    %c0_9 = arith.constant 0 : index
    %14 = vector.load %arg2[%c64, %c0_9] : memref<224x32xf32, #tpu.memory_space<vmem>>, vector<32x32xf32>
    %15 = arith.truncf %14 : vector<32x32xf32> to vector<32x32xbf16>
    %16 = vector.broadcast %2 : vector<64x1xf32> to vector<64x16xf32>
    %17 = vector.broadcast %5 : vector<1x16xf32> to vector<64x16xf32>
    %18 = arith.mulf %16, %17 : vector<64x16xf32>
    %19 = math.sin %18 : vector<64x16xf32>
    %20 = math.cos %18 : vector<64x16xf32>
    %21 = arith.truncf %19 : vector<64x16xf32> to vector<64x16xbf16>
    %cst = arith.constant dense<0.000000e+00> : vector<64x32xf32>
    %22 = tpu.matmul %21, %11, %cst {dimension_numbers = #tpu.dot_dimension_numbers<[1], [0], [0], [1], [0, 0, 1, 1], [], []>} : vector<64x16xbf16>, vector<16x32xbf16>, vector<64x32xf32> -> vector<64x32xf32>
    %23 = arith.truncf %20 : vector<64x16xf32> to vector<64x16xbf16>
    %cst_10 = arith.constant dense<0.000000e+00> : vector<64x32xf32>
    %24 = tpu.matmul %23, %13, %cst_10 {dimension_numbers = #tpu.dot_dimension_numbers<[1], [0], [0], [1], [0, 0, 1, 1], [], []>} : vector<64x16xbf16>, vector<16x32xbf16>, vector<64x32xf32> -> vector<64x32xf32>
    %25 = arith.addf %22, %24 : vector<64x32xf32>
    %26 = vector.broadcast %6 : vector<1x32xf32> to vector<64x32xf32>
    %27 = arith.addf %25, %26 : vector<64x32xf32>
    %cst_11 = arith.constant 5.000000e-01 : f32
    %28 = vector.broadcast %cst_11 : f32 to vector<64x32xf32>
    %29 = arith.mulf %28, %27 : vector<64x32xf32>
    %cst_12 = arith.constant 4.471500e-02 : f32
    %30 = vector.broadcast %cst_12 : f32 to vector<64x32xf32>
    %31 = arith.mulf %30, %27 : vector<64x32xf32>
    %32 = arith.mulf %31, %27 : vector<64x32xf32>
    %33 = arith.mulf %32, %27 : vector<64x32xf32>
    %34 = arith.addf %27, %33 : vector<64x32xf32>
    %cst_13 = arith.constant 0.797884583 : f32
    %35 = vector.broadcast %cst_13 : f32 to vector<64x32xf32>
    %36 = arith.mulf %35, %34 : vector<64x32xf32>
    %37 = math.tanh %36 : vector<64x32xf32>
    %cst_14 = arith.constant 1.000000e+00 : f32
    %38 = vector.broadcast %cst_14 : f32 to vector<64x32xf32>
    %39 = arith.addf %38, %37 : vector<64x32xf32>
    %40 = arith.mulf %29, %39 : vector<64x32xf32>
    %41 = arith.truncf %40 : vector<64x32xf32> to vector<64x32xbf16>
    %cst_15 = arith.constant dense<0.000000e+00> : vector<64x32xf32>
    %42 = tpu.matmul %41, %15, %cst_15 {dimension_numbers = #tpu.dot_dimension_numbers<[1], [0], [0], [1], [0, 0, 1, 1], [], []>} : vector<64x32xbf16>, vector<32x32xbf16>, vector<64x32xf32> -> vector<64x32xf32>
    %43 = vector.broadcast %7 : vector<1x32xf32> to vector<64x32xf32>
    %44 = arith.addf %42, %43 : vector<64x32xf32>
    %cst_16 = arith.constant 5.000000e-01 : f32
    %45 = vector.broadcast %cst_16 : f32 to vector<64x32xf32>
    %46 = arith.mulf %45, %44 : vector<64x32xf32>
    %cst_17 = arith.constant 4.471500e-02 : f32
    %47 = vector.broadcast %cst_17 : f32 to vector<64x32xf32>
    %48 = arith.mulf %47, %44 : vector<64x32xf32>
    %49 = arith.mulf %48, %44 : vector<64x32xf32>
    %50 = arith.mulf %49, %44 : vector<64x32xf32>
    %51 = arith.addf %44, %50 : vector<64x32xf32>
    %cst_18 = arith.constant 0.797884583 : f32
    %52 = vector.broadcast %cst_18 : f32 to vector<64x32xf32>
    %53 = arith.mulf %52, %51 : vector<64x32xf32>
    %54 = math.tanh %53 : vector<64x32xf32>
    %cst_19 = arith.constant 1.000000e+00 : f32
    %55 = vector.broadcast %cst_19 : f32 to vector<64x32xf32>
    %56 = arith.addf %55, %54 : vector<64x32xf32>
    %57 = arith.mulf %46, %56 : vector<64x32xf32>
    %58 = arith.truncf %57 : vector<64x32xf32> to vector<64x32xbf16>
    %c96 = arith.constant 96 : index
    %c0_20 = arith.constant 0 : index
    %59 = vector.load %arg2[%c96, %c0_20] : memref<224x32xf32, #tpu.memory_space<vmem>>, vector<32x32xf32>
    %60 = vector.extract_strided_slice %59 {offsets = [0, 0], sizes = [32, 8], strides = [1, 1]} : vector<32x32xf32> to vector<32x8xf32>
    %61 = arith.truncf %60 : vector<32x8xf32> to vector<32x8xbf16>
    %cst_21 = arith.constant dense<0.000000e+00> : vector<64x8xf32>
    %62 = tpu.matmul %58, %61, %cst_21 {dimension_numbers = #tpu.dot_dimension_numbers<[1], [0], [0], [1], [0, 0, 1, 1], [], []>} : vector<64x32xbf16>, vector<32x8xbf16>, vector<64x8xf32> -> vector<64x8xf32>
    %63 = vector.extract_strided_slice %9 {offsets = [0, 0], sizes = [1, 8], strides = [1, 1]} : vector<4x8xf32> to vector<1x8xf32>
    %64 = vector.broadcast %63 : vector<1x8xf32> to vector<64x8xf32>
    %65 = arith.addf %62, %64 : vector<64x8xf32>
    %66 = vector.extract_strided_slice %3 {offsets = [0, 0], sizes = [64, 1], strides = [1, 1]} : vector<64x4xf32> to vector<64x1xf32>
    %67 = vector.broadcast %66 : vector<64x1xf32> to vector<64x8xf32>
    %68 = arith.mulf %65, %67 : vector<64x8xf32>
    %c128 = arith.constant 128 : index
    %c0_22 = arith.constant 0 : index
    %69 = vector.load %arg2[%c128, %c0_22] : memref<224x32xf32, #tpu.memory_space<vmem>>, vector<32x32xf32>
    %70 = vector.extract_strided_slice %69 {offsets = [0, 0], sizes = [32, 8], strides = [1, 1]} : vector<32x32xf32> to vector<32x8xf32>
    %71 = arith.truncf %70 : vector<32x8xf32> to vector<32x8xbf16>
    %cst_23 = arith.constant dense<0.000000e+00> : vector<64x8xf32>
    %72 = tpu.matmul %58, %71, %cst_23 {dimension_numbers = #tpu.dot_dimension_numbers<[1], [0], [0], [1], [0, 0, 1, 1], [], []>} : vector<64x32xbf16>, vector<32x8xbf16>, vector<64x8xf32> -> vector<64x8xf32>
    %73 = vector.extract_strided_slice %9 {offsets = [1, 0], sizes = [1, 8], strides = [1, 1]} : vector<4x8xf32> to vector<1x8xf32>
    %74 = vector.broadcast %73 : vector<1x8xf32> to vector<64x8xf32>
    %75 = arith.addf %72, %74 : vector<64x8xf32>
    %76 = vector.extract_strided_slice %3 {offsets = [0, 1], sizes = [64, 1], strides = [1, 1]} : vector<64x4xf32> to vector<64x1xf32>
    %77 = vector.broadcast %76 : vector<64x1xf32> to vector<64x8xf32>
    %78 = arith.mulf %75, %77 : vector<64x8xf32>
    %79 = arith.addf %68, %78 : vector<64x8xf32>
    %c160 = arith.constant 160 : index
    %c0_24 = arith.constant 0 : index
    %80 = vector.load %arg2[%c160, %c0_24] : memref<224x32xf32, #tpu.memory_space<vmem>>, vector<32x32xf32>
    %81 = vector.extract_strided_slice %80 {offsets = [0, 0], sizes = [32, 8], strides = [1, 1]} : vector<32x32xf32> to vector<32x8xf32>
    %82 = arith.truncf %81 : vector<32x8xf32> to vector<32x8xbf16>
    %cst_25 = arith.constant dense<0.000000e+00> : vector<64x8xf32>
    %83 = tpu.matmul %58, %82, %cst_25 {dimension_numbers = #tpu.dot_dimension_numbers<[1], [0], [0], [1], [0, 0, 1, 1], [], []>} : vector<64x32xbf16>, vector<32x8xbf16>, vector<64x8xf32> -> vector<64x8xf32>
    %84 = vector.extract_strided_slice %9 {offsets = [2, 0], sizes = [1, 8], strides = [1, 1]} : vector<4x8xf32> to vector<1x8xf32>
    %85 = vector.broadcast %84 : vector<1x8xf32> to vector<64x8xf32>
    %86 = arith.addf %83, %85 : vector<64x8xf32>
    %87 = vector.extract_strided_slice %3 {offsets = [0, 2], sizes = [64, 1], strides = [1, 1]} : vector<64x4xf32> to vector<64x1xf32>
    %88 = vector.broadcast %87 : vector<64x1xf32> to vector<64x8xf32>
    %89 = arith.mulf %86, %88 : vector<64x8xf32>
    %90 = arith.addf %79, %89 : vector<64x8xf32>
    %c192 = arith.constant 192 : index
    %c0_26 = arith.constant 0 : index
    %91 = vector.load %arg2[%c192, %c0_26] : memref<224x32xf32, #tpu.memory_space<vmem>>, vector<32x32xf32>
    %92 = vector.extract_strided_slice %91 {offsets = [0, 0], sizes = [32, 8], strides = [1, 1]} : vector<32x32xf32> to vector<32x8xf32>
    %93 = arith.truncf %92 : vector<32x8xf32> to vector<32x8xbf16>
    %cst_27 = arith.constant dense<0.000000e+00> : vector<64x8xf32>
    %94 = tpu.matmul %58, %93, %cst_27 {dimension_numbers = #tpu.dot_dimension_numbers<[1], [0], [0], [1], [0, 0, 1, 1], [], []>} : vector<64x32xbf16>, vector<32x8xbf16>, vector<64x8xf32> -> vector<64x8xf32>
    %95 = vector.extract_strided_slice %9 {offsets = [3, 0], sizes = [1, 8], strides = [1, 1]} : vector<4x8xf32> to vector<1x8xf32>
    %96 = vector.broadcast %95 : vector<1x8xf32> to vector<64x8xf32>
    %97 = arith.addf %94, %96 : vector<64x8xf32>
    %98 = vector.extract_strided_slice %3 {offsets = [0, 3], sizes = [64, 1], strides = [1, 1]} : vector<64x4xf32> to vector<64x1xf32>
    %99 = vector.broadcast %98 : vector<64x1xf32> to vector<64x8xf32>
    %100 = arith.mulf %97, %99 : vector<64x8xf32>
    %101 = arith.addf %90, %100 : vector<64x8xf32>
    %102 = tpu.iota {dimensions = array<i32: 0>} : vector<4x64xi32>
    %103 = tpu.iota {dimensions = array<i32: 1>} : vector<4x64xi32>
    %c16_i32 = arith.constant 16 : i32
    %104 = vector.broadcast %c16_i32 : i32 to vector<4x64xi32>
    %105 = arith.muli %102, %104 : vector<4x64xi32>
    %106 = arith.cmpi sge, %103, %105 : vector<4x64xi32>
    %c16_i32_28 = arith.constant 16 : i32
    %107 = vector.broadcast %c16_i32_28 : i32 to vector<4x64xi32>
    %108 = arith.addi %105, %107 : vector<4x64xi32>
    %109 = arith.cmpi slt, %103, %108 : vector<4x64xi32>
    %110 = arith.andi %106, %109 : vector<4x64xi1>
    %cst_29 = arith.constant 6.250000e-02 : f32
    %cst_30 = arith.constant 0.000000e+00 : f32
    %111 = vector.broadcast %cst_29 : f32 to vector<4x64xf32>
    %112 = vector.broadcast %cst_30 : f32 to vector<4x64xf32>
    %113 = arith.select %110, %111, %112 : vector<4x64xi1>, vector<4x64xf32>
    %cst_31 = arith.constant dense<0.000000e+00> : vector<4x8xf32>
    %114 = tpu.matmul %113, %101, %cst_31 {dimension_numbers = #tpu.dot_dimension_numbers<[1], [0], [0], [1], [0, 0, 1, 1], [], []>} : vector<4x64xf32>, vector<64x8xf32>, vector<4x8xf32> -> vector<4x8xf32>
    %cst_32 = arith.constant 0.000000e+00 : f32
    %115 = vector.broadcast %cst_32 : f32 to vector<4x8xf32>
    %116 = arith.maximumf %114, %115 : vector<4x8xf32>
    %117 = vector.extract_strided_slice %116 {offsets = [0, 0], sizes = [1, 8], strides = [1, 1]} : vector<4x8xf32> to vector<1x8xf32>
    %118 = vector.extract_strided_slice %116 {offsets = [1, 0], sizes = [1, 8], strides = [1, 1]} : vector<4x8xf32> to vector<1x8xf32>
    %119 = vector.extract_strided_slice %116 {offsets = [2, 0], sizes = [1, 8], strides = [1, 1]} : vector<4x8xf32> to vector<1x8xf32>
    %120 = vector.extract_strided_slice %116 {offsets = [3, 0], sizes = [1, 8], strides = [1, 1]} : vector<4x8xf32> to vector<1x8xf32>
    %121 = tpu.concatenate %117, %118, %119, %120 in 1 : vector<1x8xf32>, vector<1x8xf32>, vector<1x8xf32>, vector<1x8xf32> -> vector<1x32xf32>
    %c0_33 = arith.constant 0 : index
    %c0_34 = arith.constant 0 : index
    %c0_35 = arith.constant 0 : index
    %122 = vector.load %arg3[%c0_33, %c0_34, %c0_35] : memref<1x1x32xf32, #tpu.memory_space<vmem>>, vector<1x1x32xf32>
    %123 = vector.shape_cast %122 : vector<1x1x32xf32> to vector<1x32xf32>
    %124 = vector.shape_cast %121 : vector<1x32xf32> to vector<1x1x32xf32>
    tpu.vector_store %arg3[%c0_33, %c0_34, %c0_35], %124 {strides = array<i32>} : memref<1x1x32xf32, #tpu.memory_space<vmem>>, vector<1x1x32xf32>,
    return
  }
  func.func @transform_0(%arg0: i32) -> (i32, i32, i32) {
    %c0_i32 = arith.constant 0 : i32
    %c0_i32_0 = arith.constant 0 : i32
    %c0_i32_1 = arith.constant 0 : i32
    return %arg0, %c0_i32, %c0_i32_0 : i32, i32, i32
  }
  func.func @transform_1(%arg0: i32) -> (i32, i32) {
    %c0_i32 = arith.constant 0 : i32
    %c0_i32_0 = arith.constant 0 : i32
    %c0_i32_1 = arith.constant 0 : i32
    return %c0_i32, %c0_i32_0 : i32, i32
  }
  func.func @transform_2(%arg0: i32) -> (i32, i32, i32) {
    %c0_i32 = arith.constant 0 : i32
    %c0_i32_0 = arith.constant 0 : i32
    %c0_i32_1 = arith.constant 0 : i32
    return %arg0, %c0_i32, %c0_i32_0 : i32, i32, i32
  }
}

</mosaic_0001>

<bundles_post_ra>
// kernel: tpu_custom_call.1
= control target key start
LH: loop header
LB: loop body
LE: loop exit
PB: predicated region body
PF: predicated region fallthrough
CT: control target
= control target key end

     0   :  { %7 = vsyncpa [#allocation3], 0  ;;  %s5072_s0 = inlined_call_operand.vmem [shape: f32[2,64,5], index: 0, kind: input, shape index: {}]   ;;  %s5073_s1 = inlined_call_operand.vmem [shape: f32[224,32], index: 1, kind: input, shape index: {}]   ;;  %s5074_s2 = inlined_call_operand.hbm [shape: f32[2,1,32], index: 2, kind: output, shape index: {}]  }
   0x1   :  { %9 = vsyncpa [#allocation3 + $0x1], 0  ;;  %s3756_s9 = smov 0   ;;  %s3758_s10 = smov 0  }
   0x2   :  { %s3760_s11 = smov 0   ;;  %s3762_s12 = smov 0  }
   0x3 LB: > { %s3777_s13 = sadd.s32 4294967295, %s3724_s12   ;;  %s3445_s14 = sadd.s32 4294967294, %s3724_s12   ;;  %s3724_s12 = sphi %s3762_s12, %s5149_s12   ;;  %s3720_s11 = sphi %s3760_s11, %s5148_s11   ;;  %s3716_s10 = sphi %s3758_s10, %s5147_s10   ;;  %s3712_s9 = sphi %s3756_s9, %s5146_s9  }
   0x4   : > { %s3781_s15 = sadd.s32 1, %s3724_s12   ;;  %s69_s16 = sadd.s32 1, %s3720_s11 }
   0x5   : > { %s66_s17 = ssub.s32 %s3724_s12, %s3781_s15  ;;  %p79_p0 = scmp.ne.s32.totalorder %s3720_s11, %s3716_s10 }
   0x6   : > { %p67_p1 = scmp.eq.s32.totalorder %s66_s17, 0  ;;  %p80_p2 = scmp.eq.s32.totalorder %s3777_s13, 1 }
   0x7   : > { %p85_p3 = scmp.ne.s32.totalorder %s3716_s10, %s3712_s9  ;;  %p86_p4 = scmp.eq.s32.totalorder %s3445_s14, 1 }
   0x8   : > { %s3792_s18 = scalar_select %p67_p1, %s3720_s11, %s69_s16  }
   0x9   : > { %p3794_p5 = por %p80_p2, %p79_p0  ;;  %p3798_p6 = por %p86_p4, %p85_p3 }
   0xa   : > { %p3448_p7 = scmp.ge.s32.totalorder %s3724_s12, 1  ;;  %p115_p8 = scmp.lt.s32.totalorder %s3724_s12, 3 }
   0xc   : > { %p116_p9 = pnand %p3448_p7, %p115_p8 }
   0xe   : > { %119 = sbr.rel (%p116_p9) target bundleno = 1200 (0x4b0), region = 28 }
  0x13   : > { %p136_p10 = scmp.lt.s32.totalorder %s3777_s13, 1  ;;  %v3726_v0 = vmov 0   ;;  %v3825_v9 = vld [vmem:[%s5073_s1] ss:$0 sm:$0xff]  ;;  %v5086_v28 = vmov 683565275   ;;  %s3386_s5 = scalar_lea.hbm %s5074_s2, %s3777_s13 }
  0x14   : > { %3589 = vset.pattern.permute.xlu2 %v3726_v0  ;;  %3588 = vset.pattern.permute.xlu1 %v3726_v0  ;;  %v5084_v30 = vmov 2475754826   ;;  %v5082_v32 = vmov 2131351028   ;;  %v5080_v34 = vmov 2102212464  }
  0x15   : > { %3587 = vset.pattern.permute.xlu0 %v3726_v0  ;;  %s137_s21 = scalar_select %p136_p10, %s3777_s13, 1  ;;  %v5078_v36 = vmov 920167782   ;;  %v5077_v44 = vmov 1326507024  }
  0x16   : > { %s3738_s28 = smov 8   ;;  %s3739_s29 = smov 24  }
  0x17   : > { %s3530_s22 = sshll.u32 %s137_s21, 6  ;;  %s134_s30 = sand.u32 1, %s3716_s10  }
  0x18   : > { %s3812_s25 = scalar_lea.vmem %s5072_s0, %s3530_s22  ;;  %s135_s6 = scalar_lea.vmem [#allocation2], %s134_s30 }
  0x19   : > { %v146_v1 = vld [vmem:[%s3812_s25 + $0x20] sm:$0xff]  ;;  %v144_v2 = vld [vmem:[%s3812_s25 + $0x10] sm:$0xff]  ;;  %v147_v4 = vld [vmem:[%s3812_s25 + $0x28] sm:$0xff]  ;;  %s3388_s7 = sshll.u32 %s135_s6, 4  ;;  %s3390_s8 = sshll.u32 %s3386_s5, 4  ;;  %s3389_s7 = int_to_ptr.vmem [resolvable:$true] %s3388_s7  ;;  %s3391_s8 = int_to_ptr.hbm [resolvable:$true] %s3390_s8 }
  0x1a   : > { %v142_v3 = vld [vmem:[%s3812_s25] sm:$0xff]  ;;  %188 = vperm.xlu2 %3589, %v146_v1   ;;  %178 = vperm.xlu1 %3588, %v144_v2   ;;  %v145_v5 = vld [vmem:[%s3812_s25 + $0x18] sm:$0xff]  ;;  %v143_v6 = vld [vmem:[%s3812_s25 + $0x8] sm:$0xff]  ;;  %s3378_s14 = scalar_lea.sflag [#allocation3], %s134_s30  ;;  %s3676_s16 = sshra.s32 %s3391_s8, 4  ;;  %s3677_s16 = int_to_ptr.hbm [resolvable:$true] %s3676_s16 }
  0x1b   : > { %168 = vperm.xlu0 %3587, %v142_v3   ;;  %v149_v7 = vld [vmem:[%s3812_s25 + $0x38] sm:$0xff]  ;;  %v148_v8 = vld [vmem:[%s3812_s25 + $0x30] sm:$0xff]  ;;  %s3678_s13 = scalar_lea.hbm %s3677_s16, 1  ;;  %s3682_s22 = scalar_lea.hbm %s5074_s2, 2 }
  0x1c   : > { %p3679_p11 = scmp.ne.s32.totalorder %s3677_s16, %s3678_s13  ;;  %p3683_p0 = scmp.lt.s32.totalorder %s3677_s16, %s5074_s2 }
  0x1d   : > { %p3684_p1 = scmp.lt.s32.totalorder %s3682_s22, %s3678_s13 }
  0x1e   : > { %p3680_p12 = pnand %p3679_p11, %p3794_p5 }
  0x1f   : > { %p3685_p2 = por %p3684_p1, %p3683_p0 }
  0x20   : > { %p3681_p13 = pneg %p3680_p12 }
  0x22   : > { %193 = vperm.xlu2 %3589, %v147_v4   ;;  %183 = vperm.xlu1 %3588, %v145_v5   ;;  %p3686_p3 = pnand %p3685_p2, %p3681_p13 }
  0x23   : > { %173 = vperm.xlu0 %3587, %v143_v6  }
  0x2a   : > { %203 = vperm.xlu1 %3588, %v149_v7  }
  0x2b   : > { %198 = vperm.xlu0 %3587, %v148_v8  }
  0x74   : > { %v189_v10 = vpop.permute.xlu2 %188 }
  0x75   : > { %v3828_v11 = vmul.f32 %v3825_v9, %v189_v10 }
  0x77   : > { %v838_v12 = vand.u32 2139095040, %v3828_v11  ;;  %v835_v13 = vand.u32 2147483647, %v3828_v11 }
  0x79   : > { %v839_v14 = vshrl.u32 %v838_v12, 23  ;;  %v842_v16 = vand.u32 8388607, %v835_v13 }
  0x7b   : > { %v3463_v15 = vadd.s32 4294967169, %v839_v14  ;;  %v843_v20 = vor.u32 8388608, %v842_v16 }
  0x7c   : > { %v194_v17 = vpop.permute.xlu2 %193 }
  0x7d   : > { %v845_v18 = vadd.s32 1, %v3463_v15  ;;  %v3835_v19 = vmul.f32 %v3825_v9, %v194_v17  ;;  %v3844_v38 = vshll.u32 %v843_v20, 8 }
  0x7f   : > { %vm846_vm0 = vcmp.gt.s32.totalorder %v845_v18, 0  ;;  %v993_v22 = vand.u32 2139095040, %v3835_v19  ;;  %v990_v24 = vand.u32 2147483647, %v3835_v19  ;;  %v884_v58 = vand.u32 65535, %v3844_v38 }
  0x80   : > { %v847_v21 = vsel %vm846_vm0, %v845_v18, 0  ;;  %v885_v62 = vshrl.u32 %v3844_v38, 16 }
  0x81   : > { %v849_v23 = vand.u32 31, %v847_v21  ;;  %v848_v25 = vshrl.u32 %v847_v21, 5  ;;  %v994_v26 = vshrl.u32 %v993_v22, 23  ;;  %v997_v42 = vand.u32 8388607, %v990_v24 }
  0x83   : > { %v850_v27 = vsub.s32 32, %v849_v23  ;;  %v852_v29 = vshll.u32 %v5086_v28, %v849_v23  ;;  %v855_v31 = vshll.u32 %v5084_v30, %v849_v23  ;;  %v858_v33 = vshll.u32 %v5082_v32, %v849_v23 }
  0x84   : > { %v861_v35 = vshll.u32 %v5080_v34, %v849_v23  ;;  %v864_v37 = vshll.u32 %v5078_v36, %v849_v23  ;;  %vm867_vm1 = vcmp.lt.s32.totalorder %v848_v25, 1  ;;  %vm870_vm2 = vcmp.lt.s32.totalorder %v848_v25, 4 }
  0x85   : > { %v853_v39 = vshrl.u32 %v5084_v30, %v850_v27  ;;  %v856_v40 = vshrl.u32 %v5082_v32, %v850_v27  ;;  %v859_v41 = vshrl.u32 %v5080_v34, %v850_v27  ;;  %v862_v43 = vshrl.u32 %v5078_v36, %v850_v27 }
  0x86   : > { %v865_v45 = vshrl.u32 %v5077_v44, %v850_v27  ;;  %v3466_v49 = vadd.s32 4294967169, %v994_v26  ;;  %v851_v50 = vshrl.u32 %v5086_v28, %v850_v27  ;;  %vm869_vm3 = vcmp.lt.s32.totalorder %v848_v25, 3 }
  0x87   : > { %v854_v46 = vor.u32 %v853_v39, %v852_v29  ;;  %v857_v47 = vor.u32 %v856_v40, %v855_v31  ;;  %v860_v48 = vor.u32 %v859_v41, %v858_v33  ;;  %v863_v51 = vor.u32 %v862_v43, %v861_v35 }
  0x88   : > { %v866_v52 = vor.u32 %v865_v45, %v864_v37  ;;  %vm868_vm4 = vcmp.lt.s32.totalorder %v848_v25, 2  ;;  %v1000_v59 = vadd.s32 1, %v3466_v49  ;;  %v998_v63 = vor.u32 8388608, %v997_v42 }
  0x89   : > { %v872_v53 = vsel %vm870_vm2, %v860_v48, 2102212464  ;;  %v875_v54 = vsel %vm867_vm1, %v854_v46, %v857_v47  ;;  %v879_v55 = vsel %vm867_vm1, %v857_v47, %v860_v48  ;;  %v876_v56 = vsel %vm870_vm2, %v863_v51, 920167782 }
  0x8a   : > { %v880_v57 = vsel %vm870_vm2, %v866_v52, 1326507024  ;;  %v877_v60 = vsel %vm869_vm3, %v860_v48, %v876_v56  ;;  %v871_v1 = vsel %vm867_vm1, %v851_v50, %v854_v46  ;;  %v873_v2 = vsel %vm869_vm3, %v857_v47, %v872_v53 }
  0x8b   : > { %v881_v61 = vsel %vm869_vm3, %v863_v51, %v880_v57  ;;  %v878_v3 = vsel %vm868_vm4, %v875_v54, %v877_v60  ;;  %vm1001_vm5 = vcmp.gt.s32.totalorder %v1000_v59, 0  ;;  %v3862_v10 = vsel %vm868_vm4, %v871_v1, %v873_v2 }
  0x8c   : > { %v882_v4 = vsel %vm868_vm4, %v879_v55, %v881_v61  ;;  %v908_v7 = vand.u32 65535, %v878_v3  ;;  %v909_v8 = vshrl.u32 %v878_v3, 16  ;;  %v3864_v20 = vshll.u32 %v998_v63, 8 }
  0x8d   : > { %v886_v5 = vand.u32 65535, %v882_v4  ;;  %v887_v6 = vshrl.u32 %v882_v4, 16  ;;  %v1002_v26 = vsel %vm1001_vm5, %v1000_v59, 0 }
  0x8e   : > { %v910_v16 = vmul.u32 %v908_v7, %v884_v58  ;;  %v911_v17 = vmul.u32 %v909_v8, %v884_v58  ;;  %v912_v18 = vmul.u32 %v908_v7, %v885_v62  ;;  %v913_v29 = vmul.u32 %v909_v8, %v885_v62 }
  0x8f   : > { %v888_v12 = vmul.u32 %v886_v5, %v884_v58  ;;  %v889_v14 = vmul.u32 %v887_v6, %v884_v58  ;;  %v890_v15 = vmul.u32 %v886_v5, %v885_v62  ;;  %v891_v21 = vmul.u32 %v887_v6, %v885_v62 }
  0x90   : > { %v914_v31 = vshll.u32 %v911_v17, 16  ;;  %v916_v33 = vshll.u32 %v912_v18, 16  ;;  %v915_v37 = vshrl.u32 %v911_v17, 16  ;;  %v917_v40 = vshrl.u32 %v912_v18, 16 }
  0x91   : > { %v892_v22 = vshll.u32 %v889_v14, 16  ;;  %v894_v23 = vshll.u32 %v890_v15, 16  ;;  %v893_v27 = vshrl.u32 %v889_v14, 16  ;;  %v895_v35 = vshrl.u32 %v890_v15, 16 }
  0x92   : > { %vm918_vm7 = vc.u32 %v910_v16, %v914_v31  ;;  %v920_v41 = vadd.s32 %v914_v31, %v910_v16  ;;  %v1004_v45 = vand.u32 31, %v1002_v26  ;;  %v3869_v48 = vshrl.u32 %v1002_v26, 5  ;;  %v179_v26 = vpop.permute.xlu1 %178 }
  0x93   : > { %vm896_vm6 = vc.u32 %v888_v12, %v892_v22  ;;  %v898_v25 = vadd.s32 %v892_v22, %v888_v12  ;;  %v919_v43 = vsel %vm918_vm7, 1, %v3726_v0  ;;  %v928_v12 = vmul.u32 %v3844_v38, %v3862_v10 }
  0x94   : > { %v897_v39 = vsel %vm896_vm6, 1, %v3726_v0  ;;  %v921_v47 = vadd.s32 %v919_v43, %v913_v29  ;;  %vm922_vm9 = vc.u32 %v920_v41, %v916_v33  ;;  %v1005_v51 = vsub.s32 32, %v1004_v45 }
  0x95   : > { %v899_v42 = vadd.s32 %v897_v39, %v891_v21  ;;  %vm900_vm8 = vc.u32 %v898_v25, %v894_v23  ;;  %v923_v50 = vsel %vm922_vm9, 1, %v3726_v0  ;;  %v1007_v52 = vshll.u32 %v5086_v28, %v1004_v45 }
  0x96   : > { %v901_v46 = vsel %vm900_vm8, 1, %v3726_v0  ;;  %v925_v53 = vadd.s32 %v923_v50, %v921_v47  ;;  %v1010_v54 = vshll.u32 %v5084_v30, %v1004_v45  ;;  %v1013_v55 = vshll.u32 %v5082_v32, %v1004_v45 }
  0x97   : > { %v903_v49 = vadd.s32 %v901_v46, %v899_v42  ;;  %v1016_v56 = vshll.u32 %v5080_v34, %v1004_v45  ;;  %v3876_v58 = vadd.s32 %v920_v41, %v916_v33  ;;  %v1008_v59 = vshrl.u32 %v5084_v30, %v1005_v51 }
  0x98   : > { %v1011_v60 = vshrl.u32 %v5082_v32, %v1005_v51  ;;  %v926_v61 = vadd.s32 %v925_v53, %v915_v37  ;;  %v1014_v62 = vshrl.u32 %v5080_v34, %v1005_v51  ;;  %v1017_v63 = vshrl.u32 %v5078_v36, %v1005_v51 }
  0x99   : > { %v904_v57 = vadd.s32 %v903_v49, %v893_v27  ;;  %v1019_v1 = vshll.u32 %v5078_v36, %v1004_v45  ;;  %v1009_v3 = vor.u32 %v1008_v59, %v1007_v52  ;;  %v1020_v5 = vshrl.u32 %v5077_v44, %v1005_v51 }
  0x9a   : > { %v1012_v4 = vor.u32 %v1011_v60, %v1010_v54  ;;  %v927_v6 = vadd.s32 %v926_v61, %v917_v40  ;;  %v1015_v7 = vor.u32 %v1014_v62, %v1013_v55  ;;  %v1018_v8 = vor.u32 %v1017_v63, %v1016_v56 }
  0x9b   : > { %v3883_v2 = vadd.s32 %v904_v57, %v895_v35  ;;  %vm1022_vm10 = vcmp.lt.s32.totalorder %v3869_v48, 1  ;;  %v1021_v14 = vor.u32 %v1020_v5, %v1019_v1  ;;  %vm1023_vm12 = vcmp.lt.s32.totalorder %v3869_v48, 2 }
  0x9c   : > { %v931_v15 = vadd.s32 1, %v927_v6  ;;  %vm1024_vm13 = vcmp.lt.s32.totalorder %v3869_v48, 3  ;;  %vm1025_vm14 = vcmp.lt.s32.totalorder %v3869_v48, 4  ;;  %v1030_v16 = vsel %vm1022_vm10, %v1009_v3, %v1012_v4  ;;  %v169_v48 = vpop.permute.xlu0 %168 }
  0x9d   : > { %vm930_vm11 = vc.u32 %v3883_v2, %v3876_v58  ;;  %v1031_v17 = vsel %vm1025_vm14, %v1018_v8, 920167782  ;;  %v1034_v38 = vsel %vm1022_vm10, %v1012_v4, %v1015_v7  ;;  %v1039_v10 = vand.u32 65535, %v3864_v20 }
  0x9e   : > { %v932_v18 = vsel %vm930_vm11, %v931_v15, %v927_v6  ;;  %v1032_v21 = vsel %vm1024_vm13, %v1015_v7, %v1031_v17  ;;  %v1035_v22 = vsel %vm1025_vm14, %v1021_v14, 1326507024  ;;  %v1040_v23 = vshrl.u32 %v3864_v20, 16 }
  0x9f   : > { %v933_v27 = vadd.s32 %v932_v18, %v928_v12  ;;  %v1033_v29 = vsel %vm1023_vm12, %v1030_v16, %v1032_v21  ;;  %v1036_v31 = vsel %vm1024_vm13, %v1018_v8, %v1035_v22  ;;  %v1006_v33 = vshrl.u32 %v5086_v28, %v1005_v51 }
  0xa0   : > { %v1037_v35 = vsel %vm1023_vm12, %v1034_v38, %v1036_v31  ;;  %v1063_v25 = vand.u32 65535, %v1033_v29  ;;  %v1064_v37 = vshrl.u32 %v1033_v29, 16  ;;  %v3914_v42 = vmul.f32 %v3825_v9, %v179_v26 }
  0xa1   : > { %v934_v39 = vadd.s32 536870912, %v933_v27  ;;  %v1041_v40 = vand.u32 65535, %v1037_v35  ;;  %v1042_v41 = vshrl.u32 %v1037_v35, 16  ;;  %v1027_v43 = vsel %vm1025_vm14, %v1015_v7, 2102212464 }
  0xa2   : > { %v1065_v45 = vmul.u32 %v1063_v25, %v1039_v10  ;;  %v1066_v46 = vmul.u32 %v1064_v37, %v1039_v10  ;;  %v1067_v47 = vmul.u32 %v1063_v25, %v1040_v23  ;;  %v1026_v53 = vsel %vm1022_vm10, %v1006_v33, %v1009_v3 }
  0xa3   : > { %v3918_v49 = vshrl.u32 %v934_v39, 30  ;;  %v1043_v50 = vmul.u32 %v1041_v40, %v1039_v10  ;;  %v1044_v51 = vmul.u32 %v1042_v41, %v1039_v10  ;;  %v1045_v52 = vmul.u32 %v1041_v40, %v1040_v23 }
  0xa4   : > { %v1068_v54 = vmul.u32 %v1064_v37, %v1040_v23  ;;  %v1069_v55 = vshll.u32 %v1066_v46, 16  ;;  %v1071_v56 = vshll.u32 %v1067_v47, 16  ;;  %v1046_v59 = vmul.u32 %v1042_v41, %v1040_v23 }
  0xa5   : > { %v936_v57 = vshll.u32 %v3918_v49, 30  ;;  %v1047_v60 = vshll.u32 %v1044_v51, 16  ;;  %v1049_v61 = vshll.u32 %v1045_v52, 16  ;;  %v1028_v62 = vsel %vm1024_vm13, %v1012_v4, %v1027_v43 }
  0xa6   : > { %v1070_v63 = vshrl.u32 %v1066_v46, 16  ;;  %vm1073_vm15 = vc.u32 %v1065_v45, %v1069_v55  ;;  %v1075_v1 = vadd.s32 %v1069_v55, %v1065_v45  ;;  %v1048_v7 = vshrl.u32 %v1044_v51, 16 }
  0xa7   : > { %v3925_v5 = vsub.s32 %v933_v27, %v936_v57  ;;  %vm1051_vm0 = vc.u32 %v1043_v50, %v1047_v60  ;;  %v1053_v6 = vadd.s32 %v1047_v60, %v1043_v50  ;;  %v1074_v3 = vsel %vm1073_vm15, 1, %v3726_v0 }
  0xa8   : > { %v1052_v8 = vsel %vm1051_vm0, 1, %v3726_v0  ;;  %v1076_v12 = vadd.s32 %v1074_v3, %v1068_v54  ;;  %vm1077_vm1 = vc.u32 %v1075_v1, %v1071_v56  ;;  %v1050_v4 = vshrl.u32 %v1045_v52, 16 }
  0xa9   : > { %vm938_vm2 = vcmp.lt.s32.totalorder %v3925_v5, 0  ;;  %v939_v14 = vsub.s32 0, %v3925_v5  ;;  %v1054_v15 = vadd.s32 %v1052_v8, %v1046_v59  ;;  %vm1055_vm3 = vc.u32 %v1053_v6, %v1049_v61 }
  0xaa   : > { %v1056_v16 = vsel %vm1055_vm3, 1, %v3726_v0  ;;  %v1072_v17 = vshrl.u32 %v1067_v47, 16  ;;  %v1078_v38 = vsel %vm1077_vm1, 1, %v3726_v0  ;;  %v528_v22 = vand.u32 2139095040, %v3914_v42 }
  0xab   : > { %v940_v10 = vsel %vm938_vm2, %v939_v14, %v3925_v5  ;;  %v1058_v18 = vadd.s32 %v1056_v16, %v1054_v15  ;;  %v1080_v21 = vadd.s32 %v1078_v38, %v1076_v12  ;;  %v1029_v26 = vsel %vm1023_vm12, %v1026_v53, %v1028_v62 }
  0xac   : > { %v941_v23 = vclz %v940_v10  ;;  %v525_v27 = vand.u32 2147483647, %v3914_v42  ;;  %v3938_v31 = vadd.s32 %v1075_v1, %v1071_v56  ;;  %v529_v35 = vshrl.u32 %v528_v22, 23 }
  0xad   : > { %v1059_v29 = vadd.s32 %v1058_v18, %v1048_v7  ;;  %v1081_v33 = vadd.s32 %v1080_v21, %v1070_v63  ;;  %v1083_v41 = vmul.u32 %v3864_v20, %v1029_v26  ;;  %v3948_v51 = vmul.f32 %v3825_v9, %v169_v48 }
  0xae   : > { %v3464_v25 = vadd.s32 4294967294, %v941_v23  ;;  %v3457_v40 = vadd.s32 4294967169, %v529_v35  ;;  %v532_v43 = vand.u32 8388607, %v525_v27  ;;  %v929_v56 = vadd.s32 %v3876_v58, %v3883_v2 }
  0xaf   : > { %v3940_v37 = vadd.s32 %v1059_v29, %v1050_v4  ;;  %v1082_v39 = vadd.s32 %v1081_v33, %v1072_v17  ;;  %v215_v59 = vand.u32 2147483647, %v3948_v51  ;;  %v218_v60 = vand.u32 2139095040, %v3948_v51 }
  0xb0   : > { %vm3465_vm4 = vcmp.lt.s32.totalorder %v3464_v25, 0  ;;  %v535_v46 = vadd.s32 1, %v3457_v40  ;;  %v533_v53 = vor.u32 8388608, %v532_v43 }
  0xb1   : > { %vm1085_vm5 = vc.u32 %v3940_v37, %v3938_v31  ;;  %v1086_v45 = vadd.s32 1, %v1082_v39  ;;  %v944_v47 = vsel %vm3465_vm4, 0, %v3464_v25  ;;  %v219_v18 = vshrl.u32 %v218_v60, 23 }
  0xb2   : > { %vm536_vm6 = vcmp.gt.s32.totalorder %v535_v46, 0  ;;  %v949_v55 = vsub.s32 4294967266, %v944_v47  ;;  %v945_v61 = vsub.s32 32, %v944_v47  ;;  %v946_v62 = vshll.u32 %v3925_v5, %v944_v47 }
  0xb3   : > { %v1087_v50 = vsel %vm1085_vm5, %v1086_v45, %v1082_v39  ;;  %v537_v54 = vsel %vm536_vm6, %v535_v46, 0  ;;  %v3957_v1 = vshll.u32 %v533_v53, 8  ;;  %v3451_v48 = vadd.s32 4294967169, %v219_v18 }
  0xb4   : > { %v1088_v52 = vadd.s32 %v1087_v50, %v1083_v41  ;;  %v539_v57 = vand.u32 31, %v537_v54  ;;  %v3959_v6 = vshrl.u32 %v537_v54, 5  ;;  %v950_v58 = vadd.s32 127, %v949_v55 }
  0xb5   : > { %v947_v21 = vshrl.u32 %v929_v56, %v945_v61  ;;  %v222_v45 = vand.u32 8388607, %v215_v59  ;;  %v575_v60 = vshrl.u32 %v3957_v1, 16 }
  0xb6   : > { %v1089_v20 = vadd.s32 536870912, %v1088_v52  ;;  %v540_v3 = vsub.s32 32, %v539_v57  ;;  %v542_v7 = vshll.u32 %v5086_v28, %v539_v57  ;;  %v545_v8 = vshll.u32 %v5084_v30, %v539_v57 }
  0xb7   : > { %v548_v12 = vshll.u32 %v5082_v32, %v539_v57  ;;  %v551_v14 = vshll.u32 %v5080_v34, %v539_v57  ;;  %v554_v16 = vshll.u32 %v5078_v36, %v539_v57  ;;  %vm557_vm7 = vcmp.lt.s32.totalorder %v3959_v6, 1 }
  0xb8   : > { %v3955_v63 = vshrl.u32 %v1089_v20, 30  ;;  %v543_v5 = vshrl.u32 %v5084_v30, %v540_v3  ;;  %v546_v15 = vshrl.u32 %v5082_v32, %v540_v3  ;;  %v549_v4 = vshrl.u32 %v5080_v34, %v540_v3 }
  0xb9   : > { %v552_v38 = vshrl.u32 %v5078_v36, %v540_v3  ;;  %v555_v10 = vshrl.u32 %v5077_v44, %v540_v3  ;;  %v951_v35 = vshll.u32 %v950_v58, 23  ;;  %vm559_vm9 = vcmp.lt.s32.totalorder %v3959_v6, 3 }
  0xba   : > { %v1091_v2 = vshll.u32 %v3955_v63, 30  ;;  %v544_v22 = vor.u32 %v543_v5, %v542_v7  ;;  %v547_v23 = vor.u32 %v546_v15, %v545_v8  ;;  %v550_v29 = vor.u32 %v549_v4, %v548_v12 }
  0xbb   : > { %v553_v33 = vor.u32 %v552_v38, %v551_v14  ;;  %v556_v25 = vor.u32 %v555_v10, %v554_v16  ;;  %vm560_vm10 = vcmp.lt.s32.totalorder %v3959_v6, 4  ;;  %vm558_vm11 = vcmp.lt.s32.totalorder %v3959_v6, 2 }
  0xbc   : > { %v3970_v17 = vsub.s32 %v1088_v52, %v1091_v2  ;;  %v565_v40 = vsel %vm557_vm7, %v544_v22, %v547_v23  ;;  %v948_v46 = vor.u32 %v947_v21, %v946_v62  ;;  %v569_v50 = vsel %vm557_vm7, %v547_v23, %v550_v29 }
  0xbd   : > { %v566_v43 = vsel %vm560_vm10, %v553_v33, 920167782  ;;  %v574_v52 = vand.u32 65535, %v3957_v1  ;;  %v952_v53 = vor.u32 4788187, %v951_v35  ;;  %v541_v56 = vshrl.u32 %v5086_v28, %v540_v3 }
  0xbe   : > { %vm1093_vm8 = vcmp.lt.s32.totalorder %v3970_v17, 0  ;;  %v1094_v26 = vsub.s32 0, %v3970_v17  ;;  %v567_v47 = vsel %vm559_vm9, %v550_v29, %v566_v43  ;;  %v570_v20 = vsel %vm560_vm10, %v556_v25, 1326507024 }
  0xbf   : > { %v568_v55 = vsel %vm558_vm11, %v565_v40, %v567_v47  ;;  %v571_v57 = vsel %vm559_vm9, %v553_v33, %v570_v20  ;;  %v1084_v62 = vadd.s32 %v3938_v31, %v3940_v37  ;;  %v225_v58 = vadd.s32 1, %v3451_v48 }
  0xc0   : > { %v1095_v39 = vsel %vm1093_vm8, %v1094_v26, %v3970_v17  ;;  %v599_v61 = vshrl.u32 %v568_v55, 16  ;;  %v572_v7 = vsel %vm558_vm11, %v569_v50, %v571_v57  ;;  %v598_v8 = vand.u32 65535, %v568_v55 }
  0xc1   : > { %v1096_v41 = vclz %v1095_v39  ;;  %v562_v2 = vsel %vm560_vm10, %v550_v29, 2102212464  ;;  %v576_v12 = vand.u32 65535, %v572_v7  ;;  %v577_v14 = vshrl.u32 %v572_v7, 16 }
  0xc2   : > { %v223_v3 = vor.u32 8388608, %v222_v45  ;;  %v953_v5 = vand.u32 2147483647, %v952_v53  ;;  %v955_v15 = vcvt.s32.f32 %v948_v46  ;;  %v601_v4 = vmul.u32 %v599_v61, %v574_v52 }
  0xc3   : > { %v3467_v54 = vadd.s32 4294967294, %v1096_v41  ;;  %v561_v16 = vsel %vm557_vm7, %v541_v56, %v544_v22  ;;  %v578_v38 = vmul.u32 %v576_v12, %v574_v52  ;;  %v579_v31 = vmul.u32 %v577_v14, %v574_v52 }
  0xc4   : > { %v580_v37 = vmul.u32 %v576_v12, %v575_v60  ;;  %v563_v10 = vsel %vm559_vm9, %v547_v23, %v562_v2  ;;  %v600_v18 = vmul.u32 %v598_v8, %v574_v52  ;;  %v602_v21 = vmul.u32 %v598_v8, %v575_v60 }
  0xc5   : > { %vm3468_vm12 = vcmp.lt.s32.totalorder %v3467_v54, 0  ;;  %vm226_vm13 = vcmp.gt.s32.totalorder %v225_v58, 0  ;;  %v581_v29 = vmul.u32 %v577_v14, %v575_v60  ;;  %v582_v33 = vshll.u32 %v579_v31, 16 }
  0xc6   : > { %v1099_v26 = vsel %vm3468_vm12, 0, %v3467_v54  ;;  %v584_v35 = vshll.u32 %v580_v37, 16  ;;  %v4010_v25 = vmul.f32 %v955_v15, %v953_v5  ;;  %v603_v39 = vmul.u32 %v599_v61, %v575_v60 }
  0xc7   : > { %v604_v40 = vshll.u32 %v601_v4, 16  ;;  %v4012_v41 = vshll.u32 %v223_v3, 8  ;;  %v564_v22 = vsel %vm558_vm11, %v561_v16, %v563_v10  ;;  %vm586_vm14 = vc.u32 %v578_v38, %v582_v33 }
  0xc8   : > { %v588_v43 = vadd.s32 %v582_v33, %v578_v38  ;;  %v606_v48 = vshll.u32 %v602_v21, 16  ;;  %v1104_v23 = vsub.s32 4294967266, %v1099_v26  ;;  %v587_v45 = vsel %vm586_vm14, 1, %v3726_v0 }
  0xc9   : > { %vm608_vm15 = vc.u32 %v600_v18, %v604_v40  ;;  %v227_v46 = vsel %vm226_vm13, %v225_v58, 0  ;;  %v589_v47 = vadd.s32 %v587_v45, %v581_v29  ;;  %v610_v52 = vadd.s32 %v604_v40, %v600_v18 }
  0xca   : > { %vm590_vm0 = vc.u32 %v588_v43, %v584_v35  ;;  %v609_v50 = vsel %vm608_vm15, 1, %v3726_v0  ;;  %v1100_v53 = vsub.s32 32, %v1099_v26  ;;  %v1101_v54 = vshll.u32 %v3970_v17, %v1099_v26 }
  0xcb   : > { %v591_v6 = vsel %vm590_vm0, 1, %v3726_v0  ;;  %v611_v55 = vadd.s32 %v609_v50, %v603_v39  ;;  %v583_v20 = vshrl.u32 %v579_v31, 16  ;;  %vm612_vm1 = vc.u32 %v610_v52, %v606_v48 }
  0xcc   : > { %v593_v56 = vadd.s32 %v591_v6, %v589_v47  ;;  %v229_v57 = vand.u32 31, %v227_v46  ;;  %v1105_v60 = vadd.s32 127, %v1104_v23  ;;  %v585_v61 = vshrl.u32 %v580_v37, 16 }
  0xcd   : > { %v605_v7 = vshrl.u32 %v601_v4, 16  ;;  %v613_v8 = vsel %vm612_vm1, 1, %v3726_v0  ;;  %v4022_v12 = vshrl.u32 %v227_v46, 5  ;;  %v1102_v3 = vshrl.u32 %v1084_v62, %v1100_v53 }
  0xce   : > { %v594_v58 = vadd.s32 %v593_v56, %v583_v20  ;;  %v615_v2 = vadd.s32 %v613_v8, %v611_v55  ;;  %v230_v14 = vsub.s32 32, %v229_v57  ;;  %v607_v5 = vshrl.u32 %v602_v21, 16 }
  0xcf   : > { %v4024_v17 = vadd.s32 %v610_v52, %v606_v48  ;;  %v232_v15 = vshll.u32 %v5086_v28, %v229_v57  ;;  %v235_v4 = vshll.u32 %v5084_v30, %v229_v57  ;;  %v238_v10 = vshll.u32 %v5082_v32, %v229_v57 }
  0xd0   : > { %v4027_v16 = vadd.s32 %v594_v58, %v585_v61  ;;  %v616_v38 = vadd.s32 %v615_v2, %v605_v7  ;;  %v233_v31 = vshrl.u32 %v5084_v30, %v230_v14  ;;  %v236_v37 = vshrl.u32 %v5082_v32, %v230_v14 }
  0xd1   : > { %v239_v18 = vshrl.u32 %v5080_v34, %v230_v14  ;;  %v242_v62 = vshrl.u32 %v5078_v36, %v230_v14  ;;  %v1106_v21 = vshll.u32 %v1105_v60, 23  ;;  %v241_v29 = vshll.u32 %v5080_v34, %v229_v57 }
  0xd2   : > { %v617_v26 = vadd.s32 %v616_v38, %v607_v5  ;;  %vm247_vm2 = vcmp.lt.s32.totalorder %v4022_v12, 1  ;;  %vm620_vm3 = vc.u32 %v4027_v16, %v4024_v17  ;;  %v234_v33 = vor.u32 %v233_v31, %v232_v15 }
  0xd3   : > { %v237_v35 = vor.u32 %v236_v37, %v235_v4  ;;  %v240_v39 = vor.u32 %v239_v18, %v238_v10  ;;  %v243_v43 = vor.u32 %v242_v62, %v241_v29  ;;  %v244_v48 = vshll.u32 %v5078_v36, %v229_v57  ;;  %v184_v4 = vpop.permute.xlu1 %183 }
  0xd4   : > { %v621_v40 = vadd.s32 1, %v617_v26  ;;  %v245_v23 = vshrl.u32 %v5077_v44, %v230_v14  ;;  %v4041_v45 = vor.u32 %v1102_v3, %v1101_v54  ;;  %v618_v46 = vmul.u32 %v3957_v1, %v564_v22 }
  0xd5   : > { %vm250_vm4 = vcmp.lt.s32.totalorder %v4022_v12, 4  ;;  %v255_v47 = vsel %vm247_vm2, %v234_v33, %v237_v35  ;;  %vm249_vm5 = vcmp.lt.s32.totalorder %v4022_v12, 3  ;;  %vm248_vm6 = vcmp.lt.s32.totalorder %v4022_v12, 2 }
  0xd6   : > { %v622_v50 = vsel %vm620_vm3, %v621_v40, %v617_v26  ;;  %v246_v52 = vor.u32 %v245_v23, %v244_v48  ;;  %v256_v53 = vsel %vm250_vm4, %v243_v43, 920167782  ;;  %v259_v1 = vsel %vm247_vm2, %v237_v35, %v240_v39 }
  0xd7   : > { %v623_v6 = vadd.s32 %v622_v50, %v618_v46  ;;  %v257_v54 = vsel %vm249_vm5, %v240_v39, %v256_v53  ;;  %v957_v22 = vxor.u32 2147483648, %v4010_v25  ;;  %v1107_v55 = vor.u32 4788187, %v1106_v21 }
  0xd8   : > { %v258_v20 = vsel %vm248_vm6, %v255_v47, %v257_v54  ;;  %v260_v56 = vsel %vm250_vm4, %v246_v52, 1326507024  ;;  %v231_v8 = vshrl.u32 %v5086_v28, %v230_v14  ;;  %v264_v2 = vand.u32 65535, %v4012_v41 }
  0xd9   : > { %v624_v57 = vadd.s32 536870912, %v623_v6  ;;  %v261_v60 = vsel %vm249_vm5, %v243_v43, %v260_v56  ;;  %v288_v61 = vand.u32 65535, %v258_v20  ;;  %v289_v7 = vshrl.u32 %v258_v20, 16 }
  0xda   : > { %v262_v58 = vsel %vm248_vm6, %v259_v1, %v261_v60  ;;  %v265_v3 = vshrl.u32 %v4012_v41, 16  ;;  %v1110_v5 = vcvt.s32.f32 %v4041_v45  ;;  %v1108_v37 = vand.u32 2147483647, %v1107_v55 }
  0xdb   : > { %v4068_v15 = vshrl.u32 %v624_v57, 30  ;;  %v266_v38 = vand.u32 65535, %v262_v58  ;;  %v267_v31 = vshrl.u32 %v262_v58, 16  ;;  %v251_v10 = vsel %vm247_vm2, %v231_v8, %v234_v33 }
  0xdc   : > { %v291_v18 = vmul.u32 %v289_v7, %v264_v2  ;;  %v292_v14 = vmul.u32 %v288_v61, %v265_v3  ;;  %vm837_vm7 = vcmp.lt.s32.totalorder %v3828_v11, 0  ;;  %v252_v21 = vsel %vm250_vm4, %v240_v39, 2102212464 }
  0xdd   : > { %v626_v62 = vshll.u32 %v4068_v15, 30  ;;  %v269_v26 = vmul.u32 %v267_v31, %v264_v2  ;;  %v270_v29 = vmul.u32 %v266_v38, %v265_v3  ;;  %v290_v40 = vmul.u32 %v288_v61, %v264_v2 }
  0xde   : > { %v293_v43 = vmul.u32 %v289_v7, %v265_v3  ;;  %v294_v48 = vshll.u32 %v291_v18, 16  ;;  %v4077_v23 = vmul.f32 %v3825_v9, %v184_v4  ;;  %v268_v33 = vmul.u32 %v266_v38, %v264_v2 }
  0xdf   : > { %v4079_v45 = vsub.s32 %v623_v6, %v626_v62  ;;  %v271_v46 = vmul.u32 %v267_v31, %v265_v3  ;;  %v272_v47 = vshll.u32 %v269_v26, 16  ;;  %v274_v50 = vshll.u32 %v270_v29, 16 }
  0xe0   : > { %v296_v52 = vshll.u32 %v292_v14, 16  ;;  %vm298_vm8 = vc.u32 %v290_v40, %v294_v48  ;;  %v300_v53 = vadd.s32 %v294_v48, %v290_v40  ;;  %vm4083_vm9 = vcmp.le.f32.partialorder %v835_v13, 0.7853982 }
  0xe1   : > { %vm628_vm10 = vcmp.lt.s32.totalorder %v4079_v45, 0  ;;  %v629_v54 = vsub.s32 0, %v4079_v45  ;;  %vm276_vm11 = vc.u32 %v268_v33, %v272_v47  ;;  %v278_v6 = vadd.s32 %v272_v47, %v268_v33 }
  0xe2   : > { %v253_v1 = vsel %vm249_vm5, %v237_v35, %v252_v21  ;;  %v277_v55 = vsel %vm276_vm11, 1, %v3726_v0  ;;  %v299_v20 = vsel %vm298_vm8, 1, %v3726_v0  ;;  %vm302_vm12 = vc.u32 %v300_v53, %v296_v52 }
  0xe3   : > { %v630_v56 = vsel %vm628_vm10, %v629_v54, %v4079_v45  ;;  %v279_v13 = vadd.s32 %v277_v55, %v271_v46  ;;  %vm280_vm13 = vc.u32 %v278_v6, %v274_v50  ;;  %v301_v57 = vadd.s32 %v299_v20, %v293_v43  ;;  %v174_v46 = vpop.permute.xlu0 %173 }
  0xe4   : > { %v631_v60 = vclz %v630_v56  ;;  %v281_v61 = vsel %vm280_vm13, 1, %v3726_v0  ;;  %v295_v7 = vshrl.u32 %v291_v18, 16  ;;  %v303_v8 = vsel %vm302_vm12, 1, %v3726_v0 }
  0xe5   : > { %v273_v58 = vshrl.u32 %v269_v26, 16  ;;  %v283_v2 = vadd.s32 %v281_v61, %v279_v13  ;;  %v305_v3 = vadd.s32 %v303_v8, %v301_v57  ;;  %v683_v35 = vand.u32 2139095040, %v4077_v23 }
  0xe6   : > { %v958_v38 = vsel %vm837_vm7, %v957_v22, %v4010_v25  ;;  %v1111_v31 = vmul.f32 %v1110_v5, %v1108_v37  ;;  %v3458_v4 = vadd.s32 4294967294, %v631_v60  ;;  %v275_v62 = vshrl.u32 %v270_v29, 16 }
  0xe7   : > { %v284_v21 = vadd.s32 %v283_v2, %v273_v58  ;;  %v297_v40 = vshrl.u32 %v292_v14, 16  ;;  %v306_v43 = vadd.s32 %v305_v3, %v295_v7  ;;  %v684_v48 = vshrl.u32 %v683_v35, 23 }
  0xe8   : > { %vm3459_vm14 = vcmp.lt.s32.totalorder %v3458_v4, 0  ;;  %v254_v18 = vsel %vm248_vm6, %v251_v10, %v253_v1  ;;  %v4102_v26 = vadd.s32 %v300_v53, %v296_v52  ;;  %v680_v33 = vand.u32 2147483647, %v4077_v23 }
  0xe9   : > { %v634_v47 = vsel %vm3459_vm14, 0, %v3458_v4  ;;  %v4105_v50 = vadd.s32 %v284_v21, %v275_v62  ;;  %v307_v25 = vadd.s32 %v306_v43, %v297_v40  ;;  %v3460_v22 = vadd.s32 4294967169, %v684_v48 }
  0xea   : > { %v4110_v5 = vsel %vm4083_vm9, %v3828_v11, %v958_v38  ;;  %v1112_v37 = vxor.u32 2147483648, %v1111_v31  ;;  %v639_v14 = vsub.s32 4294967266, %v634_v47  ;;  %v4115_v29 = vmul.f32 %v3825_v9, %v174_v46 }
  0xeb   : > { %5101 = vst [vmem:[#allocation5_spill] sm:$0xff] %v4110_v5  ;;  %vm310_vm15 = vc.u32 %v4105_v50, %v4102_v26  ;;  %v311_v12 = vadd.s32 1, %v307_v25  ;;  %v690_v10 = vadd.s32 1, %v3460_v22  ;;  %v635_v52 = vsub.s32 32, %v634_v47 }
  0xec   : > { %v308_v53 = vmul.u32 %v4012_v41, %v254_v18  ;;  %v687_v54 = vand.u32 8388607, %v680_v33  ;;  %vm5092_vm0 = vcmp.lt.s32.totalorder %v3835_v19, 0  ;;  %v640_v6 = vadd.s32 127, %v639_v14 }
  0xed   : > { %v312_v1 = vsel %vm310_vm15, %v311_v12, %v307_v25  ;;  %vm691_vm1 = vcmp.gt.s32.totalorder %v690_v10, 0  ;;  %v4123_v55 = vmul.f32 %v4110_v5, %v4110_v5  ;;  %v619_v20 = vadd.s32 %v4024_v17, %v4027_v16 }
  0xee   : > { %v313_v9 = vadd.s32 %v312_v1, %v308_v53  ;;  %v692_v56 = vsel %vm691_vm1, %v690_v10, 0  ;;  %v1113_v41 = vsel %vm5092_vm0, %v1112_v37, %v1111_v31  ;;  %v5075_v57 = vand.u32 2147483647, %v4115_v29 }
  0xef   : > { %v694_v13 = vand.u32 31, %v692_v56  ;;  %v373_v60 = vand.u32 2139095040, %v4115_v29  ;;  %vm4133_vm2 = vcmp.le.f32.partialorder %v990_v24, 0.7853982  ;;  %v5102_v61 = vmov 0 }
  0xf0   : > { %v5103_v61 = vsel %vm4133_vm2, 4294967295, %v5102_v61  ;;  %v636_v7 = vshll.u32 %v4079_v45, %v634_v47  ;;  %v637_v8 = vshrl.u32 %v619_v20, %v635_v52  ;;  %v314_v17 = vadd.s32 536870912, %v313_v9 }
  0xf1   : > { %5104 = vst [vmem:[#allocation6_spill] sm:$0xff] %v5103_v61  ;;  %v688_v16 = vor.u32 8388608, %v687_v54  ;;  %v641_v58 = vshll.u32 %v640_v6, 23  ;;  %v695_v2 = vsub.s32 32, %v694_v13  ;;  %v697_v3 = vshll.u32 %v5086_v28, %v694_v13 }
  0xf2   : > { %v700_v35 = vshll.u32 %v5084_v30, %v694_v13  ;;  %v4140_v38 = vshrl.u32 %v314_v17, 30  ;;  %v4142_v31 = vshrl.u32 %v692_v56, 5  ;;  %v703_v24 = vshll.u32 %v5082_v32, %v694_v13 }
  0xf3   : > { %v706_v4 = vshll.u32 %v5080_v34, %v694_v13  ;;  %v698_v62 = vshrl.u32 %v5084_v30, %v695_v2  ;;  %v701_v45 = vshrl.u32 %v5082_v32, %v695_v2  ;;  %v704_v21 = vshrl.u32 %v5080_v34, %v695_v2 }
  0xf4   : > { %v709_v40 = vshll.u32 %v5078_v36, %v694_v13  ;;  %v316_v43 = vshll.u32 %v4140_v38, 30  ;;  %v707_v48 = vshrl.u32 %v5078_v36, %v695_v2  ;;  %v710_v18 = vshrl.u32 %v5077_v44, %v695_v2 }
  0xf5   : > { %v4153_v46 = vshll.u32 %v688_v16, 8  ;;  %v638_v47 = vor.u32 %v637_v8, %v636_v7  ;;  %v642_v25 = vor.u32 4788187, %v641_v58  ;;  %v699_v22 = vor.u32 %v698_v62, %v697_v3 }
  0xf6   : > { %v702_v37 = vor.u32 %v701_v45, %v700_v35  ;;  %v4155_v14 = vsub.s32 %v313_v9, %v316_v43  ;;  %v705_v12 = vor.u32 %v704_v21, %v703_v24  ;;  %v708_v10 = vor.u32 %v707_v48, %v706_v4 }
  0xf7   : > { %vm712_vm3 = vcmp.lt.s32.totalorder %v4142_v31, 1  ;;  %v711_v52 = vor.u32 %v710_v18, %v709_v40  ;;  %vm714_vm4 = vcmp.lt.s32.totalorder %v4142_v31, 3  ;;  %vm715_vm5 = vcmp.lt.s32.totalorder %v4142_v31, 4 }
  0xf8   : > { %v377_v53 = vand.u32 8388607, %v5075_v57  ;;  %vm318_vm6 = vcmp.lt.s32.totalorder %v4155_v14, 0  ;;  %v319_v54 = vsub.s32 0, %v4155_v14  ;;  %vm713_vm8 = vcmp.lt.s32.totalorder %v4142_v31, 2 }
  0xf9   : > { %v374_v6 = vshrl.u32 %v373_v60, 23  ;;  %v4168_v1 = vsel %vm4133_vm2, %v3835_v19, %v1113_v41  ;;  %v643_v20 = vand.u32 2147483647, %v642_v25  ;;  %v720_v9 = vsel %vm712_vm3, %v699_v22, %v702_v37 }
  0xfa   : > { %5105 = vst [vmem:[#allocation7_spill] sm:$0xff] %v4168_v1  ;;  %v721_v56 = vsel %vm715_vm5, %v708_v10, 920167782  ;;  %v645_v13 = vcvt.s32.f32 %v638_v47  ;;  %v320_v7 = vsel %vm318_vm6, %v319_v54, %v4155_v14  ;;  %v729_v60 = vand.u32 65535, %v4153_v46 }
  0xfb   : > { %v722_v8 = vsel %vm714_vm4, %v705_v12, %v721_v56  ;;  %v321_v17 = vclz %v320_v7  ;;  %v724_v16 = vsel %vm712_vm3, %v702_v37, %v705_v12  ;;  %v725_v58 = vsel %vm715_vm5, %v711_v52, 1326507024 }
  0xfc   : > { %v723_v41 = vsel %vm713_vm8, %v720_v9, %v722_v8  ;;  %v726_v3 = vsel %vm714_vm4, %v708_v10, %v725_v58  ;;  %v3454_v24 = vadd.s32 4294967169, %v374_v6  ;;  %v378_v4 = vor.u32 8388608, %v377_v53 }
  0xfd   : > { %v754_v35 = vshrl.u32 %v723_v41, 16  ;;  %v646_v62 = vmul.f32 %v645_v13, %v643_v20  ;;  %v3452_v45 = vadd.s32 4294967294, %v321_v17  ;;  %v727_v21 = vsel %vm713_vm8, %v724_v16, %v726_v3 }
  0xfe   : > { %v753_v40 = vand.u32 65535, %v723_v41  ;;  %v696_v43 = vshrl.u32 %v5086_v28, %v695_v2  ;;  %v730_v48 = vshrl.u32 %v4153_v46, 16  ;;  %v731_v18 = vand.u32 65535, %v727_v21 }
  0xff   : > { %v732_v47 = vshrl.u32 %v727_v21, 16  ;;  %v309_v25 = vadd.s32 %v4102_v26, %v4105_v50  ;;  %vm3453_vm10 = vcmp.lt.s32.totalorder %v3452_v45, 0  ;;  %v717_v10 = vsel %vm715_vm5, %v705_v12, 2102212464 }
 0x100   : > { %v756_v52 = vmul.u32 %v754_v35, %v729_v60  ;;  %vm527_vm11 = vcmp.lt.s32.totalorder %v3914_v42, 0  ;;  %v4195_v53 = vsel %vm3453_vm10, 0, %v3452_v45  ;;  %v735_v6 = vmul.u32 %v731_v18, %v730_v48 }
 0x101   : > { %v734_v54 = vmul.u32 %v732_v47, %v729_v60  ;;  %v4197_v20 = vshll.u32 %v378_v4, 8  ;;  %v647_v2 = vxor.u32 2147483648, %v646_v62  ;;  %v329_v9 = vsub.s32 4294967266, %v4195_v53 }
 0x102   : > { %v757_v56 = vmul.u32 %v753_v40, %v730_v48  ;;  %v380_v13 = vadd.s32 1, %v3454_v24  ;;  %v716_v26 = vsel %vm712_vm3, %v696_v43, %v699_v22  ;;  %v718_v50 = vsel %vm714_vm4, %v702_v37, %v717_v10  ;;  %v204_v43 = vpop.permute.xlu1 %203 }
 0x103   : > { %v733_v12 = vmul.u32 %v731_v18, %v729_v60  ;;  %v737_v7 = vshll.u32 %v734_v54, 16  ;;  %v736_v8 = vmul.u32 %v732_v47, %v730_v48  ;;  %v755_v17 = vmul.u32 %v753_v40, %v729_v60 }
 0x104   : > { %v758_v41 = vmul.u32 %v754_v35, %v730_v48  ;;  %v759_v16 = vshll.u32 %v756_v52, 16  ;;  %v330_v58 = vadd.s32 127, %v329_v9  ;;  %v739_v3 = vshll.u32 %v735_v6, 16 }
 0x105   : > { %vm741_vm12 = vc.u32 %v733_v12, %v737_v7  ;;  %v743_v4 = vadd.s32 %v737_v7, %v733_v12  ;;  %v761_v21 = vshll.u32 %v757_v56, 16  ;;  %vm381_vm14 = vcmp.gt.s32.totalorder %v380_v13, 0 }
 0x106   : > { %v742_v45 = vsel %vm741_vm12, 1, %v3726_v0  ;;  %vm763_vm13 = vc.u32 %v755_v17, %v759_v16  ;;  %v765_v37 = vadd.s32 %v759_v16, %v755_v17  ;;  %v325_v18 = vsub.s32 32, %v4195_v53 }
 0x107   : > { %v744_v24 = vadd.s32 %v742_v45, %v736_v8  ;;  %vm745_vm15 = vc.u32 %v743_v4, %v739_v3  ;;  %v764_v22 = vsel %vm763_vm13, 1, %v3726_v0  ;;  %v738_v60 = vshrl.u32 %v734_v54, 16  ;;  %v4216_v8 = vld [vmem:[%s5073_s1] ss:$0 sm:$0xff] }
 0x108   : > { %v746_v35 = vsel %vm745_vm15, 1, %v3726_v0  ;;  %v766_v40 = vadd.s32 %v764_v22, %v758_v41  ;;  %v331_v48 = vshll.u32 %v330_v58, 23  ;;  %vm767_vm1 = vc.u32 %v765_v37, %v761_v21 }
 0x109   : > { %v748_v47 = vadd.s32 %v746_v35, %v744_v24  ;;  %v382_v10 = vsel %vm381_vm14, %v380_v13, 0  ;;  %v4210_v9 = vsel %vm527_vm11, %v647_v2, %v646_v62  ;;  %v768_v12 = vsel %vm767_vm1, 1, %v3726_v0 }
 0x10a   : > { %v384_v7 = vand.u32 31, %v382_v10  ;;  %v4219_v54 = vmul.f32 %v4216_v8, %v204_v43  ;;  %v740_v17 = vshrl.u32 %v735_v6, 16  ;;  %v760_v16 = vshrl.u32 %v756_v52, 16 }
 0x10b   : > { %v749_v41 = vadd.s32 %v748_v47, %v738_v60  ;;  %v770_v58 = vadd.s32 %v768_v12, %v766_v40  ;;  %v326_v13 = vshll.u32 %v4155_v14, %v4195_v53  ;;  %v327_v62 = vshrl.u32 %v309_v25, %v325_v18 }
 0x10c   : > { %v719_v2 = vsel %vm713_vm8, %v716_v26, %v718_v50  ;;  %v385_v3 = vsub.s32 32, %v384_v7  ;;  %v332_v4 = vor.u32 4788187, %v331_v48  ;;  %v762_v24 = vshrl.u32 %v757_v56, 16 }
 0x10d   : > { %v750_v45 = vadd.s32 %v749_v41, %v740_v17  ;;  %v771_v22 = vadd.s32 %v770_v58, %v760_v16  ;;  %v769_v35 = vadd.s32 %v765_v37, %v761_v21  ;;  %v387_v43 = vshll.u32 %v5086_v28, %v384_v7 }
 0x10e   : > { %v388_v6 = vshrl.u32 %v5084_v30, %v385_v3  ;;  %v391_v52 = vshrl.u32 %v5082_v32, %v385_v3  ;;  %v390_v40 = vshll.u32 %v5084_v30, %v384_v7  ;;  %v393_v14 = vshll.u32 %v5082_v32, %v384_v7 }
 0x10f   : > { %v772_v60 = vadd.s32 %v771_v22, %v762_v24  ;;  %v394_v31 = vshrl.u32 %v5080_v34, %v385_v3  ;;  %vm775_vm3 = vc.u32 %v750_v45, %v769_v35  ;;  %v4231_v25 = vshrl.u32 %v382_v10, 5 }
 0x110   : > { %v396_v53 = vshll.u32 %v5080_v34, %v384_v7  ;;  %v397_v56 = vshrl.u32 %v5078_v36, %v385_v3  ;;  %v4235_v50 = vor.u32 %v388_v6, %v387_v43  ;;  %v4237_v21 = vor.u32 %v391_v52, %v390_v40 }
 0x111   : > { %v776_v26 = vadd.s32 1, %v772_v60  ;;  %v395_v37 = vor.u32 %v394_v31, %v393_v14  ;;  %v773_v18 = vmul.u32 %v4153_v46, %v719_v2  ;;  %v399_v47 = vshll.u32 %v5078_v36, %v384_v7 }
 0x112   : > { %v398_v48 = vor.u32 %v397_v56, %v396_v53  ;;  %v400_v12 = vshrl.u32 %v5077_v44, %v385_v3  ;;  %v328_v17 = vor.u32 %v327_v62, %v326_v13  ;;  %v333_v10 = vand.u32 2147483647, %v332_v4 }
 0x113   : > { %v777_v41 = vsel %vm775_vm3, %v776_v26, %v772_v60  ;;  %v419_v16 = vand.u32 65535, %v4197_v20  ;;  %vm402_vm4 = vcmp.lt.s32.totalorder %v4231_v25, 1  ;;  %vm405_vm5 = vcmp.lt.s32.totalorder %v4231_v25, 4 }
 0x114   : > { %v778_v58 = vadd.s32 %v777_v41, %v773_v18  ;;  %v401_v24 = vor.u32 %v400_v12, %v399_v47  ;;  %vm404_vm6 = vcmp.lt.s32.totalorder %v4231_v25, 3  ;;  %v410_v46 = vsel %vm402_vm4, %v4235_v50, %v4237_v21 }
 0x115   : > { %v411_v7 = vsel %vm405_vm5, %v398_v48, 920167782  ;;  %v414_v13 = vsel %vm402_vm4, %v4237_v21, %v395_v37  ;;  %vm403_vm8 = vcmp.lt.s32.totalorder %v4231_v25, 2  ;;  %v335_v22 = vcvt.s32.f32 %v328_v17 }
 0x116   : > { %v779_v62 = vadd.s32 536870912, %v778_v58  ;;  %v412_v2 = vsel %vm404_vm6, %v395_v37, %v411_v7  ;;  %v415_v4 = vsel %vm405_vm5, %v401_v24, 1326507024  ;;  %v420_v52 = vshrl.u32 %v4197_v20, 16 }
 0x117   : > { %v413_v43 = vsel %vm403_vm8, %v410_v46, %v412_v2  ;;  %v416_v6 = vsel %vm404_vm6, %v398_v48, %v415_v4  ;;  %v4269_v53 = vmul.f32 %v335_v22, %v333_v10  ;;  %v5076_v18 = vand.u32 2147483647, %v4219_v54 }
 0x118   : > { %v4265_v60 = vshrl.u32 %v779_v62, 30  ;;  %v417_v40 = vsel %vm403_vm8, %v414_v13, %v416_v6  ;;  %v443_v14 = vand.u32 65535, %v413_v43  ;;  %v444_v31 = vshrl.u32 %v413_v43, 16 }
 0x119   : > { %v421_v56 = vand.u32 65535, %v417_v40  ;;  %v422_v26 = vshrl.u32 %v417_v40, 16  ;;  %v386_v12 = vshrl.u32 %v5086_v28, %v385_v3  ;;  %v774_v41 = vadd.s32 %v769_v35, %v750_v45 }
 0x11a   : > { %v781_v47 = vshll.u32 %v4265_v60, 30  ;;  %v446_v48 = vmul.u32 %v444_v31, %v419_v16  ;;  %v447_v17 = vmul.u32 %v443_v14, %v420_v52  ;;  %v407_v24 = vsel %vm405_vm5, %v395_v37, 2102212464 }
 0x11b   : > { %v424_v46 = vmul.u32 %v422_v26, %v419_v16  ;;  %v425_v7 = vmul.u32 %v421_v56, %v420_v52  ;;  %v445_v10 = vmul.u32 %v443_v14, %v419_v16  ;;  %v1303_v2 = vand.u32 2139095040, %v4219_v54 }
 0x11c   : > { %v4276_v13 = vsub.s32 %v778_v58, %v781_v47  ;;  %v449_v62 = vshll.u32 %v446_v48, 16  ;;  %v423_v4 = vmul.u32 %v421_v56, %v419_v16  ;;  %v426_v22 = vmul.u32 %v422_v26, %v420_v52 }
 0x11d   : > { %v427_v43 = vshll.u32 %v424_v46, 16  ;;  %v448_v6 = vmul.u32 %v444_v31, %v420_v52  ;;  %v429_v45 = vshll.u32 %v425_v7, 16  ;;  %v451_v35 = vshll.u32 %v447_v17, 16 }
 0x11e   : > { %vm783_vm10 = vcmp.lt.s32.totalorder %v4276_v13, 0  ;;  %v784_v3 = vsub.s32 0, %v4276_v13  ;;  %vm453_vm13 = vc.u32 %v445_v10, %v449_v62  ;;  %v455_v40 = vadd.s32 %v449_v62, %v445_v10 }
 0x11f   : > { %vm431_vm12 = vc.u32 %v423_v4, %v427_v43  ;;  %v433_v37 = vadd.s32 %v427_v43, %v423_v4  ;;  %vm4283_vm14 = vcmp.le.f32.partialorder %v525_v27, 0.7853982  ;;  %v454_v14 = vsel %vm453_vm13, 1, %v3726_v0 }
 0x120   : > { %v785_v16 = vsel %vm783_vm10, %v784_v3, %v4276_v13  ;;  %v432_v52 = vsel %vm431_vm12, 1, %v3726_v0  ;;  %v1304_v31 = vshrl.u32 %v1303_v2, 23  ;;  %v456_v47 = vadd.s32 %v454_v14, %v448_v6 }
 0x121   : > { %v786_v56 = vclz %v785_v16  ;;  %v434_v26 = vadd.s32 %v432_v52, %v426_v22  ;;  %vm435_vm15 = vc.u32 %v433_v37, %v429_v45  ;;  %v406_v10 = vsel %vm402_vm4, %v386_v12, %v4235_v50 }
 0x122   : > { %v436_v27 = vsel %vm435_vm15, 1, %v3726_v0  ;;  %vm457_vm1 = vc.u32 %v455_v40, %v451_v35  ;;  %v3472_v62 = vadd.s32 4294967169, %v1304_v31  ;;  %v428_v43 = vshrl.u32 %v424_v46, 16 }
 0x123   : > { %v3461_v4 = vadd.s32 4294967294, %v786_v56  ;;  %v438_v3 = vadd.s32 %v436_v27, %v434_v26  ;;  %v458_v57 = vsel %vm457_vm1, 1, %v3726_v0  ;;  %v408_v2 = vsel %vm404_vm6, %v4237_v21, %v407_v24 }
 0x124   : > { %v450_v22 = vshrl.u32 %v446_v48, 16  ;;  %v460_v45 = vadd.s32 %v458_v57, %v456_v47  ;;  %v1310_v6 = vadd.s32 1, %v3472_v62  ;;  %v430_v37 = vshrl.u32 %v425_v7, 16 }
 0x125   : > { %vm3462_vm3 = vcmp.lt.s32.totalorder %v3461_v4, 0  ;;  %v439_v16 = vadd.s32 %v438_v3, %v428_v43  ;;  %v452_v50 = vshrl.u32 %v447_v17, 16  ;;  %v459_v52 = vadd.s32 %v455_v40, %v451_v35  ;;  %v199_v17 = vpop.permute.xlu0 %198 }
 0x126   : > { %v789_v12 = vsel %vm3462_vm3, 0, %v3461_v4  ;;  %v461_v14 = vadd.s32 %v460_v45, %v450_v22  ;;  %vm1311_vm4 = vcmp.gt.s32.totalorder %v1310_v6, 0  ;;  %v1307_v26 = vand.u32 8388607, %v5076_v18 }
 0x127   : > { %v790_v31 = vsub.s32 32, %v789_v12  ;;  %v794_v46 = vsub.s32 4294967266, %v789_v12  ;;  %v440_v56 = vadd.s32 %v439_v16, %v430_v37  ;;  %v4302_v21 = vmul.f32 %v4168_v1, %v4168_v1 }
 0x128   : > { %v409_v57 = vsel %vm403_vm8, %v406_v10, %v408_v2  ;;  %v462_v48 = vadd.s32 %v461_v14, %v452_v50  ;;  %v1312_v24 = vsel %vm1311_vm4, %v1310_v6, 0  ;;  %v4310_v7 = vsel %vm4283_vm14, %v3914_v42, %v4210_v9 }
 0x129   : > { %vm217_vm5 = vcmp.lt.s32.totalorder %v3948_v51, 0  ;;  %v792_v35 = vshrl.u32 %v774_v41, %v790_v31  ;;  %v795_v40 = vadd.s32 127, %v794_v46  ;;  %vm465_vm6 = vc.u32 %v440_v56, %v459_v52 }
 0x12a   : > { %v337_v47 = vxor.u32 2147483648, %v4269_v53  ;;  %v791_v27 = vshll.u32 %v4276_v13, %v789_v12  ;;  %v466_v25 = vadd.s32 1, %v462_v48  ;;  %v1314_v10 = vand.u32 31, %v1312_v24 }
 0x12b   : > { %v796_v62 = vshll.u32 %v795_v40, 23  ;;  %v463_v4 = vmul.u32 %v4197_v20, %v409_v57  ;;  %v1308_v43 = vor.u32 8388608, %v1307_v26  ;;  %v4317_v3 = vmul.f32 %v4216_v8, %v199_v17 }
 0x12c   : > { %v793_v9 = vor.u32 %v792_v35, %v791_v27  ;;  %v467_v2 = vsel %vm465_vm6, %v466_v25, %v462_v48  ;;  %v4319_v22 = vshrl.u32 %v1312_v24, 5  ;;  %v1315_v41 = vsub.s32 32, %v1314_v10 }
 0x12d   : > { %v797_v45 = vor.u32 4788187, %v796_v62  ;;  %v468_v6 = vadd.s32 %v467_v2, %v463_v4  ;;  %v1317_v37 = vshll.u32 %v5086_v28, %v1314_v10  ;;  %v1320_v13 = vshll.u32 %v5084_v30, %v1314_v10 }
 0x12e   : > { %v1318_v16 = vshrl.u32 %v5084_v30, %v1315_v41  ;;  %v1321_v50 = vshrl.u32 %v5082_v32, %v1315_v41  ;;  %v1323_v20 = vshll.u32 %v5082_v32, %v1314_v10  ;;  %v1324_v8 = vshrl.u32 %v5080_v34, %v1315_v41 }
 0x12f   : > { %v798_v12 = vand.u32 2147483647, %v797_v45  ;;  %v469_v14 = vadd.s32 536870912, %v468_v6  ;;  %v1326_v31 = vshll.u32 %v5080_v34, %v1314_v10  ;;  %v1327_v46 = vshrl.u32 %v5078_v36, %v1315_v41 }
 0x130   : > { %v800_v26 = vcvt.s32.f32 %v793_v9  ;;  %v1319_v57 = vor.u32 %v1318_v16, %v1317_v37  ;;  %v1322_v48 = vor.u32 %v1321_v50, %v1320_v13  ;;  %v1325_v24 = vor.u32 %v1324_v8, %v1323_v20 }
 0x131   : > { %vm682_vm8 = vcmp.lt.s32.totalorder %v4077_v23, 0  ;;  %v4330_v17 = vshrl.u32 %v469_v14, 30  ;;  %v1328_v35 = vor.u32 %v1327_v46, %v1326_v31  ;;  %v1329_v40 = vshll.u32 %v5078_v36, %v1314_v10 }
 0x132   : > { %v1330_v27 = vshrl.u32 %v5077_v44, %v1315_v41  ;;  %v4337_v25 = vsel %vm217_vm5, %v337_v47, %v4269_v53  ;;  %v801_v62 = vmul.f32 %v800_v26, %v798_v12  ;;  %v4339_v4 = vshll.u32 %v1308_v43, 8 }
 0x133   : > { %v5089_v9 = vand.u32 2147483647, %v4317_v3  ;;  %v471_v2 = vshll.u32 %v4330_v17, 30  ;;  %vm1332_vm10 = vcmp.lt.s32.totalorder %v4319_v22, 1  ;;  %vm1335_vm12 = vcmp.lt.s32.totalorder %v4319_v22, 4 }
 0x134   : > { %v1331_v45 = vor.u32 %v1330_v27, %v1329_v40  ;;  %v464_v10 = vadd.s32 %v459_v52, %v440_v56  ;;  %vm1334_vm13 = vcmp.lt.s32.totalorder %v4319_v22, 3  ;;  %v1340_v37 = vsel %vm1332_vm10, %v1319_v57, %v1322_v48 }
 0x135   : > { %v1341_v53 = vsel %vm1335_vm12, %v1328_v35, 920167782  ;;  %v4350_v47 = vsub.s32 %v468_v6, %v471_v2  ;;  %vm1333_vm15 = vcmp.lt.s32.totalorder %v4319_v22, 2  ;;  %v1344_v13 = vsel %vm1332_vm10, %v1322_v48, %v1325_v24 }
 0x136   : > { %v1342_v43 = vsel %vm1334_vm13, %v1325_v24, %v1341_v53  ;;  %v802_v16 = vxor.u32 2147483648, %v801_v62  ;;  %v1345_v56 = vsel %vm1335_vm12, %v1331_v45, 1326507024  ;;  %v1349_v50 = vand.u32 65535, %v4339_v4 }
 0x137   : > { %v1343_v52 = vsel %vm1333_vm15, %v1340_v37, %v1342_v43  ;;  %vm473_vm1 = vcmp.lt.s32.totalorder %v4350_v47, 0  ;;  %v474_v6 = vsub.s32 0, %v4350_v47  ;;  %v1316_v20 = vshrl.u32 %v5086_v28, %v1315_v41 }
 0x138   : > { %v1346_v8 = vsel %vm1334_vm13, %v1328_v35, %v1345_v56  ;;  %v1337_v12 = vsel %vm1335_vm12, %v1325_v24, 2102212464  ;;  %v1373_v31 = vand.u32 65535, %v1343_v52  ;;  %v1374_v46 = vshrl.u32 %v1343_v52, 16 }
 0x139   : > { %v1347_v14 = vsel %vm1333_vm15, %v1344_v13, %v1346_v8  ;;  %v475_v26 = vsel %vm473_vm1, %v474_v6, %v4350_v47  ;;  %v1350_v40 = vshrl.u32 %v4339_v4, 16  ;;  %v803_v41 = vsel %vm682_vm8, %v802_v16, %v801_v62 }
 0x13a   : > { %v1351_v27 = vand.u32 65535, %v1347_v14  ;;  %v1352_v2 = vshrl.u32 %v1347_v14, 16  ;;  %v476_v45 = vclz %v475_v26  ;;  %v1336_v35 = vsel %vm1332_vm10, %v1316_v20, %v1319_v57 }
 0x13b   : > { %v1376_v37 = vmul.u32 %v1374_v46, %v1349_v50  ;;  %v1338_v24 = vsel %vm1334_vm13, %v1322_v48, %v1337_v12  ;;  %v1148_v13 = vand.u32 2139095040, %v4317_v3  ;;  %v1375_v56 = vmul.u32 %v1373_v31, %v1349_v50 }
 0x13c   : > { %v1354_v53 = vmul.u32 %v1352_v2, %v1349_v50  ;;  %v1355_v43 = vmul.u32 %v1351_v27, %v1350_v40  ;;  %v3455_v52 = vadd.s32 4294967294, %v476_v45  ;;  %v1377_v6 = vmul.u32 %v1373_v31, %v1350_v40 }
 0x13d   : > { %v1379_v8 = vshll.u32 %v1376_v37, 16  ;;  %vm4382_vm3 = vcmp.le.f32.partialorder %v215_v59, 0.7853982  ;;  %vm4388_vm4 = vcmp.le.f32.partialorder %v680_v33, 0.7853982  ;;  %v1353_v48 = vmul.u32 %v1351_v27, %v1349_v50 }
 0x13e   : > { %v1356_v16 = vmul.u32 %v1352_v2, %v1350_v40  ;;  %v1357_v20 = vshll.u32 %v1354_v53, 16  ;;  %v1378_v12 = vmul.u32 %v1374_v46, %v1350_v40  ;;  %vm3456_vm6 = vcmp.lt.s32.totalorder %v3455_v52, 0 }
 0x13f   : > { %v1359_v14 = vshll.u32 %v1355_v43, 16  ;;  %v1380_v31 = vshrl.u32 %v1376_v37, 16  ;;  %vm1383_vm10 = vc.u32 %v1375_v56, %v1379_v8  ;;  %v479_v26 = vsel %vm3456_vm6, 0, %v3455_v52 }
 0x140   : > { %vm1361_vm12 = vc.u32 %v1353_v48, %v1357_v20  ;;  %v1363_v59 = vadd.s32 %v1357_v20, %v1353_v48  ;;  %v1384_v45 = vsel %vm1383_vm10, 1, %v3726_v0  ;;  %v480_v18 = vsub.s32 32, %v479_v26 }
 0x141   : > { %v484_v44 = vsub.s32 4294967266, %v479_v26  ;;  %v1362_v33 = vsel %vm1361_vm12, 1, %v3726_v0  ;;  %v1381_v36 = vshll.u32 %v1377_v6, 16  ;;  %v1385_v50 = vadd.s32 %v1379_v8, %v1375_v56 }
 0x142   : > { %v1364_v34 = vadd.s32 %v1362_v33, %v1356_v16  ;;  %vm1365_vm13 = vc.u32 %v1363_v59, %v1359_v14  ;;  %v1386_v27 = vadd.s32 %v1384_v45, %v1378_v12  ;;  %v1358_v46 = vshrl.u32 %v1354_v53, 16 }
 0x143   : > { %v485_v2 = vadd.s32 127, %v484_v44  ;;  %v1366_v40 = vsel %vm1365_vm13, 1, %v3726_v0  ;;  %v1149_v37 = vshrl.u32 %v1148_v13, 23  ;;  %v482_v32 = vshrl.u32 %v464_v10, %v480_v18 }
 0x144   : > { %v1360_v52 = vshrl.u32 %v1355_v43, 16  ;;  %v1368_v30 = vadd.s32 %v1366_v40, %v1364_v34  ;;  %vm1387_vm1 = vc.u32 %v1385_v50, %v1381_v36  ;;  %v1152_v1 = vand.u32 8388607, %v5089_v9 }
 0x145   : > { %v486_v48 = vshll.u32 %v485_v2, 23  ;;  %v1388_v20 = vsel %vm1387_vm1, 1, %v3726_v0  ;;  %v3469_v28 = vadd.s32 4294967169, %v1149_v37  ;;  %v481_v16 = vshll.u32 %v4350_v47, %v479_v26 }
 0x146   : > { %v1369_v56 = vadd.s32 %v1368_v30, %v1358_v46  ;;  %v1390_v8 = vadd.s32 %v1388_v20, %v1386_v27  ;;  %v339_v44 = vsub.s32 4, %v4140_v38  ;;  %v4404_v18 = vsel %vm4382_vm3, %v3948_v51, %v4337_v25 }
 0x147   : > { %v4409_v34 = vsel %vm4388_vm4, %v4077_v23, %v803_v41  ;;  %v487_v10 = vor.u32 4788187, %v486_v48  ;;  %v1155_v53 = vadd.s32 1, %v3469_v28  ;;  %v483_v43 = vor.u32 %v482_v32, %v481_v16 }
 0x148   : > { %v1370_v13 = vadd.s32 %v1369_v56, %v1360_v52  ;;  %v1382_v47 = vshrl.u32 %v1377_v6, 16  ;;  %v1391_v30 = vadd.s32 %v1390_v8, %v1380_v31  ;;  %v1339_v12 = vsel %vm1333_vm15, %v1336_v35, %v1338_v24 }
 0x149   : > { %v1389_v14 = vadd.s32 %v1385_v50, %v1381_v36  ;;  %v1153_v26 = vor.u32 8388608, %v1152_v1  ;;  %vm1156_vm6 = vcmp.gt.s32.totalorder %v1155_v53, 0  ;;  %v488_v59 = vand.u32 2147483647, %v487_v10 }
 0x14a   : > { %v1392_v25 = vadd.s32 %v1391_v30, %v1382_v47  ;;  %v1157_v45 = vsel %vm1156_vm6, %v1155_v53, 0  ;;  %v340_v41 = vsel %vm217_vm5, %v339_v44, %v4140_v38  ;;  %v4418_v28 = vmul.f32 %v4310_v7, %v4310_v7 }
 0x14b   : > { %v4422_v32 = vmul.f32 %v4404_v18, %v4404_v18  ;;  %vm1395_vm10 = vc.u32 %v1370_v13, %v1389_v14  ;;  %v1159_v22 = vand.u32 31, %v1157_v45  ;;  %v4426_v36 = vmul.f32 %v4409_v34, %v4409_v34 }
 0x14c   : > { %v490_v1 = vcvt.s32.f32 %v483_v43  ;;  %v1393_v35 = vmul.u32 %v4339_v4, %v1339_v12  ;;  %v1396_v24 = vadd.s32 1, %v1392_v25  ;;  %v4429_v6 = vadd.s32 %v1389_v14, %v1370_v13 }
 0x14d   : > { %v1160_v38 = vsub.s32 32, %v1159_v22  ;;  %v4431_v31 = vshll.u32 %v1153_v26, 8  ;;  %v342_v33 = vsel %vm4382_vm3, 0, %v340_v41  ;;  %vm372_vm5 = vcmp.lt.s32.totalorder %v4115_v29, 0 }
 0x14e   : > { %v491_v50 = vmul.f32 %v490_v1, %v488_v59  ;;  %v1397_v27 = vsel %vm1395_vm10, %v1396_v24, %v1392_v25  ;;  %v4436_v2 = vshrl.u32 %v1157_v45, 5  ;;  %v5112_v46 = vmov 683565275  }
 0x14f   : > { %v1162_v40 = vshll.u32 %v5112_v46, %v1159_v22  ;;  %v1398_v37 = vadd.s32 %v1397_v27, %v1393_v35  ;;  %v5113_v52 = vmov 2475754826   ;;  %v5114_v20 = vmov 2131351028  }
 0x150   : > { %v1163_v4 = vshrl.u32 %v5113_v52, %v1160_v38  ;;  %v1165_v48 = vshll.u32 %v5113_v52, %v1159_v22  ;;  %v1168_v16 = vshll.u32 %v5114_v20, %v1159_v22  ;;  %v1166_v56 = vshrl.u32 %v5114_v20, %v1160_v38 }
 0x151   : > { %v5115_v8 = vmov 2102212464   ;;  %v5116_v10 = vmov 920167782   ;;  %v5117_v43 = vand.u32 2147483647, %v4115_v29 }
 0x152   : > { %v1169_v62 = vshrl.u32 %v5115_v8, %v1160_v38  ;;  %v1171_v44 = vshll.u32 %v5115_v8, %v1159_v22  ;;  %v1172_v53 = vshrl.u32 %v5116_v10, %v1160_v38  ;;  %v1399_v47 = vadd.s32 536870912, %v1398_v37 }
 0x153   : > { %vm4448_vm15 = vcmp.le.f32.partialorder %v5117_v43, 0.7853982  ;;  %v1164_v30 = vor.u32 %v1163_v4, %v1162_v40  ;;  %v1174_v12 = vshll.u32 %v5116_v10, %v1159_v22  ;;  %v5120_v14 = vmov 1326507024  }
 0x154   : > { %v1175_v26 = vshrl.u32 %v5120_v14, %v1160_v38  ;;  %v1167_v59 = vor.u32 %v1166_v56, %v1165_v48  ;;  %v1170_v25 = vor.u32 %v1169_v62, %v1168_v16  ;;  %v1173_v45 = vor.u32 %v1172_v53, %v1171_v44 }
 0x155   : > { %v1194_v41 = vand.u32 65535, %v4431_v31  ;;  %v492_v1 = vxor.u32 2147483648, %v491_v50  ;;  %v4455_v35 = vshrl.u32 %v1399_v47, 30  ;;  %vm1177_vm3 = vcmp.lt.s32.totalorder %v4436_v2, 1 }
 0x156   : > { %v1176_v24 = vor.u32 %v1175_v26, %v1174_v12  ;;  %vm1180_vm12 = vcmp.lt.s32.totalorder %v4436_v2, 4  ;;  %v1185_v27 = vsel %vm1177_vm3, %v1164_v30, %v1167_v59  ;;  %v1195_v22 = vshrl.u32 %v4431_v31, 16 }
 0x157   : > { %5121 = vst [vmem:[#allocation8_spill] sm:$0xff] %v4455_v35  ;;  %v4462_v40 = vand.u32 3, %v342_v33  ;;  %v1401_v52 = vshll.u32 %v4455_v35, 30  ;;  %vm1179_vm13 = vcmp.lt.s32.totalorder %v4436_v2, 3  ;;  %v1186_v4 = vsel %vm1180_vm12, %v1173_v45, 920167782 }
 0x158   : > { %v1189_v48 = vsel %vm1177_vm3, %v1167_v59, %v1170_v25  ;;  %vm1178_vm1 = vcmp.lt.s32.totalorder %v4436_v2, 2  ;;  %v1187_v20 = vsel %vm1179_vm13, %v1170_v25, %v1186_v4  ;;  %v1190_v16 = vsel %vm1180_vm12, %v1176_v24, 1326507024 }
 0x159   : > { %v4475_v56 = vadd.s32 3, %v342_v33  ;;  %v493_v8 = vsel %vm372_vm5, %v492_v1, %v491_v50  ;;  %v1402_v62 = vsub.s32 %v1398_v37, %v1401_v52  ;;  %v1188_v44 = vsel %vm1178_vm1, %v1185_v27, %v1187_v20 }
 0x15a   : > { %v1191_v10 = vsel %vm1179_vm13, %v1173_v45, %v1190_v16  ;;  %v1161_v53 = vshrl.u32 %v5112_v46, %v1160_v38  ;;  %v1218_v47 = vand.u32 65535, %v1188_v44  ;;  %v1219_v12 = vshrl.u32 %v1188_v44, 16 }
 0x15b   : > { %v1192_v43 = vsel %vm1178_vm1, %v1189_v48, %v1191_v10  ;;  %vm1403_vm6 = vcmp.lt.s32.totalorder %v1402_v62, 0  ;;  %v1404_v33 = vsub.s32 0, %v1402_v62  ;;  %v4489_v50 = vsel %vm4448_vm15, %v4115_v29, %v493_v8 }
 0x15c   : > { %v1196_v14 = vand.u32 65535, %v1192_v43  ;;  %v1197_v26 = vshrl.u32 %v1192_v43, 16  ;;  %v1181_v37 = vsel %vm1177_vm3, %v1161_v53, %v1164_v30  ;;  %v1221_v45 = vmul.u32 %v1219_v12, %v1194_v41 }
 0x15d   : > { %v1222_v1 = vmul.u32 %v1218_v47, %v1195_v22  ;;  %v1405_v38 = vsel %vm1403_vm6, %v1404_v33, %v1402_v62  ;;  %v1182_v46 = vsel %vm1180_vm12, %v1170_v25, 2102212464  ;;  %v1220_v4 = vmul.u32 %v1218_v47, %v1194_v41 }
 0x15e   : > { %v1199_v24 = vmul.u32 %v1197_v26, %v1194_v41  ;;  %v1200_v27 = vmul.u32 %v1196_v14, %v1195_v22  ;;  %v1406_v52 = vclz %v1405_v38  ;;  %v1224_v48 = vshll.u32 %v1221_v45, 16 }
 0x15f   : > { %v494_v20 = vsub.s32 4, %v4330_v17  ;;  %v1198_v16 = vmul.u32 %v1196_v14, %v1194_v41  ;;  %v1201_v44 = vmul.u32 %v1197_v26, %v1195_v22  ;;  %v1223_v10 = vmul.u32 %v1219_v12, %v1195_v22 }
 0x160   : > { %v1202_v8 = vshll.u32 %v1199_v24, 16  ;;  %v3473_v43 = vadd.s32 4294967294, %v1406_v52  ;;  %v1204_v9 = vshll.u32 %v1200_v27, 16  ;;  %v1226_v30 = vshll.u32 %v1222_v1, 16 }
 0x161   : > { %vm1228_vm10 = vc.u32 %v1220_v4, %v1224_v48  ;;  %v1230_v25 = vadd.s32 %v1224_v48, %v1220_v4  ;;  %v1183_v47 = vsel %vm1179_vm13, %v1167_v59, %v1182_v46  ;;  %v1225_v52 = vshrl.u32 %v1221_v45, 16 }
 0x162   : > { %vm1206_vm3 = vc.u32 %v1198_v16, %v1202_v8  ;;  %v1208_v53 = vadd.s32 %v1202_v8, %v1198_v16  ;;  %v1229_v33 = vsel %vm1228_vm10, 1, %v3726_v0  ;;  %vm3474_vm12 = vcmp.lt.s32.totalorder %v3473_v43, 0 }
 0x163   : > { %v1207_v38 = vsel %vm1206_vm3, 1, %v3726_v0  ;;  %v1231_v35 = vadd.s32 %v1229_v33, %v1223_v10  ;;  %v1409_v41 = vsel %vm3474_vm12, 0, %v3473_v43  ;;  %vm1232_vm0 = vc.u32 %v1230_v25, %v1226_v30 }
 0x164   : > { %v1209_v14 = vadd.s32 %v1207_v38, %v1201_v44  ;;  %vm1210_vm6 = vc.u32 %v1208_v53, %v1204_v9  ;;  %v1410_v22 = vsub.s32 32, %v1409_v41  ;;  %v1414_v12 = vsub.s32 4294967266, %v1409_v41 }
 0x165   : > { %v1211_v26 = vsel %vm1210_vm6, 1, %v3726_v0  ;;  %v1203_v16 = vshrl.u32 %v1199_v24, 16  ;;  %v1205_v8 = vshrl.u32 %v1200_v27, 16  ;;  %v1233_v4 = vsel %vm1232_vm0, 1, %v3726_v0 }
 0x166   : > { %v1213_v5 = vadd.s32 %v1211_v26, %v1209_v14  ;;  %v1411_v48 = vshll.u32 %v1402_v62, %v1409_v41  ;;  %v1412_v59 = vshrl.u32 %v4429_v6, %v1410_v22  ;;  %v1415_v46 = vadd.s32 127, %v1414_v12 }
 0x167   : > { %v1235_v61 = vadd.s32 %v1233_v4, %v1231_v35  ;;  %v1227_v43 = vshrl.u32 %v1222_v1, 16  ;;  %v344_v9 = vmul.f32 -0.001358992, %v4422_v32  ;;  %v351_v44 = vmul.f32 -0.00019511016, %v4422_v32 }
 0x168   : > { %v1214_v10 = vadd.s32 %v1213_v5, %v1203_v16  ;;  %v1413_v53 = vor.u32 %v1412_v59, %v1411_v48  ;;  %v1416_v33 = vshll.u32 %v1415_v46, 23  ;;  %v495_v45 = vsel %vm372_vm5, %v494_v20, %v4330_v17 }
 0x169   : > { %v1236_v38 = vadd.s32 %v1235_v61, %v1225_v52  ;;  %v1234_v0 = vadd.s32 %v1230_v25, %v1226_v30  ;;  %v345_v62 = vadd.f32 0.041655596, %v344_v9  ;;  %v352_v27 = vadd.f32 0.008332121, %v351_v44  ;;  %v158_v44 = vld [vmem:[%s5073_s1 + $0x38] sm:$0xff] }
 0x16a   : > { %v1215_v24 = vadd.s32 %v1214_v10, %v1205_v8  ;;  %v4510_v6 = vmul.f32 %v4489_v50, %v4489_v50  ;;  %v1417_v5 = vor.u32 4788187, %v1416_v33  ;;  %v1184_v35 = vsel %vm1178_vm1, %v1181_v37, %v1183_v47 }
 0x16b   : > { %v1237_v1 = vadd.s32 %v1236_v38, %v1227_v43  ;;  %v346_v61 = vmul.f32 %v345_v62, %v4422_v32  ;;  %v353_v41 = vmul.f32 %v352_v27, %v4422_v32  ;;  %v497_v17 = vsel %vm4448_vm15, 0, %v495_v45 }
 0x16c   : > { %vm1240_vm0 = vc.u32 %v1215_v24, %v1234_v0  ;;  %v1418_v20 = vand.u32 2147483647, %v1417_v5  ;;  %v1420_v30 = vcvt.s32.f32 %v1413_v53  ;;  %v360_v14 = vand.u32 3, %v4475_v56  ;;  %v154_v53 = vld [vmem:[%s5073_s1 + $0x20] sm:$0xff] }
 0x16d   : > { %v1241_v25 = vadd.s32 1, %v1237_v1  ;;  %vm5095_vm5 = vcmp.lt.s32.totalorder %v4219_v54, 0  ;;  %v1238_v22 = vmul.u32 %v4431_v31, %v1184_v35  ;;  %v347_v2 = vadd.f32 -0.4999988, %v346_v61 }
 0x16e   : > { %v354_v37 = vadd.f32 -0.16666654, %v353_v41  ;;  %v649_v47 = vsub.s32 4, %v4068_v15  ;;  %v1421_v12 = vmul.f32 %v1420_v30, %v1418_v20  ;;  %vm1601_vm13 = vcmp.eq.s32.totalorder %v4462_v40, 0 }
 0x16f   : > { %v1242_v26 = vsel %vm1240_vm0, %v1241_v25, %v1237_v1  ;;  %vm1604_vm1 = vcmp.eq.s32.totalorder %v4462_v40, 2  ;;  %v4524_v13 = vand.u32 3, %v497_v17  ;;  %v348_v16 = vmul.f32 %v347_v2, %v4422_v32 }
 0x170   : > { %v1243_v52 = vadd.s32 %v1242_v26, %v1238_v22  ;;  %v355_v56 = vmul.f32 %v354_v37, %v4422_v32  ;;  %v499_v8 = vmul.f32 -0.001358992, %v4510_v6  ;;  %vm1600_vm15 = vcmp.lt.s32.totalorder %v4462_v40, 2  ;;  %v157_v32 = vld [vmem:[%s5073_s1 + $0x30] sm:$0xff] }
 0x171   : > { %v506_v31 = vmul.f32 -0.00019511016, %v4510_v6  ;;  %vm361_vm10 = vcmp.lt.s32.totalorder %v360_v14, 2  ;;  %vm362_vm3 = vcmp.eq.s32.totalorder %v360_v14, 0  ;;  %v514_v4 = vadd.s32 3, %v497_v17 }
 0x172   : > { %v1244_v48 = vadd.s32 536870912, %v1243_v52  ;;  %v349_v59 = vadd.f32 1.0, %v348_v16  ;;  %v356_v46 = vadd.f32 1.0, %v355_v56  ;;  %vm358_vm12 = vweird.f32 %v3948_v51 }
 0x173   : > { %v500_v10 = vadd.f32 0.041655596, %v499_v8  ;;  %v1422_v43 = vxor.u32 2147483648, %v1421_v12  ;;  %v4532_v9 = vadd.s32 %v1234_v0, %v1215_v24  ;;  %v507_v33 = vadd.f32 0.008332121, %v506_v31  ;;  %v155_v0 = vld [vmem:[%s5073_s1 + $0x28] sm:$0xff] }
 0x174   : > { %v650_v38 = vsel %vm527_vm11, %v649_v47, %v4068_v15  ;;  %v4546_v45 = vshrl.u32 %v1244_v48, 30  ;;  %v159_v24 = vpack.c.bf16 %v158_v44, %v157_v32  ;;  %v357_v62 = vmul.f32 %v356_v46, %v4404_v18 }
 0x175   : > { %vm365_vm6 = vcmp.eq.s32.totalorder %v360_v14, 2  ;;  %v156_v27 = vpack.c.bf16 %v155_v0, %v154_v53  ;;  %v366_v5 = vxor.u32 2147483648, %v349_v59  ;;  %v501_v35 = vmul.f32 %v500_v10, %v4510_v6 }
 0x176   : > { %v4553_v1 = vand.u32 3, %v514_v4  ;;  %v1246_v61 = vshll.u32 %v4546_v45, 30  ;;  %2715 = vmatpush.bf16.msra.mxu0 %v159_v24  ;;  %v363_v15 = vxor.u32 2147483648, %v357_v62  ;;  %v508_v41 = vmul.f32 %v507_v33, %v4510_v6 }
 0x177   : > { %v4559_v17 = vsel %vm4283_vm14, 0, %v650_v38  ;;  %v4563_v18 = vsel %vm5095_vm5, %v1422_v43, %v1421_v12  ;;  %2756 = vmatpush.bf16.msra.mxu1 %v156_v27  ;;  %v502_v20 = vadd.f32 -0.4999988, %v501_v35  ;;  %v1606_v30 = vsel %vm1604_vm1, %v366_v5, %v357_v62 }
 0x178   : > { %vm1758_vm11 = vcmp.eq.s32.totalorder %v4524_v13, 2  ;;  %v367_v25 = vsel %vm365_vm6, %v366_v5, %v357_v62  ;;  %v4568_v22 = vsub.s32 %v1243_v52, %v1246_v61  ;;  %v509_v2 = vadd.f32 -0.16666654, %v508_v41 }
 0x179   : > { %v1603_v58 = vsel %vm1601_vm13, %v349_v59, %v363_v15  ;;  %v364_v37 = vsel %vm362_vm3, %v349_v59, %v363_v15  ;;  %v503_v47 = vmul.f32 %v502_v20, %v4510_v6  ;;  %vm1755_vm14 = vcmp.eq.s32.totalorder %v4524_v13, 0 }
 0x17a   : > { %v1607_v12 = vsel %vm1600_vm15, %v1603_v58, %v1606_v30  ;;  %v368_v26 = vsel %vm361_vm10, %v364_v37, %v367_v25  ;;  %vm517_vm0 = vcmp.eq.s32.totalorder %v4553_v1, 0  ;;  %vm1248_vm1 = vcmp.lt.s32.totalorder %v4568_v22, 0 }
 0x17b   : > { %v1249_v52 = vsub.s32 0, %v4568_v22  ;;  %v510_v16 = vmul.f32 %v509_v2, %v4510_v6  ;;  %vm1754_vm13 = vcmp.lt.s32.totalorder %v4524_v13, 2  ;;  %vm520_vm3 = vcmp.eq.s32.totalorder %v4553_v1, 2 }
 0x17c   : > { %v504_v56 = vadd.f32 1.0, %v503_v47  ;;  %vm513_vm6 = vweird.f32 %v4115_v29  ;;  %v1608_v40 = vsel %vm358_vm12, nan, %v1607_v12  ;;  %vm516_vm15 = vcmp.lt.s32.totalorder %v4553_v1, 2 }
 0x17d   : > { %v654_v14 = vmul.f32 -0.001358992, %v4418_v28  ;;  %v661_v8 = vmul.f32 -0.00019511016, %v4418_v28  ;;  %v1250_v31 = vsel %vm1248_vm1, %v1249_v52, %v4568_v22  ;;  %v511_v4 = vadd.f32 1.0, %v510_v16 }
 0x17e   : > { %vm5096_vm10 = vcmask 130048   ;;  %v804_v6 = vsub.s32 4, %v4265_v60  ;;  %v809_v48 = vmul.f32 -0.001358992, %v4426_v36  ;;  %v1251_v59 = vclz %v1250_v31 }
 0x17f   : > { %v521_v46 = vxor.u32 2147483648, %v504_v56  ;;  %v655_v10 = vadd.f32 0.041655596, %v654_v14  ;;  %v662_v43 = vadd.f32 0.008332121, %v661_v8  ;;  %v512_v32 = vmul.f32 %v511_v4, %v4489_v50 }
 0x180   : > { %v369_v44 = vsel %vm358_vm12, nan, %v368_v26  ;;  %v805_v53 = vsel %vm682_vm8, %v804_v6, %v4265_v60  ;;  %v810_v33 = vadd.f32 0.041655596, %v809_v48  ;;  %v3470_v38 = vadd.s32 4294967294, %v1251_v59 }
 0x181   : > { %v656_v24 = vmul.f32 %v655_v10, %v4418_v28  ;;  %v663_v0 = vmul.f32 %v662_v43, %v4418_v28  ;;  %v816_v62 = vmul.f32 -0.00019511016, %v4426_v36  ;;  %v518_v27 = vxor.u32 2147483648, %v512_v32 }
 0x182   : > { %v1760_v5 = vsel %vm1758_vm11, %v521_v46, %v512_v32  ;;  %v807_v51 = vsel %vm4388_vm4, 0, %v805_v53  ;;  %v811_v50 = vmul.f32 %v810_v33, %v4426_v36  ;;  %vm3471_vm12 = vcmp.lt.s32.totalorder %v3470_v38, 0 }
 0x183   : > { %v522_v60 = vsel %vm520_vm3, %v521_v46, %v512_v32  ;;  %v657_v35 = vadd.f32 -0.4999988, %v656_v24  ;;  %v664_v61 = vadd.f32 -0.16666654, %v663_v0  ;;  %v1254_v15 = vsel %vm3471_vm12, 0, %v3470_v38 }
 0x184   : > { %v1757_v41 = vsel %vm1755_vm14, %v504_v56, %v518_v27  ;;  %v519_v20 = vsel %vm517_vm0, %v504_v56, %v518_v27  ;;  %v812_v30 = vadd.f32 -0.4999988, %v811_v50  ;;  %v1255_v25 = vsub.s32 32, %v1254_v15 }
 0x185   : > { %v1256_v57 = vshll.u32 %v4568_v22, %v1254_v15  ;;  %v1259_v2 = vsub.s32 4294967266, %v1254_v15  ;;  %v1761_v58 = vsel %vm1754_vm13, %v1757_v41, %v1760_v5  ;;  %v523_v47 = vsel %vm516_vm15, %v519_v20, %v522_v60 }
 0x186   : > { %v1762_v37 = vsel %vm513_vm6, nan, %v1761_v58  ;;  %v658_v12 = vmul.f32 %v657_v35, %v4418_v28  ;;  %v665_v26 = vmul.f32 %v664_v61, %v4418_v28  ;;  %v1257_v52 = vshrl.u32 %v4532_v9, %v1255_v25 }
 0x187   : > { %v1260_v16 = vadd.s32 127, %v1259_v2  ;;  %v2691_v56 = vpack.c.bf16 %v1762_v37, %v1608_v40  ;;  %v524_v22 = vsel %vm513_vm6, nan, %v523_v47  ;;  %v813_v31 = vmul.f32 %v812_v30, %v4426_v36 }
 0x188   : > { %v2687_v14 = vpack.c.bf16 %v524_v22, %v369_v44  ;;  %v659_v13 = vadd.f32 1.0, %v658_v12  ;;  %v666_v8 = vadd.f32 1.0, %v665_v26  ;;  %v1258_v4 = vor.u32 %v1257_v52, %v1256_v57 }
 0x189   : > { %v1261_v6 = vshll.u32 %v1260_v16, 23  ;;  %3499 = vmatmul.msk.bf16.vlgmr.msra.gmra.mxu0 %vm5096_vm10, %v2691_v56  ;;  %v817_v1 = vadd.f32 0.008332121, %v816_v62  ;;  %v1907_v48 = vand.u32 3, %v4559_v17  ;;  %v5122_v28 = vand.u32 2147483647, %v4219_v54 }
 0x18a   : > { %3503 = vmatmul.msk.bf16.vlgmr.msra.gmra.mxu1 %vm5096_vm10, %v2687_v14  ;;  %v667_v29 = vmul.f32 %v666_v8, %v4310_v7  ;;  %v676_v40 = vxor.u32 2147483648, %v659_v13  ;;  %v814_v59 = vadd.f32 1.0, %v813_v31  ;;  %vm1147_vm4 = vcmp.lt.s32.totalorder %v4317_v3, 0 }
 0x18b   : > { %vm4630_vm8 = vcmp.le.f32.partialorder %v5122_v28, 0.7853982  ;;  %v1262_v46 = vor.u32 4788187, %v1261_v6  ;;  %vm668_vm11 = vweird.f32 %v3914_v42  ;;  %v818_v10 = vmul.f32 %v817_v1, %v4426_v36 }
 0x18c   : > { %v2061_v43 = vand.u32 3, %v807_v51  ;;  %v4643_v32 = vsel %vm4630_vm8, %v4219_v54, %v4563_v18  ;;  %v1265_v44 = vcvt.s32.f32 %v1258_v4  ;;  %v673_v53 = vxor.u32 2147483648, %v667_v29 }
 0x18d   : > { %vm1908_vm14 = vcmp.lt.s32.totalorder %v1907_v48, 2  ;;  %v1263_v7 = vand.u32 2147483647, %v1262_v46  ;;  %v819_v33 = vadd.f32 -0.16666654, %v818_v10  ;;  %vm1909_vm0 = vcmp.eq.s32.totalorder %v1907_v48, 0 }
 0x18e   : > { %vm1912_vm1 = vcmp.eq.s32.totalorder %v1907_v48, 2  ;;  %v831_v38 = vxor.u32 2147483648, %v814_v59  ;;  %v1911_v24 = vsel %vm1909_vm0, %v659_v13, %v673_v53  ;;  %v669_v62 = vadd.s32 3, %v4559_v17 }
 0x18f   : > { %v1914_v0 = vsel %vm1912_vm1, %v676_v40, %v667_v29  ;;  %v1266_v27 = vmul.f32 %v1265_v44, %v1263_v7  ;;  %v820_v5 = vmul.f32 %v819_v33, %v4426_v36  ;;  %vm2062_vm13 = vcmp.lt.s32.totalorder %v2061_v43, 2 }
 0x190   : > { %v824_v50 = vadd.s32 3, %v807_v51  ;;  %vm823_vm3 = vweird.f32 %v4077_v23  ;;  %vm2063_vm6 = vcmp.eq.s32.totalorder %v2061_v43, 0  ;;  %vm2066_vm15 = vcmp.eq.s32.totalorder %v2061_v43, 2 }
 0x191   : > { %v670_v18 = vand.u32 3, %v669_v62  ;;  %v959_v60 = vsub.s32 4, %v3918_v49  ;;  %v1267_v35 = vxor.u32 2147483648, %v1266_v27  ;;  %v821_v61 = vadd.f32 1.0, %v820_v5 }
 0x192   : > { %v1915_v15 = vsel %vm1908_vm14, %v1911_v24, %v1914_v0  ;;  %v825_v41 = vand.u32 3, %v824_v50  ;;  %v5125_v20 = vand.u32 2147483647, %v4317_v3  ;;  %v964_v36 = vmul.f32 -0.001358992, %v4123_v55 }
 0x193   : > { %vm672_vm0 = vcmp.eq.s32.totalorder %v670_v18, 0  ;;  %vm675_vm1 = vcmp.eq.s32.totalorder %v670_v18, 2  ;;  %v971_v51 = vmul.f32 -0.00019511016, %v4123_v55  ;;  %v822_v30 = vmul.f32 %v821_v61, %v4409_v34 }
 0x194   : > { %vm4652_vm12 = vcmp.le.f32.partialorder %v5125_v20, 0.7853982  ;;  %vm671_vm5 = vcmp.lt.s32.totalorder %v670_v18, 2  ;;  %v674_v25 = vsel %vm672_vm0, %v659_v13, %v673_v53  ;;  %v677_v57 = vsel %vm675_vm1, %v676_v40, %v667_v29 }
 0x195   : > { %v1268_v2 = vsel %vm1147_vm4, %v1267_v35, %v1266_v27  ;;  %v1916_v58 = vsel %vm668_vm11, nan, %v1915_v15  ;;  %v678_v37 = vsel %vm671_vm5, %v674_v25, %v677_v57  ;;  %v960_v47 = vsel %vm837_vm7, %v959_v60, %v3918_v49  ;;  %v5132_v60 = vld [vmem:[#allocation5_spill] sm:$0xff] }
 0x196   : > { %v828_v12 = vxor.u32 2147483648, %v822_v30  ;;  %v2068_v26 = vsel %vm2066_vm15, %v831_v38, %v822_v30  ;;  %vm826_vm14 = vcmp.lt.s32.totalorder %v825_v41, 2  ;;  %vm827_vm10 = vcmp.eq.s32.totalorder %v825_v41, 0 }
 0x197   : > { %v679_v34 = vsel %vm668_vm11, nan, %v678_v37  ;;  %vm830_vm0 = vcmp.eq.s32.totalorder %v825_v41, 2  ;;  %v965_v52 = vadd.f32 0.041655596, %v964_v36  ;;  %v972_v16 = vadd.f32 0.008332121, %v971_v51 }
 0x198   : > { %v2065_v56 = vsel %vm2063_vm6, %v814_v59, %v828_v12  ;;  %v829_v22 = vsel %vm827_vm10, %v814_v59, %v828_v12  ;;  %v832_v14 = vsel %vm830_vm0, %v831_v38, %v822_v30  ;;  %v962_v13 = vsel %vm4083_vm9, 0, %v960_v47 }
 0x199   : > { %v2069_v49 = vsel %vm2062_vm13, %v2065_v56, %v2068_v26  ;;  %v833_v8 = vsel %vm826_vm14, %v829_v22, %v832_v14  ;;  %v966_v31 = vmul.f32 %v965_v52, %v4123_v55  ;;  %v973_v4 = vmul.f32 %v972_v16, %v4123_v55  ;;  %v5133_v22 = vld [vmem:[#allocation7_spill] sm:$0xff] }
 0x19a   : > { %v2070_v42 = vsel %vm823_vm3, nan, %v2069_v49  ;;  %v834_v6 = vsel %vm823_vm3, nan, %v833_v8  ;;  %v1114_v1 = vsub.s32 4, %v3955_v63  ;;  %v1119_v48 = vmul.f32 -0.001358992, %v4302_v21 }
 0x19b   : > { %v2692_v28 = vpack.c.bf16 %v2070_v42, %v1916_v58  ;;  %v2688_v39 = vpack.c.bf16 %v834_v6, %v679_v34  ;;  %v967_v29 = vadd.f32 -0.4999988, %v966_v31  ;;  %v974_v40 = vadd.f32 -0.16666654, %v973_v4  ;;  %v5134_v6 = vld [vmem:[#allocation8_spill] sm:$0xff] }
 0x19c   : > { %v4684_v59 = vsel %vm4652_vm12, %v4317_v3, %v1268_v2  ;;  %vm5128_vm7 = vcmp.lt.s32.totalorder %v3835_v19, 0  ;;  %v1120_v10 = vadd.f32 0.041655596, %v1119_v48  ;;  %v1126_v23 = vmul.f32 -0.00019511016, %v4302_v21 }
 0x19d   : > { %v1115_v46 = vsel %vm5128_vm7, %v1114_v1, %v3955_v63  ;;  %vm5129_vm9 = vcmask 130048   ;;  %v968_v43 = vmul.f32 %v967_v29, %v4123_v55  ;;  %v975_v44 = vmul.f32 %v974_v40, %v4123_v55 }
 0x19e   : > { %3500 = vmatmul.msk.bf16.gmra.mxu0 %vm5129_vm9, %v2692_v28  ;;  %vm5130_vm5 = vmmov %vm5129_vm9  ;;  %v1117_v7 = vsel %vm4133_vm2, 0, %v1115_v46  ;;  %v2215_v33 = vand.u32 3, %v962_v13  ;;  %v4698_v38 = vmul.f32 %v4643_v32, %v4643_v32  ;;  %v1121_v63 = vmul.f32 %v1120_v10, %v4302_v21 }
 0x19f   : > { %3504 = vmatmul.msk.bf16.gmra.mxu1 %vm5130_vm5, %v2688_v39  ;;  %v1127_v24 = vadd.f32 0.008332121, %v1126_v23  ;;  %v979_v0 = vadd.s32 3, %v962_v13  ;;  %v4703_v62 = vmul.f32 %v4684_v59, %v4684_v59  ;;  %v969_v27 = vadd.f32 1.0, %v968_v43 }
 0x1a0   : > { %v976_v5 = vadd.f32 1.0, %v975_v44  ;;  %vm978_vm10 = vweird.f32 %v3828_v11  ;;  %v1122_v55 = vadd.f32 -0.4999988, %v1121_v63  ;;  %vm2216_vm2 = vcmp.lt.s32.totalorder %v2215_v33, 2 }
 0x1a1   : > { %v1128_v50 = vmul.f32 %v1127_v24, %v4302_v21  ;;  %v2369_v18 = vand.u32 3, %v1117_v7  ;;  %v986_v61 = vxor.u32 2147483648, %v969_v27  ;;  %vm2217_vm11 = vcmp.eq.s32.totalorder %v2215_v33, 0 }
 0x1a2   : > { %v977_v35 = vmul.f32 %v976_v5, %v5132_v60  ;;  %vm2220_vm13 = vcmp.eq.s32.totalorder %v2215_v33, 2  ;;  %v1123_v15 = vmul.f32 %v1122_v55, %v4302_v21  ;;  %v980_v20 = vand.u32 3, %v979_v0 }
 0x1a3   : > { %v1129_v41 = vadd.f32 -0.16666654, %v1128_v50  ;;  %v1134_v36 = vadd.s32 3, %v1117_v7  ;;  %v1269_v25 = vsub.s32 4, %v4546_v45  ;;  %v1274_v57 = vmul.f32 -0.001358992, %v4703_v62 }
 0x1a4   : > { %v983_v51 = vxor.u32 2147483648, %v977_v35  ;;  %v2222_v30 = vsel %vm2220_vm13, %v986_v61, %v977_v35  ;;  %v1124_v2 = vadd.f32 1.0, %v1123_v15  ;;  %vm981_vm3 = vcmp.lt.s32.totalorder %v980_v20, 2 }
 0x1a5   : > { %v1130_v58 = vmul.f32 %v1129_v41, %v4302_v21  ;;  %vm982_vm6 = vcmp.eq.s32.totalorder %v980_v20, 0  ;;  %vm1133_vm15 = vweird.f32 %v3835_v19  ;;  %vm985_vm1 = vcmp.eq.s32.totalorder %v980_v20, 2 }
 0x1a6   : > { %v2219_v37 = vsel %vm2217_vm11, %v969_v27, %v983_v51  ;;  %v984_v47 = vsel %vm982_vm6, %v969_v27, %v983_v51  ;;  %v1135_v12 = vand.u32 3, %v1134_v36  ;;  %v1141_v34 = vxor.u32 2147483648, %v1124_v2 }
 0x1a7   : > { %v1131_v26 = vadd.f32 1.0, %v1130_v58  ;;  %v2223_v52 = vsel %vm2216_vm2, %v2219_v37, %v2222_v30  ;;  %v987_v16 = vsel %vm985_vm1, %v986_v61, %v977_v35  ;;  %vm2370_vm14 = vcmp.lt.s32.totalorder %v2369_v18, 2 }
 0x1a8   : > { %vm2371_vm0 = vcmp.eq.s32.totalorder %v2369_v18, 0  ;;  %vm2374_vm7 = vcmp.eq.s32.totalorder %v2369_v18, 2  ;;  %v988_v56 = vsel %vm981_vm3, %v984_v47, %v987_v16  ;;  %v2224_v21 = vsel %vm978_vm10, nan, %v2223_v52 }
 0x1a9   : > { %v1132_v14 = vmul.f32 %v1131_v26, %v5133_v22  ;;  %vm1136_vm9 = vcmp.lt.s32.totalorder %v1135_v12, 2  ;;  %vm1137_vm5 = vcmp.eq.s32.totalorder %v1135_v12, 0  ;;  %v989_v13 = vsel %vm978_vm10, nan, %v988_v56 }
 0x1aa   : > { %vm1140_vm11 = vcmp.eq.s32.totalorder %v1135_v12, 2  ;;  %v1275_v49 = vadd.f32 0.041655596, %v1274_v57  ;;  %v1281_v8 = vmul.f32 -0.00019511016, %v4703_v62  ;;  %v1270_v42 = vsel %vm1147_vm4, %v1269_v25, %v4546_v45 }
 0x1ab   : > { %v1138_v31 = vxor.u32 2147483648, %v1132_v14  ;;  %v2376_v4 = vsel %vm2374_vm7, %v1141_v34, %v1132_v14  ;;  %v1424_v1 = vsub.s32 4, %v5134_v6  ;;  %v1142_v48 = vsel %vm1140_vm11, %v1141_v34, %v1132_v14 }
 0x1ac   : > { %v1276_v28 = vmul.f32 %v1275_v49, %v4703_v62  ;;  %v1282_v39 = vadd.f32 0.008332121, %v1281_v8  ;;  %v1429_v29 = vmul.f32 -0.001358992, %v4698_v38  ;;  %vm5135_vm10 = vcmp.lt.s32.totalorder %v4219_v54, 0 }
 0x1ad   : > { %v2373_v11 = vsel %vm2371_vm0, %v1124_v2, %v1138_v31  ;;  %v1139_v40 = vsel %vm1137_vm5, %v1124_v2, %v1138_v31  ;;  %v1425_v46 = vsel %vm5135_vm10, %v1424_v1, %v5134_v6  ;;  %v1436_v10 = vmul.f32 -0.00019511016, %v4698_v38 }
 0x1ae   : > { %v2377_v23 = vsel %vm2370_vm14, %v2373_v11, %v2376_v4  ;;  %v1143_v45 = vsel %vm1136_vm9, %v1139_v40, %v1142_v48  ;;  %v1277_v43 = vadd.f32 -0.4999988, %v1276_v28  ;;  %v1283_v44 = vmul.f32 %v1282_v39, %v4703_v62  ;;  %v4760_v28 = vld [vmem:[%s5073_s1 + $0x8] ss:$0 sm:$0xff]  ;;  %v163_v39 = vld [vmem:[%s5073_s1 + $0x58] sm:$0xff] }
 0x1af   : > { %v2378_v53 = vsel %vm1133_vm15, nan, %v2377_v23  ;;  %v1144_v7 = vsel %vm1133_vm15, nan, %v1143_v45  ;;  %v1272_v33 = vsel %vm4652_vm12, 0, %v1270_v42  ;;  %v1430_v63 = vadd.f32 0.041655596, %v1429_v29 }
 0x1b0   : > { %v2693_v24 = vpack.c.bf16 %v2378_v53, %v2224_v21  ;;  %v2689_v0 = vpack.c.bf16 %v1144_v7, %v989_v13  ;;  %v1278_v27 = vmul.f32 %v1277_v43, %v4703_v62  ;;  %v1284_v5 = vadd.f32 -0.16666654, %v1283_v44  ;;  %v160_v53 = vld [vmem:[%s5073_s1 + $0x40] sm:$0xff]  ;;  %v161_v7 = vld [vmem:[%s5073_s1 + $0x48] sm:$0xff] }
 0x1b1   : > { %v1427_v55 = vsel %vm4630_vm8, 0, %v1425_v46  ;;  %v1431_v50 = vmul.f32 %v1430_v63, %v4698_v38  ;;  %v1437_v18 = vadd.f32 0.008332121, %v1436_v10  ;;  %vm5136_vm4 = vcmask 130048  }
 0x1b2   : > { %3501 = vmatmul.msk.bf16.gmra.mxu0 %vm5136_vm4, %v2693_v24  ;;  %vm5137_vm2 = vmmov %vm5136_vm4  ;;  %v1279_v19 = vadd.f32 1.0, %v1278_v27  ;;  %v1285_v17 = vmul.f32 %v1284_v5, %v4703_v62  ;;  %v1289_v60 = vadd.s32 3, %v1272_v33  ;;  %v2523_v15 = vand.u32 3, %v1272_v33 }
 0x1b3   : > { %3505 = vmatmul.msk.bf16.gmra.mxu1 %vm5137_vm2, %v2689_v0  ;;  %v1432_v35 = vadd.f32 -0.4999988, %v1431_v50  ;;  %v1438_v61 = vmul.f32 %v1437_v18, %v4698_v38  ;;  %v1444_v20 = vadd.s32 3, %v1427_v55  ;;  %v2677_v58 = vand.u32 3, %v1427_v55  ;;  %vm5138_vm4 = vmmov %vm5137_vm2 }
 0x1b4   : > { %v1286_v41 = vadd.f32 1.0, %v1285_v17  ;;  %v1296_v36 = vxor.u32 2147483648, %v1279_v19  ;;  %v1290_v25 = vand.u32 3, %v1289_v60  ;;  %vm2524_vm8 = vcmp.lt.s32.totalorder %v2523_v15, 2 }
 0x1b5   : > { %v1433_v9 = vmul.f32 %v1432_v35, %v4698_v38  ;;  %v1439_v51 = vadd.f32 -0.16666654, %v1438_v61  ;;  %vm2525_vm12 = vcmp.eq.s32.totalorder %v2523_v15, 0  ;;  %vm2528_vm13 = vcmp.eq.s32.totalorder %v2523_v15, 2 }
 0x1b6   : > { %v1287_v30 = vmul.f32 %v1286_v41, %v4684_v59  ;;  %v1445_v37 = vand.u32 3, %v1444_v20  ;;  %vm1292_vm3 = vcmp.eq.s32.totalorder %v1290_v25, 0  ;;  %vm1295_vm6 = vcmp.eq.s32.totalorder %v1290_v25, 2 }
 0x1b7   : > { %v1434_v57 = vadd.f32 1.0, %v1433_v9  ;;  %v1440_v2 = vmul.f32 %v1439_v51, %v4698_v38  ;;  %vm1291_vm15 = vcmp.lt.s32.totalorder %v1290_v25, 2  ;;  %vm1288_vm1 = vweird.f32 %v4317_v3 }
 0x1b8   : > { %v1293_v62 = vxor.u32 2147483648, %v1287_v30  ;;  %v2530_v12 = vsel %vm2528_vm13, %v1296_v36, %v1287_v30  ;;  %v1297_v52 = vsel %vm1295_vm6, %v1296_v36, %v1287_v30  ;;  %vm2678_vm14 = vcmp.lt.s32.totalorder %v2677_v58, 2 }
 0x1b9   : > { %v1441_v47 = vadd.f32 1.0, %v1440_v2  ;;  %v1451_v16 = vxor.u32 2147483648, %v1434_v57  ;;  %vm2679_vm0 = vcmp.eq.s32.totalorder %v2677_v58, 0  ;;  %vm2682_vm7 = vcmp.eq.s32.totalorder %v2677_v58, 2 }
 0x1ba   : > { %v2527_v26 = vsel %vm2525_vm12, %v1279_v19, %v1293_v62  ;;  %v1294_v34 = vsel %vm1292_vm3, %v1279_v19, %v1293_v62  ;;  %vm1446_vm9 = vcmp.lt.s32.totalorder %v1445_v37, 2  ;;  %vm1447_vm5 = vcmp.eq.s32.totalorder %v1445_v37, 0 }
 0x1bb   : > { %v1442_v59 = vmul.f32 %v1441_v47, %v4643_v32  ;;  %v2531_v56 = vsel %vm2524_vm8, %v2527_v26, %v2530_v12  ;;  %v1298_v38 = vsel %vm1291_vm15, %v1294_v34, %v1297_v52  ;;  %vm1450_vm11 = vcmp.eq.s32.totalorder %v1445_v37, 2 }
 0x1bc   : > { %v2532_v14 = vsel %vm1288_vm1, nan, %v2531_v56  ;;  %v1299_v21 = vsel %vm1288_vm1, nan, %v1298_v38  ;;  %vm1443_vm10 = vweird.f32 %v4219_v54  ;;  %v162_v54 = vld [vmem:[%s5073_s1 + $0x50] sm:$0xff]  ;;  %v164_v63 = vpack.c.bf16 %v161_v7, %v160_v53 }
 0x1bd   : > { %v1448_v22 = vxor.u32 2147483648, %v1442_v59  ;;  %v2684_v49 = vsel %vm2682_vm7, %v1451_v16, %v1442_v59  ;;  %v1452_v31 = vsel %vm1450_vm11, %v1451_v16, %v1442_v59  ;;  %v165_v11 = vpack.c.bf16 %v163_v39, %v162_v54 }
 0x1be   : > { %vm2864_vm8 = vcmask 261120   ;;  %vm3332_vm6 = vcmask 523264   ;;  %vm3370_vm15 = vcmask 64512   ;;  %vm3373_vm1 = vcmask 195584  }
 0x1bf   : > { %v2681_v13 = vsel %vm2679_vm0, %v1434_v57, %v1448_v22  ;;  %v1449_v8 = vsel %vm1447_vm5, %v1434_v57, %v1448_v22  ;;  %2883 = vmatpush.bf16.msra.mxu2 %v165_v11  ;;  %3531 = vmatpush.bf16.msra.mxu3 %v165_v11  ;;  %vm5145_vm0 = vmmov %vm5137_vm2 }
 0x1c0   : > { %v2685_v32 = vsel %vm2678_vm14, %v2681_v13, %v2684_v49  ;;  %v1453_v4 = vsel %vm1446_vm9, %v1449_v8, %v1452_v31  ;;  %vm3375_vm14 = vcmask 253952  }
 0x1c1   : > { %v2686_v42 = vsel %vm1443_vm10, nan, %v2685_v32  ;;  %v1454_v6 = vsel %vm1443_vm10, nan, %v1453_v4 }
 0x1c2   : > { %v2694_v3 = vpack.c.bf16 %v2686_v42, %v2532_v14  ;;  %v2690_v1 = vpack.c.bf16 %v1454_v6, %v1299_v21 }
 0x1c3   : > { %2884 = vmatpush.bf16.msra.mxu2 %v164_v63  ;;  %3532 = vmatpush.bf16.msra.mxu3 %v164_v63 }
 0x1c4   : > { %3502 = vmatmul.msk.bf16.gmra.mxu0 %vm5138_vm4, %v2694_v3  ;;  %3506 = vmatmul.msk.bf16.gmra.mxu1 %vm5137_vm2, %v2690_v1 }
 0x206   : > { %v2717_v48 = vpop.f32.mrf.mxu0 }
 0x207   : > { %v2758_v29 = vpop.f32.mrf.mxu1 }
 0x208   : > { %v2759_v40 = vadd.f32 %v2758_v29, %v2717_v48 }
 0x20a   : > { %v2779_v46 = vadd.f32 %v4760_v28, %v2759_v40 }
 0x20c   : > { %v2795_v10 = vmul.f32 0.044715, %v2779_v46  ;;  %v2787_v2 = vmul.f32 0.5, %v2779_v46 }
 0x20e   : > { %v2719_v23 = vpop.f32.mrf.mxu0  ;;  %v2803_v33 = vmul.f32 %v2795_v10, %v2779_v46 }
 0x20f   : > { %v2760_v45 = vpop.f32.mrf.mxu1 }
 0x210   : > { %v2761_v43 = vadd.f32 %v2760_v45, %v2719_v23  ;;  %v2811_v0 = vmul.f32 %v2803_v33, %v2779_v46 }
 0x212   : > { %v2780_v44 = vadd.f32 %v4760_v28, %v2761_v43  ;;  %v2819_v5 = vadd.f32 %v2811_v0, %v2779_v46 }
 0x214   : > { %v2796_v24 = vmul.f32 0.044715, %v2780_v44  ;;  %v2827_v50 = vmul.f32 0.7978846, %v2819_v5  ;;  %v2788_v58 = vmul.f32 0.5, %v2780_v44 }
 0x216   : > { %v2804_v27 = vmul.f32 %v2796_v24, %v2780_v44  ;;  %3621 = vtanh.f32 %v2827_v50  ;;  %v3654_v50 = vld [vmem:[%s3812_s25 + $0x30] sm:$0xff] }
 0x218   : > { %v2812_v55 = vmul.f32 %v2804_v27, %v2780_v44 }
 0x21a   : > { %v2820_v60 = vadd.f32 %v2812_v55, %v2780_v44  ;;  %v3733_v55 = vmov 1  }
 0x21b   : > { %v2722_v18 = vpop.f32.mrf.mxu0  ;;  %3591 = vset.pattern.permute.xlu1 %v3733_v55  ;;  %3590 = vset.pattern.permute.xlu2 %v3733_v55 }
 0x21c   : > { %v2763_v19 = vpop.f32.mrf.mxu1  ;;  %v2828_v61 = vmul.f32 0.7978846, %v2820_v60  ;;  %v3622_v15 = vpop.eup %3621  ;;  %3055 = vperm.xlu1 %3591, %v3654_v50   ;;  %3596 = vset.pattern.permute.xlu0 %v3733_v55 }
 0x21d   : > { %v2764_v17 = vadd.f32 %v2763_v19, %v2722_v18  ;;  %v2843_v51 = vadd.f32 1.0, %v3622_v15  ;;  %v3655_v18 = vld [vmem:[%s3812_s25 + $0x38] sm:$0xff] }
 0x21e   : > { %3623 = vtanh.f32 %v2828_v61  ;;  %3059 = vperm.xlu2 %3590, %v3655_v18   ;;  %v4789_v61 = vld [vmem:[%s3812_s25 + $0x20] sm:$0xff] }
 0x21f   : > { %v2781_v35 = vadd.f32 %v4760_v28, %v2764_v17  ;;  %v2851_v12 = vmul.f32 %v2843_v51, %v2787_v2  ;;  %3047 = vperm.xlu0 %3596, %v4789_v61  }
 0x221   : > { %v2797_v41 = vmul.f32 0.044715, %v2781_v35  ;;  %v2789_v54 = vmul.f32 0.5, %v2781_v35 }
 0x223   : > { %v2724_v20 = vpop.f32.mrf.mxu0  ;;  %v2805_v57 = vmul.f32 %v2797_v41, %v2781_v35 }
 0x224   : > { %v2765_v36 = vpop.f32.mrf.mxu1  ;;  %v3624_v30 = vpop.eup %3623 }
 0x225   : > { %v2766_v9 = vadd.f32 %v2765_v36, %v2724_v20  ;;  %v2844_v62 = vadd.f32 1.0, %v3624_v30  ;;  %v2813_v47 = vmul.f32 %v2805_v57, %v2781_v35 }
 0x227   : > { %v2782_v25 = vadd.f32 %v4760_v28, %v2766_v9  ;;  %v2852_v26 = vmul.f32 %v2844_v62, %v2788_v58  ;;  %v2821_v52 = vadd.f32 %v2813_v47, %v2781_v35  ;;  %v3735_v47 = vmov 2  }
 0x228   : > { %3592 = vset.pattern.permute.xlu2 %v3735_v47  ;;  %3597 = vset.pattern.permute.xlu0 %v3735_v47 }
 0x229   : > { %v2798_v37 = vmul.f32 0.044715, %v2782_v25  ;;  %v2859_v59 = vpack.c.bf16 %v2852_v26, %v2851_v12  ;;  %v2829_v56 = vmul.f32 0.7978846, %v2821_v52  ;;  %v2790_v39 = vmul.f32 0.5, %v2782_v25  ;;  %3131 = vperm.xlu2 %3592, %v3654_v50   ;;  %3135 = vperm.xlu0 %3597, %v3655_v18  }
 0x22b   : > { %v2806_v34 = vmul.f32 %v2798_v37, %v2782_v25  ;;  %3507 = vmatmul.msk.bf16.vlgmr.msra.gmra.mxu2 %vm2864_vm8, %v2859_v59  ;;  %3625 = vtanh.f32 %v2829_v56  ;;  %v3734_v37 = vmov 3  }
 0x22c   : > { %3593 = vset.pattern.permute.xlu1 %v3734_v37 }
 0x22d   : > { %v2814_v16 = vmul.f32 %v2806_v34, %v2782_v25  ;;  %3219 = vperm.xlu1 %3593, %v3655_v18  }
 0x22f   : > { %v2822_v38 = vadd.f32 %v2814_v16, %v2782_v25  ;;  %v2727_v22 = vpop.f32.mrf.mxu0  ;;  %v3657_v16 = vld [vmem:[%s3812_s25 + $0x28] sm:$0xff] }
 0x230   : > { %v2768_v14 = vpop.f32.mrf.mxu1 }
 0x231   : > { %v2769_v21 = vadd.f32 %v2768_v14, %v2727_v22  ;;  %v2830_v13 = vmul.f32 0.7978846, %v2822_v38  ;;  %v3626_v8 = vpop.eup %3625  ;;  %3594 = vset.pattern.permute.xlu2 %v3733_v55  ;;  %3127 = vperm.xlu0 %3597, %v3657_v16  }
 0x232   : > { %v2845_v6 = vadd.f32 1.0, %v3626_v8  ;;  %3051 = vperm.xlu2 %3594, %v3657_v16  }
 0x233   : > { %v2783_v49 = vadd.f32 %v4760_v28, %v2769_v21  ;;  %3627 = vtanh.f32 %v2830_v13 }
 0x234   : > { %v2853_v46 = vmul.f32 %v2845_v6, %v2789_v54  ;;  %v3660_v6 = vld [vmem:[%s3812_s25] sm:$0xff] }
 0x235   : > { %v2799_v31 = vmul.f32 0.044715, %v2783_v49  ;;  %v2791_v30 = vmul.f32 0.5, %v2783_v49  ;;  %3215 = vperm.xlu1 %3593, %v3654_v50  }
 0x237   : > { %v2807_v32 = vmul.f32 %v2799_v31, %v2783_v49  ;;  %v2729_v4 = vpop.f32.mrf.mxu0  ;;  %v3736_v31 = vmov 4  }
 0x238   : > { %v2770_v42 = vpop.f32.mrf.mxu1 }
 0x239   : > { %v3628_v3 = vpop.eup %3627  ;;  %v2771_v1 = vadd.f32 %v2770_v42, %v2729_v4  ;;  %v2815_v48 = vmul.f32 %v2807_v32, %v2783_v49  ;;  %v3658_v32 = vld [vmem:[%s3812_s25 + $0x18] sm:$0xff]  ;;  %v3659_v42 = vld [vmem:[%s3812_s25 + $0x10] sm:$0xff] }
 0x23a   : > { %v2846_v29 = vadd.f32 1.0, %v3628_v3  ;;  %3595 = vset.pattern.permute.xlu2 %v3736_v31  ;;  %3119 = vperm.xlu0 %3597, %v3658_v32   ;;  %v3661_v3 = vld [vmem:[%s3812_s25 + $0x8] sm:$0xff]  ;;  %s3740_s25 = smov 16  }
 0x23b   : > { %v2784_v11 = vadd.f32 %v4760_v28, %v2771_v1  ;;  %v2823_v40 = vadd.f32 %v2815_v48, %v2783_v49  ;;  %3303 = vperm.xlu2 %3595, %v3655_v18   ;;  %v4823_v1 = vld [vmem:[%s5073_s1 + $0x10] ss:$0 sm:$0xff] }
 0x23c   : > { %v2854_v10 = vmul.f32 %v2846_v29, %v2790_v39 }
 0x23d   : > { %v2800_v23 = vmul.f32 0.044715, %v2784_v11  ;;  %v2831_v44 = vmul.f32 0.7978846, %v2823_v40  ;;  %v2792_v25 = vmul.f32 0.5, %v2784_v11  ;;  %3598 = vset.pattern.permute.xlu1 %v3735_v47  ;;  %v3073_v40 = vld [vmem:[%s5073_s1 + $0x98] sm:$0xff] }
 0x23e   : > { %v2860_v45 = vpack.c.bf16 %v2854_v10, %v2853_v46  ;;  %3123 = vperm.xlu1 %3598, %v4789_v61   ;;  %v2984_v46 = vld [vmem:[%s5073_s1 + $0x70] sm:$0xff] }
 0x23f   : > { %v2808_v43 = vmul.f32 %v2800_v23, %v2784_v11  ;;  %3629 = vtanh.f32 %v2831_v44  ;;  %v2985_v23 = vld [vmem:[%s5073_s1 + $0x78] sm:$0xff] }
 0x240   : > { %3508 = vmatmul.msk.bf16.gmra.mxu2 %vm2864_vm8, %v2860_v45  ;;  %v3156_v45 = vld [vmem:[%s5073_s1 + $0xb0] sm:$0xff] }
 0x241   : > { %v2816_v53 = vmul.f32 %v2808_v43, %v2784_v11  ;;  %v2732_v7 = vpop.f32.mrf.mxu0  ;;  %v2773_v33 = vpop.f32.mrf.mxu1  ;;  %v3157_v43 = vld [vmem:[%s5073_s1 + $0xb8] sm:$0xff] }
 0x242   : > { %v2774_v63 = vadd.f32 %v2773_v33, %v2732_v7  ;;  %3610 = vset.pattern.permute.xlu0 %v3736_v31  ;;  %v3159_v7 = vpack.c.bf16 %v3157_v43, %v3156_v45  ;;  %v3240_v33 = vld [vmem:[%s5073_s1 + $0xd0] sm:$0xff] }
 0x243   : > { %v2824_v24 = vadd.f32 %v2816_v53, %v2784_v11  ;;  %3599 = vset.pattern.permute.xlu2 %v3734_v37  ;;  %3287 = vperm.xlu0 %3610, %v3658_v32   ;;  %v3072_v11 = vld [vmem:[%s5073_s1 + $0x90] sm:$0xff]  ;;  %v2987_v53 = vpack.c.bf16 %v2985_v23, %v2984_v46 }
 0x244   : > { %v2785_v0 = vadd.f32 %v4760_v28, %v2774_v63  ;;  %3211 = vperm.xlu2 %3599, %v3657_v16   ;;  %v3075_v10 = vpack.c.bf16 %v3073_v40, %v3072_v11  ;;  %v3241_v63 = vld [vmem:[%s5073_s1 + $0xd8] sm:$0xff]  ;;  %3167 = vmatpush.bf16.msrb.mxu1 %v3159_v7 }
 0x245   : > { %v2832_v27 = vmul.f32 0.7978846, %v2824_v24  ;;  %v3630_v19 = vpop.eup %3629  ;;  %v2982_v24 = vld [vmem:[%s5073_s1 + $0x60] sm:$0xff]  ;;  %3007 = vmatpush.bf16.msrb.mxu3 %v2987_v53 }
 0x246   : > { %v2801_v5 = vmul.f32 0.044715, %v2785_v0  ;;  %v2847_v20 = vadd.f32 1.0, %v3630_v19  ;;  %v2793_v14 = vmul.f32 0.5, %v2785_v0  ;;  %3600 = vset.pattern.permute.xlu1 %v3736_v31  ;;  %3083 = vmatpush.bf16.msrb.mxu0 %v3075_v10 }
 0x247   : > { %3631 = vtanh.f32 %v2832_v27  ;;  %3299 = vperm.xlu1 %3600, %v3654_v50   ;;  %v3243_v27 = vpack.c.bf16 %v3241_v63, %v3240_v33  ;;  %v3071_v50 = vld [vmem:[%s5073_s1 + $0x88] sm:$0xff] }
 0x248   : > { %v2809_v17 = vmul.f32 %v2801_v5, %v2785_v0  ;;  %v2855_v58 = vmul.f32 %v2847_v20, %v2791_v30  ;;  %v2983_v5 = vld [vmem:[%s5073_s1 + $0x68] sm:$0xff] }
 0x249   : > { %v2734_v60 = vpop.f32.mrf.mxu0  ;;  %v2775_v35 = vpop.f32.mrf.mxu1  ;;  %3251 = vmatpush.bf16.msrb.mxu2 %v3243_v27  ;;  %v3239_v20 = vld [vmem:[%s5073_s1 + $0xc8] sm:$0xff] }
 0x24a   : > { %v2776_v15 = vadd.f32 %v2775_v35, %v2734_v60  ;;  %v2817_v41 = vmul.f32 %v2809_v17, %v2785_v0  ;;  %v2986_v17 = vpack.c.bf16 %v2983_v5, %v2982_v24  ;;  %v3154_v60 = vld [vmem:[%s5073_s1 + $0xa0] sm:$0xff]  ;;  %v3155_v35 = vld [vmem:[%s5073_s1 + $0xa8] sm:$0xff] }
 0x24b   : > { %3611 = vset.pattern.permute.xlu0 %v3734_v37 }
 0x24c   : > { %v2786_v9 = vadd.f32 %v4760_v28, %v2776_v15  ;;  %v2825_v51 = vadd.f32 %v2817_v41, %v2785_v0  ;;  %3601 = vset.pattern.permute.xlu2 %v3733_v55  ;;  %3203 = vperm.xlu0 %3611, %v3658_v32   ;;  %v3158_v41 = vpack.c.bf16 %v3155_v35, %v3154_v60 }
 0x24d   : > { %v3632_v36 = vpop.eup %3631  ;;  %3043 = vperm.xlu2 %3601, %v3658_v32   ;;  %3008 = vmatpush.bf16.msrb.mxu3 %v2986_v17 }
 0x24e   : > { %v2848_v57 = vadd.f32 1.0, %v3632_v36  ;;  %v2802_v2 = vmul.f32 0.044715, %v2786_v9  ;;  %v2833_v26 = vmul.f32 0.7978846, %v2825_v51  ;;  %v2794_v21 = vmul.f32 0.5, %v2786_v9  ;;  %3168 = vmatpush.bf16.msrb.mxu1 %v3158_v41 }
 0x24f   : > { %3602 = vset.pattern.permute.xlu1 %v3734_v37 }
 0x250   : > { %v2856_v62 = vmul.f32 %v2848_v57, %v2792_v25  ;;  %v2810_v12 = vmul.f32 %v2802_v2, %v2786_v9  ;;  %3633 = vtanh.f32 %v2833_v26  ;;  %3207 = vperm.xlu1 %3602, %v4789_v61  }
 0x252   : > { %v2861_v34 = vpack.c.bf16 %v2856_v62, %v2855_v58  ;;  %v2818_v28 = vmul.f32 %v2810_v12, %v2786_v9 }
 0x254   : > { %3509 = vmatmul.msk.bf16.gmra.mxu2 %vm2864_vm8, %v2861_v34  ;;  %v2826_v52 = vadd.f32 %v2818_v28, %v2786_v9  ;;  %3191 = vperm.xlu0 %3611, %v3660_v6  }
 0x255   : > { %3603 = vset.pattern.permute.xlu2 %v3736_v31 }
 0x256   : > { %v2834_v59 = vmul.f32 0.7978846, %v2826_v52  ;;  %v3634_v56 = vpop.eup %3633  ;;  %3295 = vperm.xlu2 %3603, %v3657_v16  }
 0x257   : > { %v2849_v38 = vadd.f32 1.0, %v3634_v56 }
 0x258   : > { %3635 = vtanh.f32 %v2834_v59  ;;  %3604 = vset.pattern.permute.xlu1 %v3733_v55 }
 0x259   : > { %v2857_v49 = vmul.f32 %v2849_v38, %v2793_v14  ;;  %3039 = vperm.xlu1 %3604, %v3659_v42  }
 0x25c   : > { %3617 = vset.pattern.permute.xlu0 %v3736_v31 }
 0x25e   : > { %v3636_v22 = vpop.eup %3635  ;;  %3605 = vset.pattern.permute.xlu2 %v3735_v47 }
 0x25f   : > { %v2850_v13 = vadd.f32 1.0, %v3636_v22  ;;  %3115 = vperm.xlu2 %3605, %v3659_v42  }
 0x261   : > { %v2858_v8 = vmul.f32 %v2850_v13, %v2794_v21  ;;  %3606 = vset.pattern.permute.xlu1 %v3736_v31 }
 0x262   : > { %3291 = vperm.xlu1 %3606, %v4789_v61   ;;  %v3238_v61 = vld [vmem:[%s5073_s1 + $0xc0] sm:$0xff] }
 0x263   : > { %v2862_v4 = vpack.c.bf16 %v2858_v8, %v2857_v49  ;;  %v3242_v9 = vpack.c.bf16 %v3239_v20, %v3238_v61 }
 0x265   : > { %3510 = vmatmul.msk.bf16.vlgmr.msra.gmra.mxu3 %vm2864_vm8, %v2862_v4  ;;  %3252 = vmatpush.bf16.msrb.mxu2 %v3242_v9 }
 0x267   : > { %3607 = vset.pattern.permute.xlu2 %v3733_v55 }
 0x268   : > { %3035 = vperm.xlu2 %3607, %v3661_v3  }
 0x26a   : > { %3608 = vset.pattern.permute.xlu1 %v3735_v47 }
 0x26b   : > { %3111 = vperm.xlu1 %3608, %v3661_v3  }
 0x270   : > { %3609 = vset.pattern.permute.xlu2 %v3734_v37 }
 0x271   : > { %3199 = vperm.xlu2 %3609, %v3659_v42  }
 0x273   : > { %3612 = vset.pattern.permute.xlu1 %v3733_v55  ;;  %v3070_v55 = vld [vmem:[%s5073_s1 + $0x80] sm:$0xff] }
 0x274   : > { %3031 = vperm.xlu1 %3612, %v3660_v6   ;;  %v3074_v15 = vpack.c.bf16 %v3071_v50, %v3070_v55 }
 0x276   : > { %3084 = vmatpush.bf16.msrb.mxu0 %v3074_v15 }
 0x278   : > { %v4883_v63 = vpop.permute.xlu2 %3059 }
 0x279   : > { %3613 = vset.pattern.permute.xlu2 %v3735_v47 }
 0x27a   : > { %3107 = vperm.xlu2 %3613, %v3660_v6  }
 0x27c   : > { %3614 = vset.pattern.permute.xlu1 %v3734_v37 }
 0x27d   : > { %3195 = vperm.xlu1 %3614, %v3661_v3  }
 0x282   : > { %3615 = vset.pattern.permute.xlu2 %v3736_v31 }
 0x283   : > { %3283 = vperm.xlu2 %3615, %v3659_v42   ;;  %v4890_v60 = vpop.permute.xlu2 %3131 }
 0x285   : > { %3616 = vset.pattern.permute.xlu1 %v3736_v31 }
 0x286   : > { %3279 = vperm.xlu1 %3616, %v3661_v3  }
 0x28b   : > { %3275 = vperm.xlu2 %3615, %v3660_v6  }
 0x2ae   : > { %v2886_v48 = vpop.f32.mrf.mxu2 }
 0x2af   : > { %v2887_v54 = vadd.f32 %v4823_v1, %v2886_v48 }
 0x2b1   : > { %v2914_v39 = vmul.f32 0.044715, %v2887_v54  ;;  %v2906_v56 = vmul.f32 0.5, %v2887_v54 }
 0x2b3   : > { %v2922_v29 = vmul.f32 %v2914_v39, %v2887_v54 }
 0x2b5   : > { %v2930_v44 = vmul.f32 %v2922_v29, %v2887_v54 }
 0x2b6   : > { %v2888_v0 = vpop.f32.mrf.mxu2 }
 0x2b7   : > { %v2938_v18 = vadd.f32 %v2930_v44, %v2887_v54  ;;  %v2889_v19 = vadd.f32 %v4823_v1, %v2888_v0 }
 0x2b9   : > { %v2915_v36 = vmul.f32 0.044715, %v2889_v19  ;;  %v2946_v51 = vmul.f32 0.7978846, %v2938_v18  ;;  %v2907_v38 = vmul.f32 0.5, %v2889_v19 }
 0x2bb   : > { %v2923_v30 = vmul.f32 %v2915_v36, %v2889_v19  ;;  %3637 = vtanh.f32 %v2946_v51 }
 0x2bd   : > { %v2931_v25 = vmul.f32 %v2923_v30, %v2889_v19 }
 0x2bf   : > { %v2939_v57 = vadd.f32 %v2931_v25, %v2889_v19 }
 0x2c1   : > { %v2947_v58 = vmul.f32 0.7978846, %v2939_v57  ;;  %v3638_v47 = vpop.eup %3637 }
 0x2c2   : > { %v2962_v28 = vadd.f32 1.0, %v3638_v47 }
 0x2c3   : > { %v2891_v2 = vpop.f32.mrf.mxu2  ;;  %3639 = vtanh.f32 %v2947_v58 }
 0x2c4   : > { %v2892_v62 = vadd.f32 %v4823_v1, %v2891_v2  ;;  %v2970_v21 = vmul.f32 %v2962_v28, %v2906_v56 }
 0x2c6   : > { %v2916_v37 = vmul.f32 0.044715, %v2892_v62  ;;  %v2908_v10 = vmul.f32 0.5, %v2892_v62 }
 0x2c8   : > { %v2924_v12 = vmul.f32 %v2916_v37, %v2892_v62 }
 0x2c9   : > { %v3640_v52 = vpop.eup %3639 }
 0x2ca   : > { %v2932_v26 = vmul.f32 %v2924_v12, %v2892_v62  ;;  %v2963_v22 = vadd.f32 1.0, %v3640_v52  ;;  %v4893_v12 = vpop.permute.xlu2 %3051  ;;  %v4899_v52 = vpop.permute.xlu1 %3055 }
 0x2cb   : > { %v2893_v34 = vpop.f32.mrf.mxu2 }
 0x2cc   : > { %v2940_v59 = vadd.f32 %v2932_v26, %v2892_v62  ;;  %v2894_v16 = vadd.f32 %v4823_v1, %v2893_v34  ;;  %v2971_v13 = vmul.f32 %v2963_v22, %v2907_v38 }
 0x2ce   : > { %v2917_v14 = vmul.f32 0.044715, %v2894_v16  ;;  %v2948_v49 = vmul.f32 0.7978846, %v2940_v59  ;;  %v2978_v31 = vpack.c.bf16 %v2971_v13, %v2970_v21  ;;  %v2909_v23 = vmul.f32 0.5, %v2894_v16 }
 0x2d0   : > { %v2925_v8 = vmul.f32 %v2917_v14, %v2894_v16  ;;  %3511 = vmatmul.msk.bf16.vlgmr.msrb.gmra.mxu3 %vm2864_vm8, %v2978_v31  ;;  %3515 = vmatmul.msk.bf16.vlgmr.msrb.gmra.mxu0 %vm2864_vm8, %v2978_v31  ;;  %3641 = vtanh.f32 %v2948_v49 }
 0x2d1   : > { %3519 = vmatmul.msk.bf16.vlgmr.msrb.gmra.mxu1 %vm2864_vm8, %v2978_v31  ;;  %3523 = vmatmul.msk.bf16.vlgmr.msrb.gmra.mxu2 %vm2864_vm8, %v2978_v31 }
 0x2d2   : > { %v2933_v32 = vmul.f32 %v2925_v8, %v2894_v16  ;;  %v4903_v8 = vpop.permute.xlu1 %3219 }
 0x2d4   : > { %v2941_v4 = vadd.f32 %v2933_v32, %v2894_v16  ;;  %v4901_v16 = vpop.permute.xlu2 %3303 }
 0x2d6   : > { %v2949_v42 = vmul.f32 0.7978846, %v2941_v4  ;;  %v3642_v48 = vpop.eup %3641 }
 0x2d7   : > { %v2896_v6 = vpop.f32.mrf.mxu2  ;;  %v2964_v29 = vadd.f32 1.0, %v3642_v48 }
 0x2d8   : > { %v2897_v3 = vadd.f32 %v4823_v1, %v2896_v6  ;;  %3643 = vtanh.f32 %v2949_v42  ;;  %v4915_v6 = vpop.permute.xlu0 %3047 }
 0x2d9   : > { %v2972_v53 = vmul.f32 %v2964_v29, %v2908_v10 }
 0x2da   : > { %v2918_v54 = vmul.f32 0.044715, %v2897_v3  ;;  %v2910_v30 = vmul.f32 0.5, %v2897_v3  ;;  %v4911_v4 = vpop.permute.xlu1 %3215 }
 0x2dc   : > { %v2926_v39 = vmul.f32 %v2918_v54, %v2897_v3  ;;  %v4905_v32 = vpop.permute.xlu2 %3211 }
 0x2de   : > { %v3644_v11 = vpop.eup %3643  ;;  %v2934_v40 = vmul.f32 %v2926_v39, %v2897_v3 }
 0x2df   : > { %v2898_v46 = vpop.f32.mrf.mxu2  ;;  %v2965_v45 = vadd.f32 1.0, %v3644_v11 }
 0x2e0   : > { %v2942_v43 = vadd.f32 %v2934_v40, %v2897_v3  ;;  %v2899_v44 = vadd.f32 %v4823_v1, %v2898_v46  ;;  %v4921_v54 = vpop.permute.xlu0 %3135 }
 0x2e1   : > { %v2973_v7 = vmul.f32 %v2965_v45, %v2909_v23 }
 0x2e2   : > { %v2919_v33 = vmul.f32 0.044715, %v2899_v44  ;;  %v2950_v0 = vmul.f32 0.7978846, %v2942_v43  ;;  %v2911_v25 = vmul.f32 0.5, %v2899_v44  ;;  %v4917_v3 = vpop.permute.xlu1 %3123 }
 0x2e3   : > { %v2979_v24 = vpack.c.bf16 %v2973_v7, %v2972_v53 }
 0x2e4   : > { %v2927_v27 = vmul.f32 %v2919_v33, %v2899_v44  ;;  %3645 = vtanh.f32 %v2950_v0  ;;  %v4913_v42 = vpop.permute.xlu2 %3043 }
 0x2e5   : > { %3512 = vmatmul.msk.bf16.gmra.mxu3 %vm2864_vm8, %v2979_v24  ;;  %3516 = vmatmul.msk.bf16.gmra.mxu0 %vm2864_vm8, %v2979_v24 }
 0x2e6   : > { %v2935_v5 = vmul.f32 %v2927_v27, %v2899_v44  ;;  %3520 = vmatmul.msk.bf16.gmra.mxu1 %vm2864_vm8, %v2979_v24  ;;  %3524 = vmatmul.msk.bf16.gmra.mxu2 %vm2864_vm8, %v2979_v24  ;;  %v153_v24 = vld [vmem:[%s5073_s1 + $0x18] sm:$0xf] }
 0x2e8   : > { %v2943_v55 = vadd.f32 %v2935_v5, %v2899_v44  ;;  %v2901_v50 = vpop.f32.mrf.mxu3  ;;  %v4927_v11 = vpop.permute.xlu0 %3127  ;;  %v4952_v5 = vperm.slane %v153_v24, 1 }
 0x2e9   : > { %v2902_v19 = vadd.f32 %v4823_v1, %v2901_v50  ;;  %v4954_v50 = vperm.slane %v153_v24, 2 }
 0x2ea   : > { %v2951_v18 = vmul.f32 0.7978846, %v2943_v55  ;;  %v3646_v35 = vpop.eup %3645  ;;  %v4923_v39 = vpop.permute.xlu1 %3299 }
 0x2eb   : > { %v2920_v17 = vmul.f32 0.044715, %v2902_v19  ;;  %v2966_v20 = vadd.f32 1.0, %v3646_v35  ;;  %v2912_v22 = vmul.f32 0.5, %v2902_v19 }
 0x2ec   : > { %3647 = vtanh.f32 %v2951_v18  ;;  %v4919_v48 = vpop.permute.xlu2 %3295  ;;  %v4956_v18 = vperm.slane %v153_v24, 0 }
 0x2ed   : > { %v2928_v61 = vmul.f32 %v2920_v17, %v2902_v19  ;;  %v2974_v58 = vmul.f32 %v2966_v20, %v2910_v30  ;;  %v4959_v17 = vperm.slane %v153_v24, 3 }
 0x2ef   : > { %v2936_v15 = vmul.f32 %v2928_v61, %v2902_v19 }
 0x2f0   : > { %v2903_v41 = vpop.f32.mrf.mxu3  ;;  %v4933_v10 = vpop.permute.xlu0 %3119 }
 0x2f1   : > { %v2944_v9 = vadd.f32 %v2936_v15, %v2902_v19  ;;  %v2904_v51 = vadd.f32 %v4823_v1, %v2903_v41 }
 0x2f2   : > { %v3648_v36 = vpop.eup %3647  ;;  %v4929_v40 = vpop.permute.xlu1 %3207 }
 0x2f3   : > { %v2967_v57 = vadd.f32 1.0, %v3648_v36  ;;  %v2921_v2 = vmul.f32 0.044715, %v2904_v51  ;;  %v2952_v37 = vmul.f32 0.7978846, %v2944_v9  ;;  %v2913_v14 = vmul.f32 0.5, %v2904_v51 }
 0x2f4   : > { %v4925_v29 = vpop.permute.xlu2 %3115 }
 0x2f5   : > { %v2975_v62 = vmul.f32 %v2967_v57, %v2911_v25  ;;  %v2929_v47 = vmul.f32 %v2921_v2, %v2904_v51  ;;  %3649 = vtanh.f32 %v2952_v37 }
 0x2f7   : > { %v2980_v26 = vpack.c.bf16 %v2975_v62, %v2974_v58  ;;  %v2937_v34 = vmul.f32 %v2929_v47, %v2904_v51 }
 0x2f8   : > { %v4939_v43 = vpop.permute.xlu0 %3287 }
 0x2f9   : > { %3513 = vmatmul.msk.bf16.gmra.mxu3 %vm2864_vm8, %v2980_v26  ;;  %3517 = vmatmul.msk.bf16.gmra.mxu0 %vm2864_vm8, %v2980_v26  ;;  %v2945_v28 = vadd.f32 %v2937_v34, %v2904_v51  ;;  %5139 = vst [vmem:[#allocation6_spill] sm:$0xff] %v4939_v43 }
 0x2fa   : > { %3521 = vmatmul.msk.bf16.gmra.mxu1 %vm2864_vm8, %v2980_v26  ;;  %3525 = vmatmul.msk.bf16.gmra.mxu2 %vm2864_vm8, %v2980_v26  ;;  %v4935_v23 = vpop.permute.xlu1 %3039 }
 0x2fb   : > { %v2953_v1 = vmul.f32 0.7978846, %v2945_v28  ;;  %v3650_v59 = vpop.eup %3649 }
 0x2fc   : > { %v2968_v56 = vadd.f32 1.0, %v3650_v59  ;;  %v4931_v46 = vpop.permute.xlu2 %3035 }
 0x2fd   : > { %3651 = vtanh.f32 %v2953_v1 }
 0x2fe   : > { %v2976_v13 = vmul.f32 %v2968_v56, %v2912_v22 }
 0x300   : > { %v4943_v7 = vpop.permute.xlu0 %3203 }
 0x302   : > { %v4941_v44 = vpop.permute.xlu1 %3291 }
 0x303   : > { %v3652_v38 = vpop.eup %3651 }
 0x304   : > { %v2969_v21 = vadd.f32 1.0, %v3652_v38  ;;  %v4937_v45 = vpop.permute.xlu2 %3199 }
 0x306   : > { %v2977_v49 = vmul.f32 %v2969_v21, %v2913_v14 }
 0x308   : > { %v2981_v31 = vpack.c.bf16 %v2977_v49, %v2976_v13  ;;  %v3192_v15 = vpop.permute.xlu0 %3191 }
 0x30a   : > { %3514 = vmatmul.msk.bf16.gmra.mxu3 %vm2864_vm8, %v2981_v31  ;;  %3518 = vmatmul.msk.bf16.gmra.mxu0 %vm2864_vm8, %v2981_v31  ;;  %v4945_v33 = vpop.permute.xlu1 %3111 }
 0x30b   : > { %3522 = vmatmul.msk.bf16.gmra.mxu1 %vm2864_vm8, %v2981_v31  ;;  %3526 = vmatmul.msk.bf16.gmra.mxu2 %vm2864_vm8, %v2981_v31 }
 0x30c   : > { %v3108_v53 = vpop.permute.xlu2 %3107 }
 0x312   : > { %v3032_v36 = vpop.permute.xlu1 %3031 }
 0x314   : > { %v4950_v0 = vpop.permute.xlu2 %3283 }
 0x315   : > { %5140 = vst [vmem:[#allocation5_spill] sm:$0xff] %v4950_v0 }
 0x31c   : > { %v3276_v2 = vpop.permute.xlu2 %3275 }
 0x34d   : > { %v3086_v27 = vpop.f32.mrf.mxu0 }
 0x34e   : > { %v3170_v55 = vpop.f32.mrf.mxu1  ;;  %v3087_v19 = vadd.f32 %v3086_v27, %v4952_v5 }
 0x34f   : > { %v3171_v61 = vadd.f32 %v3170_v55, %v4954_v50 }
 0x350   : > { %v3138_v51 = vmul.f32 %v3108_v53, %v3087_v19 }
 0x351   : > { %v3222_v58 = vmul.f32 %v3192_v15, %v3171_v61 }
 0x353   : > { %v3010_v35 = vpop.f32.mrf.mxu3 }
 0x354   : > { %v3011_v41 = vadd.f32 %v3010_v35, %v4956_v18  ;;  %v3254_v20 = vpop.f32.mrf.mxu2 }
 0x355   : > { %v3088_v9 = vpop.f32.mrf.mxu0  ;;  %v3255_v25 = vadd.f32 %v3254_v20, %v4959_v17 }
 0x356   : > { %v3062_v30 = vmul.f32 %v3032_v36, %v3011_v41  ;;  %v4964_v57 = vpop.f32.mrf.mxu1 }
 0x357   : > { %v3306_v47 = vmul.f32 %v3276_v2, %v3255_v25 }
 0x358   : > { %v3146_v62 = vadd.f32 %v3138_v51, %v3062_v30 }
 0x35a   : > { %v3230_v37 = vadd.f32 %v3222_v58, %v3146_v62  ;;  %v3089_v58 = vadd.f32 %v3088_v9, %v4952_v5 }
 0x35b   : > { %v3012_v26 = vpop.f32.mrf.mxu3 }
 0x35c   : > { %v4966_v34 = vadd.f32 %v3306_v47, %v3230_v37  ;;  %v4968_v28 = vpop.f32.mrf.mxu2  ;;  %v3013_v20 = vadd.f32 %v3012_v26, %v4956_v18 }
 0x35e   : > { %5141 = vst [vmem:[#allocation7_spill] sm:$0xff] %v4966_v34  ;;  %v4982_v62 = vmul.f32 %v4931_v46, %v3013_v20 }
 0x362   : > { %v3091_v1 = vpop.f32.mrf.mxu0 }
 0x363   : > { %v3175_v59 = vpop.f32.mrf.mxu1  ;;  %v3092_v47 = vadd.f32 %v3091_v1, %v4952_v5 }
 0x368   : > { %v3015_v56 = vpop.f32.mrf.mxu3 }
 0x369   : > { %v4970_v38 = vpop.f32.mrf.mxu2  ;;  %v3016_v51 = vadd.f32 %v3015_v56, %v4956_v18 }
 0x36a   : > { %v3093_v22 = vpop.f32.mrf.mxu0 }
 0x36b   : > { %v3177_v14 = vpop.f32.mrf.mxu1  ;;  %v3094_v20 = vadd.f32 %v3093_v22, %v4952_v5 }
 0x370   : > { %v3017_v21 = vpop.f32.mrf.mxu3 }
 0x371   : > { %v4972_v13 = vpop.f32.mrf.mxu2  ;;  %v3018_v34 = vadd.f32 %v3017_v21, %v4956_v18 }
 0x376   : > { %v3096_v49 = vpop.f32.mrf.mxu0 }
 0x377   : > { %v3180_v31 = vpop.f32.mrf.mxu1 }
 0x37c   : > { %v3020_v53 = vpop.f32.mrf.mxu3 }
 0x37d   : > { %v4974_v24 = vpop.f32.mrf.mxu2  ;;  %v3021_v26 = vadd.f32 %v3020_v53, %v4956_v18 }
 0x37e   : > { %v3098_v27 = vpop.f32.mrf.mxu0 }
 0x37f   : > { %v3182_v55 = vpop.f32.mrf.mxu1  ;;  %v3099_v56 = vadd.f32 %v3098_v27, %v4952_v5 }
 0x381   : > { %v3143_v22 = vmul.f32 %v4927_v11, %v3099_v56 }
 0x384   : > { %v3022_v19 = vpop.f32.mrf.mxu3 }
 0x385   : > { %v3266_v35 = vpop.f32.mrf.mxu2  ;;  %v3023_v25 = vadd.f32 %v3022_v19, %v4956_v18  ;;  %v3064_v19 = vmul.f32 %v4935_v23, %v3016_v51  ;;  %v3322_v51 = vlaneseq }
 0x387   : > { %v3101_v61 = vpop.f32.mrf.mxu0  ;;  %v3067_v1 = vmul.f32 %v4893_v12, %v3023_v25 }
 0x388   : > { %v3185_v15 = vpop.f32.mrf.mxu1  ;;  %v3102_v37 = vadd.f32 %v3101_v61, %v4952_v5  ;;  %v3097_v61 = vadd.f32 %v3096_v49, %v4952_v5 }
 0x389   : > { %v3186_v21 = vadd.f32 %v3185_v15, %v4954_v50  ;;  %v3151_v25 = vadd.f32 %v3143_v22, %v3067_v1 }
 0x38a   : > { %v3144_v27 = vmul.f32 %v4890_v60, %v3102_v37 }
 0x38d   : > { %v3025_v41 = vpop.f32.mrf.mxu3 }
 0x38e   : > { %v3269_v36 = vpop.f32.mrf.mxu2  ;;  %v3026_v30 = vadd.f32 %v3025_v41, %v4956_v18  ;;  %v3176_v41 = vadd.f32 %v3175_v59, %v4954_v50 }
 0x38f   : > { %v3103_v2 = vpop.f32.mrf.mxu0 }
 0x390   : > { %v3187_v0 = vpop.f32.mrf.mxu1  ;;  %v3068_v9 = vmul.f32 %v4899_v52, %v3026_v30  ;;  %v3104_v46 = vadd.f32 %v3103_v2, %v4952_v5  ;;  %v3065_v52 = vmul.f32 %v4913_v42, %v3018_v34  ;;  %v3066_v30 = vmul.f32 %v4915_v6, %v3021_v26  ;;  %v3196_v2 = vpop.permute.xlu1 %3195 }
 0x391   : > { %v3188_v43 = vadd.f32 %v3187_v0, %v4954_v50  ;;  %v3183_v5 = vadd.f32 %v3182_v55, %v4954_v50  ;;  %v3142_v0 = vmul.f32 %v4917_v3, %v3097_v61  ;;  %v3228_v42 = vmul.f32 %v4911_v4, %v3186_v21  ;;  %v5142_v21 = vld [vmem:[#allocation6_spill] sm:$0xff] }
 0x392   : > { %v3152_v12 = vadd.f32 %v3144_v27, %v3068_v9  ;;  %v3145_v49 = vmul.f32 %v4921_v54, %v3104_v46  ;;  %v3270_v6 = vadd.f32 %v3269_v36, %v4959_v17  ;;  %v3323_v55 = vshrl.u32 %v3322_v51, 7 }
 0x393   : > { %v3229_v11 = vmul.f32 %v4903_v8, %v3188_v43  ;;  %v3141_v54 = vmul.f32 %v4933_v10, %v3094_v20  ;;  %v3150_v37 = vadd.f32 %v3142_v0, %v3066_v30  ;;  %v3227_v26 = vmul.f32 %v4905_v32, %v3183_v5  ;;  %v5144_v30 = vld [vmem:[#allocation7_spill] sm:$0xff] }
 0x394   : > { %v3267_v3 = vadd.f32 %v3266_v35, %v4959_v17  ;;  %v3236_v4 = vadd.f32 %v3228_v42, %v3152_v12  ;;  %v3140_v36 = vmul.f32 %v4925_v29, %v3092_v47  ;;  %v3265_v43 = vadd.f32 %v4974_v24, %v4959_v17 }
 0x395   : > { %v3027_v53 = vpop.f32.mrf.mxu3  ;;  %v3149_v9 = vadd.f32 %v3141_v54, %v3065_v52  ;;  %v3312_v10 = vmul.f32 %v4923_v39, %v3270_v6  ;;  %v3235_v46 = vadd.f32 %v3227_v26, %v3151_v25  ;;  %v3326_v20 = vmul.u32 16, %v3323_v55 }
 0x396   : > { %v3028_v59 = vadd.f32 %v3027_v53, %v4956_v18  ;;  %v3271_v23 = vpop.f32.mrf.mxu2  ;;  %v3181_v18 = vadd.f32 %v3180_v31, %v4954_v50  ;;  %v3139_v32 = vmul.f32 %v4945_v33, %v3089_v58  ;;  %v3173_v35 = vadd.f32 %v4964_v57, %v4954_v50 }
 0x397   : > { %v3272_v60 = vadd.f32 %v3271_v23, %v4959_v17  ;;  %v3262_v29 = vadd.f32 %v4972_v13, %v4959_v17  ;;  %v3320_v24 = vadd.f32 %v3312_v10, %v3236_v4  ;;  %v3224_v1 = vmul.f32 %v4937_v45, %v3176_v41 }
 0x398   : > { %v3069_v15 = vmul.f32 %v4883_v63, %v3028_v59  ;;  %v3178_v63 = vadd.f32 %v3177_v14, %v4954_v50  ;;  %v3226_v8 = vmul.f32 %v4929_v40, %v3181_v18  ;;  %v3311_v40 = vmul.f32 %v4919_v48, %v3267_v3  ;;  %v3280_v45 = vpop.permute.xlu1 %3279  ;;  %v5143_v59 = vld [vmem:[#allocation5_spill] sm:$0xff] }
 0x399   : > { %v3313_v56 = vmul.f32 %v4901_v16, %v3272_v60  ;;  %v3148_v16 = vadd.f32 %v3140_v36, %v3064_v19  ;;  %v3147_v39 = vadd.f32 %v3139_v32, %v4982_v62  ;;  %v3260_v33 = vadd.f32 %v4970_v38, %v4959_v17 }
 0x39a   : > { %v3153_v34 = vadd.f32 %v3145_v49, %v3069_v15  ;;  %v3225_v61 = vmul.f32 %v4943_v7, %v3178_v63  ;;  %v3234_v47 = vadd.f32 %v3226_v8, %v3150_v37  ;;  %v3310_v50 = vmul.f32 %v4941_v44, %v3265_v43 }
 0x39b   : > { %v3319_v57 = vadd.f32 %v3311_v40, %v3235_v46  ;;  %v3325_v58 = vand.u32 127, %v3322_v51  ;;  %v3328_v19 = vadd.s32 16, %v3326_v20  ;;  %v3223_v13 = vmul.f32 %v3196_v2, %v3173_v35 }
 0x39c   : > { %v3237_v31 = vadd.f32 %v3229_v11, %v3153_v34  ;;  %v3233_v7 = vadd.f32 %v3225_v61, %v3149_v9  ;;  %v3257_v48 = vadd.f32 %v4968_v28, %v4959_v17  ;;  %v3309_v53 = vmul.f32 %v5142_v21, %v3262_v29 }
 0x39d   : > { %v3318_v62 = vadd.f32 %v3310_v50, %v3234_v47  ;;  %v3232_v27 = vadd.f32 %v3224_v1, %v3148_v16  ;;  %v3231_v41 = vadd.f32 %v3223_v13, %v3147_v39  ;;  %v3308_v38 = vmul.f32 %v5143_v59, %v3260_v33 }
 0x39e   : > { %v3321_v14 = vadd.f32 %v3313_v56, %v3237_v31  ;;  %v3317_v44 = vadd.f32 %v3309_v53, %v3233_v7  ;;  %vm3327_vm12 = vcmp.ge.s32.totalorder %v3325_v58, %v3326_v20  ;;  %vm3329_vm13 = vcmp.lt.s32.totalorder %v3325_v58, %v3328_v19 }
 0x39f   : > { %v3307_v23 = vmul.f32 %v3280_v45, %v3257_v48  ;;  %v3316_v51 = vadd.f32 %v3308_v38, %v3232_v27  ;;  %vm3330_vm3 = vmand %vm3327_vm12, %vm3329_vm13  ;;  %v3737_v17 = vmov 0.0  }
 0x3a0   : > { %3344 = vmatpush.msra.mxu3 %v3321_v14  ;;  %v3331_v28 = vsel %vm3330_vm3, 0.0625, %v3737_v17 }
 0x3a1   : > { %v3315_v52 = vadd.f32 %v3307_v23, %v3231_v41 }
 0x3a2   : > { %3345 = vmatpush.msra.mxu3 %v3320_v24 }
 0x3a4   : > { %3346 = vmatpush.msra.mxu3 %v3319_v57 }
 0x3a6   : > { %3347 = vmatpush.msra.mxu3 %v3318_v62 }
 0x3a8   : > { %3348 = vmatpush.msra.mxu3 %v3317_v44 }
 0x3aa   : > { %3349 = vmatpush.msra.mxu3 %v3316_v51 }
 0x3ac   : > { %3350 = vmatpush.msra.mxu3 %v3315_v52 }
 0x3ae   : > { %3351 = vmatpush.msra.mxu3 %v5144_v30 }
 0x3af   : > { %3527 = vmatmul.msk.f32.vlgmr.msra.gmra.mxu3 %vm3332_vm6, %v3331_v28 }
 0x432   : > { %v3353_v22 = vpop.f32.mrf.mxu3 }
 0x433   : > { %v3356_v5 = vmax.f32 %v3353_v22, 0.0 }
 0x435   : > { %v3358_v12 = vrot.slane %v3356_v5, 1  ;;  %v3366_v49 = vrot.slane %v3356_v5, 3  ;;  %v3362_v15 = vrot.slane %v3356_v5, 2 }
 0x437   : > { %3359 = vrot.lane.b32.xlu1 %v3358_v12, %s3738_s28  ;;  %3367 = vrot.lane.b32.xlu0 %v3366_v49, %s3739_s29 }
 0x438   : > { %3363 = vrot.lane.b32.xlu2 %v3362_v15, %s3740_s25 }
 0x492   : > { %v3364_v18 = vpop.permute.xlu2 %3363 }
 0x4a9   : > { %v3360_v60 = vpop.permute.xlu1 %3359  ;;  %v3368_v42 = vpop.permute.xlu0 %3367 }
 0x4aa   : > { %v3371_v0 = vsel %vm3370_vm15, %v3356_v5, %v3360_v60 }
 0x4ab   : > { %v3372_v25 = vsel %vm5145_vm0, %v3371_v0, %v3364_v18 }
 0x4ac   : > { %v3374_v6 = vsel %vm3373_vm1, %v3372_v25, %v3368_v42 }
 0x4ad   : > { %3376 = vst.msk [vmem:[%s135_s6] sm:$0x1] %vm3375_vm14, %v3374_v6 }
 0x4ae   : > { %3689 = shalt.err (!%p3686_p3)
}
 0x4af   : > { %3533 = dma.vmem_to_hbm [thread:$0]  (%p3794_p5), %s3389_s7, 16, %s3391_s8, %s3378_s14  }
 0x4b0 PF: > { %p3539_p4 = scmp.ge.s32.totalorder %s3724_s12, 2  ;;  %s3402_s26 = sand.u32 1, %s3712_s9  }
 0x4b1   : > { %s3403_s27 = scalar_lea.sflag [#allocation3], %s3402_s26 }
 0x4b2   : > { %p3536_p7 = pnand %p3539_p4, %p3798_p6 }
 0x4b4   : > { %p3537_p8 = pneg %p3536_p7 }
 0x4b6   : > { %3707 = dma.done.wait (%p3537_p8), %s3403_s27, 16  }
 0x4b7   : > { %3709 = vsyncadd (%p3537_p8), %s3403_s27, 4294967280  ;;  %p12_p9 = scmp.ge.s32.totalorder %s3781_s15, 4   ;;  %s5146_s9 = smov %s3716_s10 }
 0x4b8   : > { %s5147_s10 = smov %s3720_s11  ;;  %s5148_s11 = smov %s3792_s18 }
 0x4b9   : > { %s5149_s12 = smov %s3781_s15  ;;  %14 = sbr.rel (!%p12_p9) target bundleno = 3 (0x3), region = 63 }
 0x4be   :  { %3408 = vsyncpa [#allocation3], 1 }
 0x4bf   :  { %3410 = vsyncpa [#allocation3 + $0x1], 1 }

</bundles_post_ra>
